<compile_context>
chip_gen: v7x
topology: tpu7x:2x2x1
jax: 0.10.0
libtpu: 0.0.40
codegen_flags: <defaults>
</compile_context>

<pallas_src>
import functools
import math

import jax
import jax.numpy as jnp
from jax.experimental import pallas as pl
from jax.experimental.pallas import tpu as pltpu

# ----------------------------- config ---------------------------------------
B = 2          # batch
S_SRC = 8      # source sequence length
S_TGT = 8      # target sequence length
EMB = 32       # embed_dim (encoder.emb_dim)
HIDDEN = 32    # encoder.hidden_dim == LSTM hidden size == PositionWiseFC hidden
VOCAB = 16     # decoder.output_dim
NUM_HEADS = 4
N_LAYERS = 1
EPS = 1e-5
NEG_FILL = -1e30   # finite mask fill (robust to fully-masked rows)


# ----------------------------- parameter layout -------------------------------
def _layout(n_layers, E, H, V):
    """Ordered list of (name, kind, width) blocks for the two packed slabs."""
    blocks = []
    w = lambda n, c: blocks.append((n, "w", c))
    b = lambda n, c: blocks.append((n, "b", c))
    for l in range(n_layers):
        w(f"enc{l}.att.wqkv", 3 * E); b(f"enc{l}.att.bqkv", 3 * E)
        w(f"enc{l}.att.wo", E);       b(f"enc{l}.att.bo", E)
        b(f"enc{l}.fc.ln1g", E); b(f"enc{l}.fc.ln1b", E)
        b(f"enc{l}.fc.ln2g", E); b(f"enc{l}.fc.ln2b", E)
        w(f"enc{l}.fc.w1", H);   b(f"enc{l}.fc.b1", H)
        w(f"enc{l}.fc.w2", E);   b(f"enc{l}.fc.b2", E)
    for l in range(n_layers):
        b(f"dec{l}.ln1g", E); b(f"dec{l}.ln1b", E)
        b(f"dec{l}.ln2g", E); b(f"dec{l}.ln2b", E)
        w(f"dec{l}.self.wqkv", 3 * E); b(f"dec{l}.self.bqkv", 3 * E)
        w(f"dec{l}.self.wo", E);       b(f"dec{l}.self.bo", E)
        w(f"dec{l}.cross.wq", E);      b(f"dec{l}.cross.bq", E)
        w(f"dec{l}.cross.wkv", 2 * E); b(f"dec{l}.cross.bkv", 2 * E)
        w(f"dec{l}.cross.wo", E);      b(f"dec{l}.cross.bo", E)
        b(f"dec{l}.fc.ln1g", E); b(f"dec{l}.fc.ln1b", E)
        b(f"dec{l}.fc.ln2g", E); b(f"dec{l}.fc.ln2b", E)
        w(f"dec{l}.fc.w1", H);   b(f"dec{l}.fc.b1", H)
        w(f"dec{l}.fc.w2", E);   b(f"dec{l}.fc.b2", E)
    w("enc_lstm.wih", 4 * H); w("enc_lstm.whh", 4 * H); b("enc_lstm.b", 4 * H)
    w("dec_lstm.wih", 4 * H); w("dec_lstm.whh", 4 * H); b("dec_lstm.b", 4 * H)
    w("out.w", V); b("out.b", V)
    return blocks


def _offsets(blocks):
    """Static (offset, width) per weight name and (row, width) per bias name."""
    w_off, b_off = {}, {}
    wj = bi = 0
    for name, kind, c in blocks:
        assert c <= 128
        if kind == "w":
            w_off[name] = (wj * 128, c)
            wj += 1
        else:
            b_off[name] = (bi, c)
            bi += 1
    return w_off, b_off, wj, bi


def _named_params(params, n_layers):
    """Map the structured param dict to layout names, fusing QKV / KV projections."""
    a = {}
    for l in range(n_layers):
        pa = params["enc_attn"][l]
        a[f"enc{l}.att.wqkv"] = jnp.concatenate([pa["wq"], pa["wk"], pa["wv"]], axis=1)
        a[f"enc{l}.att.bqkv"] = jnp.concatenate([pa["bq"], pa["bk"], pa["bv"]], axis=1)
        a[f"enc{l}.att.wo"], a[f"enc{l}.att.bo"] = pa["wo"], pa["bo"]
        pf = params["enc_fc"][l]
        a[f"enc{l}.fc.ln1g"], a[f"enc{l}.fc.ln1b"] = pf["ln1"]["g"], pf["ln1"]["b"]
        a[f"enc{l}.fc.ln2g"], a[f"enc{l}.fc.ln2b"] = pf["ln2"]["g"], pf["ln2"]["b"]
        a[f"enc{l}.fc.w1"], a[f"enc{l}.fc.b1"] = pf["w1"], pf["b1"]
        a[f"enc{l}.fc.w2"], a[f"enc{l}.fc.b2"] = pf["w2"], pf["b2"]
        pd = params["dec_attn"][l]
        a[f"dec{l}.ln1g"], a[f"dec{l}.ln1b"] = pd["ln1"]["g"], pd["ln1"]["b"]
        a[f"dec{l}.ln2g"], a[f"dec{l}.ln2b"] = pd["ln2"]["g"], pd["ln2"]["b"]
        ps = pd["self"]
        a[f"dec{l}.self.wqkv"] = jnp.concatenate([ps["wq"], ps["wk"], ps["wv"]], axis=1)
        a[f"dec{l}.self.bqkv"] = jnp.concatenate([ps["bq"], ps["bk"], ps["bv"]], axis=1)
        a[f"dec{l}.self.wo"], a[f"dec{l}.self.bo"] = ps["wo"], ps["bo"]
        pc = pd["cross"]
        a[f"dec{l}.cross.wq"], a[f"dec{l}.cross.bq"] = pc["wq"], pc["bq"]
        a[f"dec{l}.cross.wkv"] = jnp.concatenate([pc["wk"], pc["wv"]], axis=1)
        a[f"dec{l}.cross.bkv"] = jnp.concatenate([pc["bk"], pc["bv"]], axis=1)
        a[f"dec{l}.cross.wo"], a[f"dec{l}.cross.bo"] = pc["wo"], pc["bo"]
        pf = params["dec_fc"][l]
        a[f"dec{l}.fc.ln1g"], a[f"dec{l}.fc.ln1b"] = pf["ln1"]["g"], pf["ln1"]["b"]
        a[f"dec{l}.fc.ln2g"], a[f"dec{l}.fc.ln2b"] = pf["ln2"]["g"], pf["ln2"]["b"]
        a[f"dec{l}.fc.w1"], a[f"dec{l}.fc.b1"] = pf["w1"], pf["b1"]
        a[f"dec{l}.fc.w2"], a[f"dec{l}.fc.b2"] = pf["w2"], pf["b2"]
    a["enc_lstm.wih"] = params["enc_lstm"]["wih"]
    a["enc_lstm.whh"] = params["enc_lstm"]["whh"]
    a["enc_lstm.b"] = params["enc_lstm"]["b"]
    a["dec_lstm.wih"] = params["dec_lstm"]["wih"]
    a["dec_lstm.whh"] = params["dec_lstm"]["whh"]
    a["dec_lstm.b"] = params["dec_lstm"]["b"]
    a["out.w"], a["out.b"] = params["dec_out"]["w"], params["dec_out"]["b"]
    return a


def pack_params(params, n_layers=N_LAYERS, E=EMB, H=HIDDEN, V=VOCAB):
    """One-time packing of all parameters into 2 contiguous slabs (done at init)."""
    assert E == H, "packed weight slab assumes emb_dim == hidden_dim"
    blocks = _layout(n_layers, E, H, V)
    w_off, b_off, n_w, n_b = _offsets(blocks)
    named = _named_params(params, n_layers)
    n_b_pad = -(-n_b // 8) * 8
    w_slab = jnp.zeros((E, 128 * n_w), jnp.float32)
    b_slab = jnp.zeros((n_b_pad, 128), jnp.float32)
    for name, kind, c in blocks:
        arr = jnp.asarray(named[name], jnp.float32)
        if kind == "w":
            off, _ = w_off[name]
            w_slab = w_slab.at[:, off:off + c].set(arr)
        else:
            row, _ = b_off[name]
            b_slab = b_slab.at[row, 0:c].set(arr.reshape(c))
    return {"w": w_slab, "b": b_slab}


# ----------------------------- fused kernel ----------------------------------
def seq2seq_kernel(src_ref, tgt_ref, len_src_ref, len_tgt_ref, w_ref, b_ref, out_ref,
                   *, n_layers, num_heads, hidden_dim, out_dim, w_off, b_off):
    f32 = jnp.float32
    src = src_ref[...]
    tgt = tgt_ref[...]
    Bb, Ss, E = src.shape
    St = tgt.shape[1]
    H = hidden_dim
    nh = num_heads
    D = E // nh
    scale = D ** -0.5

    # --- packed-parameter accessors: static, 128-lane-aligned VMEM ref slices ---
    def W(name):
        off, width = w_off[name]
        return w_ref[:, off:off + width]

    def Bv(name):
        row, width = b_off[name]
        return b_ref[row:row + 1, 0:width]

    # --- per-batch lengths from SMEM scalars -> (B,1) int32 columns ---
    def lens_col(len_ref):
        iota_b = jax.lax.broadcasted_iota(jnp.int32, (Bb, 1), 0)
        lens = jnp.zeros((Bb, 1), jnp.int32)
        for bb in range(Bb):
            lens = jnp.where(iota_b == bb, len_ref[bb], lens)
        return lens

    ls = lens_col(len_src_ref)          # (B,1)
    lt = lens_col(len_tgt_ref)          # (B,1)

    # --- masks (key-only for enc/cross, key & causal for decoder self) ---
    src_key = jax.lax.broadcasted_iota(jnp.int32, (Bb, Ss), 1) < ls        # (B,Ss)
    tgt_key = jax.lax.broadcasted_iota(jnp.int32, (Bb, St), 1) < lt        # (B,St)
    causal = (jax.lax.broadcasted_iota(jnp.int32, (St, St), 1)
              <= jax.lax.broadcasted_iota(jnp.int32, (St, St), 0))         # (St,St)
    enc_mask = src_key[:, None, :]
    ed_mask = src_key[:, None, :]
    dec_self_mask = jnp.logical_and(tgt_key[:, None, :], causal[None, :, :])

    # --- small fused primitives ---
    def _ln(x, g, b):
        m = jnp.mean(x, axis=-1, keepdims=True)
        v = jnp.mean(jnp.square(x - m), axis=-1, keepdims=True)
        return (x - m) * jax.lax.rsqrt(v + EPS) * g + b

    def _linear(x, w, b):
        shp = x.shape
        y = jnp.dot(x.reshape(-1, shp[-1]), w, preferred_element_type=f32) + b
        return y.reshape(shp[:-1] + (w.shape[-1],))

    def _attention(q, k, v, mask, wo, bo):
        # Per-head scores/softmax/context; heads are merged by accumulating through the
        # matching 8-row slice of wo (no lane concat of context heads).
        S1 = q.shape[1]
        out = jnp.zeros((Bb, S1, E), f32) + bo
        for h in range(nh):
            sl = slice(h * D, (h + 1) * D)
            s = jnp.einsum("bqd,bkd->bqk", q[..., sl], k[..., sl],
                           preferred_element_type=f32) * scale
            s = jnp.where(mask, s, NEG_FILL)
            s = s - jnp.max(s, axis=-1, keepdims=True)
            e = jnp.exp(s)
            p = e / jnp.sum(e, axis=-1, keepdims=True)                    # exact softmax
            ctx = jnp.einsum("bqk,bkd->bqd", p, v[..., sl],
                             preferred_element_type=f32)                  # (B,S1,D)
            out = out + jnp.dot(ctx.reshape(Bb * S1, D), wo[sl, :],
                                preferred_element_type=f32).reshape(Bb, S1, E)
        return out

    def _self_mha(x, mask, pfx):
        y = _linear(x, W(pfx + ".wqkv"), Bv(pfx + ".bqkv"))               # fused QKV
        return _attention(y[..., 0:E], y[..., E:2 * E], y[..., 2 * E:3 * E],
                          mask, W(pfx + ".wo"), Bv(pfx + ".bo"))

    def _cross_mha(q_in, kv_in, mask, pfx):
        q = _linear(q_in, W(pfx + ".wq"), Bv(pfx + ".bq"))
        kv = _linear(kv_in, W(pfx + ".wkv"), Bv(pfx + ".bkv"))            # fused KV
        return _attention(q, kv[..., 0:E], kv[..., E:2 * E],
                          mask, W(pfx + ".wo"), Bv(pfx + ".bo"))

    def _pwfc(x, att, pfx):
        h1 = _ln(x + att, Bv(pfx + ".ln1g"), Bv(pfx + ".ln1b"))
        ff = jnp.maximum(_linear(h1, W(pfx + ".w1"), Bv(pfx + ".b1")), 0.0)
        ff = _linear(ff, W(pfx + ".w2"), Bv(pfx + ".b2"))
        return _ln(h1 + ff, Bv(pfx + ".ln2g"), Bv(pfx + ".ln2b"))

    def _lstm_cell(gates, c):
        sig = jax.nn.sigmoid(gates)           # whole-vreg (B, 4H) nonlinearities
        th = jnp.tanh(gates)
        i_g = sig[:, 0:H]
        f_g = sig[:, H:2 * H]
        g_g = th[:, 2 * H:3 * H]
        o_g = sig[:, 3 * H:4 * H]
        c_new = f_g * c + i_g * g_g
        return o_g * jnp.tanh(c_new), c_new

    # --- encoder self-attention stack ---
    x_src = src
    for l in range(n_layers):
        att = _self_mha(x_src, enc_mask, f"enc{l}.att")
        x_src = _pwfc(x_src, att, f"enc{l}.fc")

    # --- decoder attention stack (dropout == identity in eval) ---
    x_tgt = tgt
    for l in range(n_layers):
        xn = _ln(x_tgt, Bv(f"dec{l}.ln1g"), Bv(f"dec{l}.ln1b"))
        sa = _self_mha(xn, dec_self_mask, f"dec{l}.self")
        y = x_tgt + sa
        yn = _ln(y, Bv(f"dec{l}.ln2g"), Bv(f"dec{l}.ln2b"))
        ed = _cross_mha(yn, x_src, ed_mask, f"dec{l}.cross")
        # matches torch: PositionWiseFC(tgt, tgt+sa+ed) => norm1(2*tgt + sa + ed)
        x_tgt = _pwfc(x_tgt, y + ed, f"dec{l}.fc")

    # --- encoder LSTM (time-major recurrence, packed-sequence length masking) ---
    wih_e, whh_e = W("enc_lstm.wih"), W("enc_lstm.whh")
    gx = (jnp.dot(jnp.transpose(x_src, (1, 0, 2)).reshape(Ss * Bb, E), wih_e,
                  preferred_element_type=f32)
          + Bv("enc_lstm.b")).reshape(Ss, Bb, 4 * H)
    h = jnp.zeros((Bb, H), f32)
    c = jnp.zeros((Bb, H), f32)
    for t in range(Ss):                              # static unroll of the recurrence
        gates = gx[t] + jnp.dot(h, whh_e, preferred_element_type=f32)
        h_new, c_new = _lstm_cell(gates, c)
        upd = ls > t                                 # (B,1): only valid timesteps update
        h = jnp.where(upd, h_new, h)
        c = jnp.where(upd, c_new, c)

    # --- teacher-forced decoder LSTM; output FC hoisted out of the time loop ---
    wih_d, whh_d = W("dec_lstm.wih"), W("dec_lstm.whh")
    gxd = (jnp.dot(jnp.transpose(x_tgt, (1, 0, 2)).reshape(St * Bb, E), wih_d,
                   preferred_element_type=f32)
           + Bv("dec_lstm.b")).reshape(St, Bb, 4 * H)
    hs = []
    for t in range(1, St):
        gates = gxd[t - 1] + jnp.dot(h, whh_d, preferred_element_type=f32)
        h, c = _lstm_cell(gates, c)
        hs.append(h)
    hs = jnp.stack(hs, axis=0)                                   # (St-1, B, H) time-major
    logits = (jnp.dot(hs.reshape((St - 1) * Bb, H), W("out.w"),
                      preferred_element_type=f32) + Bv("out.b")
              ).reshape(St - 1, Bb, out_dim)

    # --- lane-dense (B, St*V) output row; t=0 slot is zeros per Seq2Seq.forward ---
    pieces = [jnp.zeros((Bb, out_dim), f32)]
    for t in range(St - 1):
        pieces.append(logits[t])
    out_ref[...] = jnp.concatenate(pieces, axis=-1)              # single (B, 128) store


# ----------------------------- wrapper ----------------------------------------
def seq2seq_forward(packed, src, tgt, lengths_src, lengths_tgt):
    Bb, St, _ = tgt.shape
    Ss = src.shape[1]
    w_off, b_off, _, _ = _offsets(_layout(N_LAYERS, EMB, HIDDEN, VOCAB))
    len_s = jnp.minimum(lengths_src.astype(jnp.int32), Ss)
    len_t = jnp.minimum(lengths_tgt.astype(jnp.int32), St)
    kernel = functools.partial(
        seq2seq_kernel, n_layers=N_LAYERS, num_heads=NUM_HEADS,
        hidden_dim=HIDDEN, out_dim=VOCAB, w_off=w_off, b_off=b_off)
    vmem = pl.BlockSpec(memory_space=pltpu.MemorySpace.VMEM)
    smem = pl.BlockSpec(memory_space=pltpu.MemorySpace.SMEM)
    # Single fused call, no grid: 6 inputs total (2 activations, 2 SMEM length scalars,
    # 2 packed parameter slabs) instead of ~54 per-tensor DMAs.
    out_flat = pl.pallas_call(
        kernel,
        out_shape=jax.ShapeDtypeStruct((Bb, St * VOCAB), jnp.float32),
        in_specs=[vmem, vmem, smem, smem, vmem, vmem],
        out_specs=vmem,
    )(src, tgt, len_s, len_t, packed["w"], packed["b"])
    return out_flat.reshape(Bb, St, VOCAB)


# ----------------------------- parameter init --------------------------------
def init_linear(key, in_dim, out_dim):
    k1, k2 = jax.random.split(key)
    bound = 1.0 / math.sqrt(in_dim)
    w = jax.random.uniform(k1, (in_dim, out_dim), jnp.float32, -bound, bound)  # pre-transposed
    b = jax.random.uniform(k2, (1, out_dim), jnp.float32, -bound, bound)
    return w, b


def init_mha(key, E):
    p = {}
    for name, kk in zip(("q", "k", "v", "o"), jax.random.split(key, 4)):
        w, b = init_linear(kk, E, E)
        p["w" + name], p["b" + name] = w, b
    return p


def init_ln(key, E):
    k1, k2 = jax.random.split(key)
    return {"g": 1.0 + 0.02 * jax.random.normal(k1, (1, E), jnp.float32),
            "b": 0.02 * jax.random.normal(k2, (1, E), jnp.float32)}


def init_pwfc(key, E, Hf):
    k1, k2, k3, k4 = jax.random.split(key, 4)
    w1, b1 = init_linear(k3, E, Hf)
    w2, b2 = init_linear(k4, Hf, E)
    return {"ln1": init_ln(k1, E), "ln2": init_ln(k2, E),
            "w1": w1, "b1": b1, "w2": w2, "b2": b2}


def init_lstm(key, in_dim, H):
    k1, k2, k3, k4 = jax.random.split(key, 4)
    bound = 1.0 / math.sqrt(H)
    return {"wih": jax.random.uniform(k1, (in_dim, 4 * H), jnp.float32, -bound, bound),
            "whh": jax.random.uniform(k2, (H, 4 * H), jnp.float32, -bound, bound),
            "b": (jax.random.uniform(k3, (1, 4 * H), jnp.float32, -bound, bound)
                  + jax.random.uniform(k4, (1, 4 * H), jnp.float32, -bound, bound))}


def init_params(key, E, Hf, H, V, n_layers):
    keys = iter(jax.random.split(key, 7 * n_layers + 3))
    params = {"enc_attn": [], "enc_fc": [], "dec_attn": [], "dec_fc": []}
    for _ in range(n_layers):
        params["enc_attn"].append(init_mha(next(keys), E))
        params["enc_fc"].append(init_pwfc(next(keys), E, Hf))
        params["dec_attn"].append({"self": init_mha(next(keys), E),
                                   "cross": init_mha(next(keys), E),
                                   "ln1": init_ln(next(keys), E),
                                   "ln2": init_ln(next(keys), E)})
        params["dec_fc"].append(init_pwfc(next(keys), E, Hf))
    params["enc_lstm"] = init_lstm(next(keys), E, H)
    params["dec_lstm"] = init_lstm(next(keys), E, H)
    w, b = init_linear(next(keys), H, V)
    params["dec_out"] = {"w": w, "b": b}
    return params


# ----------------------------- main ------------------------------------------
if __name__ == "__main__":
    key = jax.random.PRNGKey(0)
    k_src, k_tgt, k_par = jax.random.split(key, 3)

    lengths_src = jnp.array([S_SRC, S_SRC - 2], jnp.int32)
    lengths_tgt = jnp.array([S_TGT, S_TGT - 3], jnp.int32)

    src = jax.random.normal(k_src, (B, S_SRC, EMB), jnp.float32)
    tgt = jax.random.normal(k_tgt, (B, S_TGT, EMB), jnp.float32)
    # mimic pad_sequence(padding_value=0): zero out positions beyond each length
    src = src * (jnp.arange(S_SRC)[None, :, None] < lengths_src[:, None, None])
    tgt = tgt * (jnp.arange(S_TGT)[None, :, None] < lengths_tgt[:, None, None])

    params = init_params(k_par, EMB, HIDDEN, HIDDEN, VOCAB, N_LAYERS)
    packed = pack_params(params)   # one-time packing into 2 contiguous slabs

    out = jax.jit(seq2seq_forward)(packed, src, tgt, lengths_src, lengths_tgt)
    jax.block_until_ready(out)
    assert out.shape == (B, S_TGT, VOCAB)
    assert bool(jnp.all(jnp.isfinite(out)))
    print("KERNEL_OK")
</pallas_src>

<mosaic_0001>
module attributes {stable_mosaic.version = 11 : i64} {
  func.func @seq2seq_kernel(%arg0: memref<2x8x32xf32, #tpu.memory_space<vmem>>, %arg1: memref<2x8x32xf32, #tpu.memory_space<vmem>>, %arg2: memref<2xi32, #tpu.memory_space<smem>>, %arg3: memref<2xi32, #tpu.memory_space<smem>>, %arg4: memref<32x2048xf32, #tpu.memory_space<vmem>>, %arg5: memref<32x128xf32, #tpu.memory_space<vmem>>, %arg6: memref<2x128xf32, #tpu.memory_space<vmem>>) attributes {dimension_semantics = [], scalar_prefetch = 0 : i64, scratch_operands = 0 : i64, tpu.core_type = #tpu.core_type<tc>} {
    %c0 = arith.constant 0 : index
    %c0_0 = arith.constant 0 : index
    %c0_1 = arith.constant 0 : index
    %0 = vector.load %arg0[%c0, %c0_0, %c0_1] : memref<2x8x32xf32, #tpu.memory_space<vmem>>, vector<2x8x32xf32>
    %c0_2 = arith.constant 0 : index
    %c0_3 = arith.constant 0 : index
    %c0_4 = arith.constant 0 : index
    %1 = vector.load %arg1[%c0_2, %c0_3, %c0_4] : memref<2x8x32xf32, #tpu.memory_space<vmem>>, vector<2x8x32xf32>
    %2 = tpu.iota {dimensions = array<i32: 0>} : vector<2x1xi32>
    %c0_i32 = arith.constant 0 : i32
    %3 = vector.broadcast %c0_i32 : i32 to vector<2x1xi32>
    %c0_i32_5 = arith.constant 0 : i32
    %4 = vector.broadcast %c0_i32_5 : i32 to vector<2x1xi32>
    %5 = arith.cmpi eq, %2, %4 : vector<2x1xi32>
    %c0_6 = arith.constant 0 : index
    %6 = memref.load %arg2[%c0_6] : memref<2xi32, #tpu.memory_space<smem>>
    %7 = vector.broadcast %6 : i32 to vector<2x1xi32>
    %8 = arith.select %5, %7, %3 : vector<2x1xi1>, vector<2x1xi32>
    %c1_i32 = arith.constant 1 : i32
    %9 = vector.broadcast %c1_i32 : i32 to vector<2x1xi32>
    %10 = arith.cmpi eq, %2, %9 : vector<2x1xi32>
    %c1 = arith.constant 1 : index
    %11 = memref.load %arg2[%c1] : memref<2xi32, #tpu.memory_space<smem>>
    %12 = vector.broadcast %11 : i32 to vector<2x1xi32>
    %13 = arith.select %10, %12, %8 : vector<2x1xi1>, vector<2x1xi32>
    %14 = tpu.iota {dimensions = array<i32: 0>} : vector<2x1xi32>
    %c0_i32_7 = arith.constant 0 : i32
    %15 = vector.broadcast %c0_i32_7 : i32 to vector<2x1xi32>
    %c0_i32_8 = arith.constant 0 : i32
    %16 = vector.broadcast %c0_i32_8 : i32 to vector<2x1xi32>
    %17 = arith.cmpi eq, %14, %16 : vector<2x1xi32>
    %c0_9 = arith.constant 0 : index
    %18 = memref.load %arg3[%c0_9] : memref<2xi32, #tpu.memory_space<smem>>
    %19 = vector.broadcast %18 : i32 to vector<2x1xi32>
    %20 = arith.select %17, %19, %15 : vector<2x1xi1>, vector<2x1xi32>
    %c1_i32_10 = arith.constant 1 : i32
    %21 = vector.broadcast %c1_i32_10 : i32 to vector<2x1xi32>
    %22 = arith.cmpi eq, %14, %21 : vector<2x1xi32>
    %c1_11 = arith.constant 1 : index
    %23 = memref.load %arg3[%c1_11] : memref<2xi32, #tpu.memory_space<smem>>
    %24 = vector.broadcast %23 : i32 to vector<2x1xi32>
    %25 = arith.select %22, %24, %20 : vector<2x1xi1>, vector<2x1xi32>
    %26 = tpu.iota {dimensions = array<i32: 1>} : vector<2x8xi32>
    %27 = vector.broadcast %13 : vector<2x1xi32> to vector<2x8xi32>
    %28 = arith.cmpi slt, %26, %27 : vector<2x8xi32>
    %29 = tpu.iota {dimensions = array<i32: 1>} : vector<2x8xi32>
    %30 = vector.broadcast %25 : vector<2x1xi32> to vector<2x8xi32>
    %31 = arith.cmpi slt, %29, %30 : vector<2x8xi32>
    %32 = tpu.iota {dimensions = array<i32: 1>} : vector<8x8xi32>
    %33 = tpu.iota {dimensions = array<i32: 0>} : vector<8x8xi32>
    %34 = arith.cmpi sle, %32, %33 : vector<8x8xi32>
    %35 = vector.shape_cast %28 : vector<2x8xi1> to vector<2x1x8xi1>
    %36 = vector.shape_cast %28 : vector<2x8xi1> to vector<2x1x8xi1>
    %37 = vector.shape_cast %31 : vector<2x8xi1> to vector<2x1x8xi1>
    %38 = vector.shape_cast %34 : vector<8x8xi1> to vector<1x8x8xi1>
    %39 = vector.broadcast %37 : vector<2x1x8xi1> to vector<2x8x8xi1>
    %40 = vector.broadcast %38 : vector<1x8x8xi1> to vector<2x8x8xi1>
    %41 = arith.andi %39, %40 : vector<2x8x8xi1>
    %c0_12 = arith.constant 0 : index
    %c0_13 = arith.constant 0 : index
    %42 = vector.load %arg4[%c0_12, %c0_13] : memref<32x2048xf32, #tpu.memory_space<vmem>>, vector<32x96xf32>
    %c0_14 = arith.constant 0 : index
    %c0_15 = arith.constant 0 : index
    %43 = vector.load %arg5[%c0_14, %c0_15] : memref<32x128xf32, #tpu.memory_space<vmem>>, vector<1x96xf32>
    %44 = vector.shape_cast %0 : vector<2x8x32xf32> to vector<16x32xf32>
    %cst = arith.constant dense<0.000000e+00> : vector<16x96xf32>
    %45 = tpu.matmul %44, %42, %cst {dimension_numbers = #tpu.dot_dimension_numbers<[1], [0], [0], [1], [0, 0, 1, 1], [], []>} : vector<16x32xf32>, vector<32x96xf32>, vector<16x96xf32> -> vector<16x96xf32>
    %46 = vector.broadcast %43 : vector<1x96xf32> to vector<16x96xf32>
    %47 = arith.addf %45, %46 : vector<16x96xf32>
    %48 = vector.shape_cast %47 : vector<16x96xf32> to vector<2x8x96xf32>
    %49 = vector.extract_strided_slice %48 {offsets = [0, 0, 0], sizes = [2, 8, 32], strides = [1, 1, 1]} : vector<2x8x96xf32> to vector<2x8x32xf32>
    %50 = vector.extract_strided_slice %48 {offsets = [0, 0, 32], sizes = [2, 8, 32], strides = [1, 1, 1]} : vector<2x8x96xf32> to vector<2x8x32xf32>
    %51 = vector.extract_strided_slice %48 {offsets = [0, 0, 64], sizes = [2, 8, 32], strides = [1, 1, 1]} : vector<2x8x96xf32> to vector<2x8x32xf32>
    %c0_16 = arith.constant 0 : index
    %c128 = arith.constant 128 : index
    %52 = vector.load %arg4[%c0_16, %c128] : memref<32x2048xf32, #tpu.memory_space<vmem>>, vector<32x32xf32>
    %c1_17 = arith.constant 1 : index
    %c0_18 = arith.constant 0 : index
    %53 = vector.load %arg5[%c1_17, %c0_18] : memref<32x128xf32, #tpu.memory_space<vmem>>, vector<1x32xf32>
    %cst_19 = arith.constant 0.000000e+00 : f32
    %54 = vector.broadcast %cst_19 : f32 to vector<2x8x32xf32>
    %55 = vector.shape_cast %53 : vector<1x32xf32> to vector<1x1x32xf32>
    %56 = vector.broadcast %55 : vector<1x1x32xf32> to vector<2x8x32xf32>
    %57 = arith.addf %54, %56 : vector<2x8x32xf32>
    %58 = vector.extract_strided_slice %49 {offsets = [0, 0, 0], sizes = [2, 8, 8], strides = [1, 1, 1]} : vector<2x8x32xf32> to vector<2x8x8xf32>
    %59 = vector.extract_strided_slice %50 {offsets = [0, 0, 0], sizes = [2, 8, 8], strides = [1, 1, 1]} : vector<2x8x32xf32> to vector<2x8x8xf32>
    "tpu.trace_start"() <{level = 10 : i32, message = "bqd,bkd->bqk"}> : () -> ()
    %cst_20 = arith.constant dense<0.000000e+00> : vector<2x8x8xf32>
    %60 = tpu.matmul %58, %59, %cst_20 {dimension_numbers = #tpu.dot_dimension_numbers<[2], [2], [1], [1], [0, 0, 0, 1, 1, 1], [0], [0]>} : vector<2x8x8xf32>, vector<2x8x8xf32>, vector<2x8x8xf32> -> vector<2x8x8xf32>
    "tpu.trace_stop"() : () -> ()
    %cst_21 = arith.constant 0.353553385 : f32
    %61 = vector.broadcast %cst_21 : f32 to vector<2x8x8xf32>
    %62 = arith.mulf %60, %61 : vector<2x8x8xf32>
    %cst_22 = arith.constant -1.000000e+30 : f32
    %63 = vector.shape_cast %35 : vector<2x1x8xi1> to vector<2x1x8xi1>
    %64 = vector.broadcast %63 : vector<2x1x8xi1> to vector<2x8x8xi1>
    %65 = vector.broadcast %cst_22 : f32 to vector<2x8x8xf32>
    %66 = arith.select %64, %62, %65 : vector<2x8x8xi1>, vector<2x8x8xf32>
    %cst_23 = arith.constant dense<0xFF800000> : vector<2x8xf32>
    %67 = vector.multi_reduction <maximumf>, %66, %cst_23 [2] : vector<2x8x8xf32> to vector<2x8xf32>
    %68 = vector.shape_cast %67 : vector<2x8xf32> to vector<2x8x1xf32>
    %69 = vector.broadcast %68 : vector<2x8x1xf32> to vector<2x8x8xf32>
    %70 = arith.subf %66, %69 : vector<2x8x8xf32>
    %71 = math.exp %70 : vector<2x8x8xf32>
    %cst_24 = arith.constant dense<0.000000e+00> : vector<2x8xf32>
    %72 = vector.multi_reduction <add>, %71, %cst_24 [2] : vector<2x8x8xf32> to vector<2x8xf32>
    %73 = vector.shape_cast %72 : vector<2x8xf32> to vector<2x8x1xf32>
    %74 = vector.broadcast %73 : vector<2x8x1xf32> to vector<2x8x8xf32>
    %75 = arith.divf %71, %74 : vector<2x8x8xf32>
    %76 = vector.extract_strided_slice %51 {offsets = [0, 0, 0], sizes = [2, 8, 8], strides = [1, 1, 1]} : vector<2x8x32xf32> to vector<2x8x8xf32>
    "tpu.trace_start"() <{level = 10 : i32, message = "bqk,bkd->bqd"}> : () -> ()
    %cst_25 = arith.constant dense<0.000000e+00> : vector<2x8x8xf32>
    %77 = tpu.matmul %75, %76, %cst_25 {dimension_numbers = #tpu.dot_dimension_numbers<[2], [1], [1], [2], [0, 0, 0, 1, 1, 2], [0], [0]>} : vector<2x8x8xf32>, vector<2x8x8xf32>, vector<2x8x8xf32> -> vector<2x8x8xf32>
    "tpu.trace_stop"() : () -> ()
    %78 = vector.shape_cast %77 : vector<2x8x8xf32> to vector<16x8xf32>
    %79 = vector.extract_strided_slice %52 {offsets = [0, 0], sizes = [8, 32], strides = [1, 1]} : vector<32x32xf32> to vector<8x32xf32>
    %cst_26 = arith.constant dense<0.000000e+00> : vector<16x32xf32>
    %80 = tpu.matmul %78, %79, %cst_26 {dimension_numbers = #tpu.dot_dimension_numbers<[1], [0], [0], [1], [0, 0, 1, 1], [], []>} : vector<16x8xf32>, vector<8x32xf32>, vector<16x32xf32> -> vector<16x32xf32>
    %81 = vector.shape_cast %80 : vector<16x32xf32> to vector<2x8x32xf32>
    %82 = arith.addf %57, %81 : vector<2x8x32xf32>
    %83 = vector.extract_strided_slice %49 {offsets = [0, 0, 8], sizes = [2, 8, 8], strides = [1, 1, 1]} : vector<2x8x32xf32> to vector<2x8x8xf32>
    %84 = vector.extract_strided_slice %50 {offsets = [0, 0, 8], sizes = [2, 8, 8], strides = [1, 1, 1]} : vector<2x8x32xf32> to vector<2x8x8xf32>
    "tpu.trace_start"() <{level = 10 : i32, message = "bqd,bkd->bqk"}> : () -> ()
    %cst_27 = arith.constant dense<0.000000e+00> : vector<2x8x8xf32>
    %85 = tpu.matmul %83, %84, %cst_27 {dimension_numbers = #tpu.dot_dimension_numbers<[2], [2], [1], [1], [0, 0, 0, 1, 1, 1], [0], [0]>} : vector<2x8x8xf32>, vector<2x8x8xf32>, vector<2x8x8xf32> -> vector<2x8x8xf32>
    "tpu.trace_stop"() : () -> ()
    %cst_28 = arith.constant 0.353553385 : f32
    %86 = vector.broadcast %cst_28 : f32 to vector<2x8x8xf32>
    %87 = arith.mulf %85, %86 : vector<2x8x8xf32>
    %cst_29 = arith.constant -1.000000e+30 : f32
    %88 = vector.shape_cast %35 : vector<2x1x8xi1> to vector<2x1x8xi1>
    %89 = vector.broadcast %88 : vector<2x1x8xi1> to vector<2x8x8xi1>
    %90 = vector.broadcast %cst_29 : f32 to vector<2x8x8xf32>
    %91 = arith.select %89, %87, %90 : vector<2x8x8xi1>, vector<2x8x8xf32>
    %cst_30 = arith.constant dense<0xFF800000> : vector<2x8xf32>
    %92 = vector.multi_reduction <maximumf>, %91, %cst_30 [2] : vector<2x8x8xf32> to vector<2x8xf32>
    %93 = vector.shape_cast %92 : vector<2x8xf32> to vector<2x8x1xf32>
    %94 = vector.broadcast %93 : vector<2x8x1xf32> to vector<2x8x8xf32>
    %95 = arith.subf %91, %94 : vector<2x8x8xf32>
    %96 = math.exp %95 : vector<2x8x8xf32>
    %cst_31 = arith.constant dense<0.000000e+00> : vector<2x8xf32>
    %97 = vector.multi_reduction <add>, %96, %cst_31 [2] : vector<2x8x8xf32> to vector<2x8xf32>
    %98 = vector.shape_cast %97 : vector<2x8xf32> to vector<2x8x1xf32>
    %99 = vector.broadcast %98 : vector<2x8x1xf32> to vector<2x8x8xf32>
    %100 = arith.divf %96, %99 : vector<2x8x8xf32>
    %101 = vector.extract_strided_slice %51 {offsets = [0, 0, 8], sizes = [2, 8, 8], strides = [1, 1, 1]} : vector<2x8x32xf32> to vector<2x8x8xf32>
    "tpu.trace_start"() <{level = 10 : i32, message = "bqk,bkd->bqd"}> : () -> ()
    %cst_32 = arith.constant dense<0.000000e+00> : vector<2x8x8xf32>
    %102 = tpu.matmul %100, %101, %cst_32 {dimension_numbers = #tpu.dot_dimension_numbers<[2], [1], [1], [2], [0, 0, 0, 1, 1, 2], [0], [0]>} : vector<2x8x8xf32>, vector<2x8x8xf32>, vector<2x8x8xf32> -> vector<2x8x8xf32>
    "tpu.trace_stop"() : () -> ()
    %103 = vector.shape_cast %102 : vector<2x8x8xf32> to vector<16x8xf32>
    %104 = vector.extract_strided_slice %52 {offsets = [8, 0], sizes = [8, 32], strides = [1, 1]} : vector<32x32xf32> to vector<8x32xf32>
    %cst_33 = arith.constant dense<0.000000e+00> : vector<16x32xf32>
    %105 = tpu.matmul %103, %104, %cst_33 {dimension_numbers = #tpu.dot_dimension_numbers<[1], [0], [0], [1], [0, 0, 1, 1], [], []>} : vector<16x8xf32>, vector<8x32xf32>, vector<16x32xf32> -> vector<16x32xf32>
    %106 = vector.shape_cast %105 : vector<16x32xf32> to vector<2x8x32xf32>
    %107 = arith.addf %82, %106 : vector<2x8x32xf32>
    %108 = vector.extract_strided_slice %49 {offsets = [0, 0, 16], sizes = [2, 8, 8], strides = [1, 1, 1]} : vector<2x8x32xf32> to vector<2x8x8xf32>
    %109 = vector.extract_strided_slice %50 {offsets = [0, 0, 16], sizes = [2, 8, 8], strides = [1, 1, 1]} : vector<2x8x32xf32> to vector<2x8x8xf32>
    "tpu.trace_start"() <{level = 10 : i32, message = "bqd,bkd->bqk"}> : () -> ()
    %cst_34 = arith.constant dense<0.000000e+00> : vector<2x8x8xf32>
    %110 = tpu.matmul %108, %109, %cst_34 {dimension_numbers = #tpu.dot_dimension_numbers<[2], [2], [1], [1], [0, 0, 0, 1, 1, 1], [0], [0]>} : vector<2x8x8xf32>, vector<2x8x8xf32>, vector<2x8x8xf32> -> vector<2x8x8xf32>
    "tpu.trace_stop"() : () -> ()
    %cst_35 = arith.constant 0.353553385 : f32
    %111 = vector.broadcast %cst_35 : f32 to vector<2x8x8xf32>
    %112 = arith.mulf %110, %111 : vector<2x8x8xf32>
    %cst_36 = arith.constant -1.000000e+30 : f32
    %113 = vector.shape_cast %35 : vector<2x1x8xi1> to vector<2x1x8xi1>
    %114 = vector.broadcast %113 : vector<2x1x8xi1> to vector<2x8x8xi1>
    %115 = vector.broadcast %cst_36 : f32 to vector<2x8x8xf32>
    %116 = arith.select %114, %112, %115 : vector<2x8x8xi1>, vector<2x8x8xf32>
    %cst_37 = arith.constant dense<0xFF800000> : vector<2x8xf32>
    %117 = vector.multi_reduction <maximumf>, %116, %cst_37 [2] : vector<2x8x8xf32> to vector<2x8xf32>
    %118 = vector.shape_cast %117 : vector<2x8xf32> to vector<2x8x1xf32>
    %119 = vector.broadcast %118 : vector<2x8x1xf32> to vector<2x8x8xf32>
    %120 = arith.subf %116, %119 : vector<2x8x8xf32>
    %121 = math.exp %120 : vector<2x8x8xf32>
    %cst_38 = arith.constant dense<0.000000e+00> : vector<2x8xf32>
    %122 = vector.multi_reduction <add>, %121, %cst_38 [2] : vector<2x8x8xf32> to vector<2x8xf32>
    %123 = vector.shape_cast %122 : vector<2x8xf32> to vector<2x8x1xf32>
    %124 = vector.broadcast %123 : vector<2x8x1xf32> to vector<2x8x8xf32>
    %125 = arith.divf %121, %124 : vector<2x8x8xf32>
    %126 = vector.extract_strided_slice %51 {offsets = [0, 0, 16], sizes = [2, 8, 8], strides = [1, 1, 1]} : vector<2x8x32xf32> to vector<2x8x8xf32>
    "tpu.trace_start"() <{level = 10 : i32, message = "bqk,bkd->bqd"}> : () -> ()
    %cst_39 = arith.constant dense<0.000000e+00> : vector<2x8x8xf32>
    %127 = tpu.matmul %125, %126, %cst_39 {dimension_numbers = #tpu.dot_dimension_numbers<[2], [1], [1], [2], [0, 0, 0, 1, 1, 2], [0], [0]>} : vector<2x8x8xf32>, vector<2x8x8xf32>, vector<2x8x8xf32> -> vector<2x8x8xf32>
    "tpu.trace_stop"() : () -> ()
    %128 = vector.shape_cast %127 : vector<2x8x8xf32> to vector<16x8xf32>
    %129 = vector.extract_strided_slice %52 {offsets = [16, 0], sizes = [8, 32], strides = [1, 1]} : vector<32x32xf32> to vector<8x32xf32>
    %cst_40 = arith.constant dense<0.000000e+00> : vector<16x32xf32>
    %130 = tpu.matmul %128, %129, %cst_40 {dimension_numbers = #tpu.dot_dimension_numbers<[1], [0], [0], [1], [0, 0, 1, 1], [], []>} : vector<16x8xf32>, vector<8x32xf32>, vector<16x32xf32> -> vector<16x32xf32>
    %131 = vector.shape_cast %130 : vector<16x32xf32> to vector<2x8x32xf32>
    %132 = arith.addf %107, %131 : vector<2x8x32xf32>
    %133 = vector.extract_strided_slice %49 {offsets = [0, 0, 24], sizes = [2, 8, 8], strides = [1, 1, 1]} : vector<2x8x32xf32> to vector<2x8x8xf32>
    %134 = vector.extract_strided_slice %50 {offsets = [0, 0, 24], sizes = [2, 8, 8], strides = [1, 1, 1]} : vector<2x8x32xf32> to vector<2x8x8xf32>
    "tpu.trace_start"() <{level = 10 : i32, message = "bqd,bkd->bqk"}> : () -> ()
    %cst_41 = arith.constant dense<0.000000e+00> : vector<2x8x8xf32>
    %135 = tpu.matmul %133, %134, %cst_41 {dimension_numbers = #tpu.dot_dimension_numbers<[2], [2], [1], [1], [0, 0, 0, 1, 1, 1], [0], [0]>} : vector<2x8x8xf32>, vector<2x8x8xf32>, vector<2x8x8xf32> -> vector<2x8x8xf32>
    "tpu.trace_stop"() : () -> ()
    %cst_42 = arith.constant 0.353553385 : f32
    %136 = vector.broadcast %cst_42 : f32 to vector<2x8x8xf32>
    %137 = arith.mulf %135, %136 : vector<2x8x8xf32>
    %cst_43 = arith.constant -1.000000e+30 : f32
    %138 = vector.shape_cast %35 : vector<2x1x8xi1> to vector<2x1x8xi1>
    %139 = vector.broadcast %138 : vector<2x1x8xi1> to vector<2x8x8xi1>
    %140 = vector.broadcast %cst_43 : f32 to vector<2x8x8xf32>
    %141 = arith.select %139, %137, %140 : vector<2x8x8xi1>, vector<2x8x8xf32>
    %cst_44 = arith.constant dense<0xFF800000> : vector<2x8xf32>
    %142 = vector.multi_reduction <maximumf>, %141, %cst_44 [2] : vector<2x8x8xf32> to vector<2x8xf32>
    %143 = vector.shape_cast %142 : vector<2x8xf32> to vector<2x8x1xf32>
    %144 = vector.broadcast %143 : vector<2x8x1xf32> to vector<2x8x8xf32>
    %145 = arith.subf %141, %144 : vector<2x8x8xf32>
    %146 = math.exp %145 : vector<2x8x8xf32>
    %cst_45 = arith.constant dense<0.000000e+00> : vector<2x8xf32>
    %147 = vector.multi_reduction <add>, %146, %cst_45 [2] : vector<2x8x8xf32> to vector<2x8xf32>
    %148 = vector.shape_cast %147 : vector<2x8xf32> to vector<2x8x1xf32>
    %149 = vector.broadcast %148 : vector<2x8x1xf32> to vector<2x8x8xf32>
    %150 = arith.divf %146, %149 : vector<2x8x8xf32>
    %151 = vector.extract_strided_slice %51 {offsets = [0, 0, 24], sizes = [2, 8, 8], strides = [1, 1, 1]} : vector<2x8x32xf32> to vector<2x8x8xf32>
    "tpu.trace_start"() <{level = 10 : i32, message = "bqk,bkd->bqd"}> : () -> ()
    %cst_46 = arith.constant dense<0.000000e+00> : vector<2x8x8xf32>
    %152 = tpu.matmul %150, %151, %cst_46 {dimension_numbers = #tpu.dot_dimension_numbers<[2], [1], [1], [2], [0, 0, 0, 1, 1, 2], [0], [0]>} : vector<2x8x8xf32>, vector<2x8x8xf32>, vector<2x8x8xf32> -> vector<2x8x8xf32>
    "tpu.trace_stop"() : () -> ()
    %153 = vector.shape_cast %152 : vector<2x8x8xf32> to vector<16x8xf32>
    %154 = vector.extract_strided_slice %52 {offsets = [24, 0], sizes = [8, 32], strides = [1, 1]} : vector<32x32xf32> to vector<8x32xf32>
    %cst_47 = arith.constant dense<0.000000e+00> : vector<16x32xf32>
    %155 = tpu.matmul %153, %154, %cst_47 {dimension_numbers = #tpu.dot_dimension_numbers<[1], [0], [0], [1], [0, 0, 1, 1], [], []>} : vector<16x8xf32>, vector<8x32xf32>, vector<16x32xf32> -> vector<16x32xf32>
    %156 = vector.shape_cast %155 : vector<16x32xf32> to vector<2x8x32xf32>
    %157 = arith.addf %132, %156 : vector<2x8x32xf32>
    %158 = arith.addf %0, %157 : vector<2x8x32xf32>
    %c2 = arith.constant 2 : index
    %c0_48 = arith.constant 0 : index
    %159 = vector.load %arg5[%c2, %c0_48] : memref<32x128xf32, #tpu.memory_space<vmem>>, vector<1x32xf32>
    %c3 = arith.constant 3 : index
    %c0_49 = arith.constant 0 : index
    %160 = vector.load %arg5[%c3, %c0_49] : memref<32x128xf32, #tpu.memory_space<vmem>>, vector<1x32xf32>
    %cst_50 = arith.constant dense<0.000000e+00> : vector<2x8xf32>
    %161 = vector.multi_reduction <add>, %158, %cst_50 [2] : vector<2x8x32xf32> to vector<2x8xf32>
    %162 = vector.shape_cast %161 : vector<2x8xf32> to vector<2x8x1xf32>
    %cst_51 = arith.constant 3.200000e+01 : f32
    %163 = vector.broadcast %cst_51 : f32 to vector<2x8x1xf32>
    %164 = arith.divf %162, %163 : vector<2x8x1xf32>
    %165 = vector.broadcast %164 : vector<2x8x1xf32> to vector<2x8x32xf32>
    %166 = arith.subf %158, %165 : vector<2x8x32xf32>
    %167 = arith.mulf %166, %166 : vector<2x8x32xf32>
    %cst_52 = arith.constant dense<0.000000e+00> : vector<2x8xf32>
    %168 = vector.multi_reduction <add>, %167, %cst_52 [2] : vector<2x8x32xf32> to vector<2x8xf32>
    %169 = vector.shape_cast %168 : vector<2x8xf32> to vector<2x8x1xf32>
    %cst_53 = arith.constant 3.200000e+01 : f32
    %170 = vector.broadcast %cst_53 : f32 to vector<2x8x1xf32>
    %171 = arith.divf %169, %170 : vector<2x8x1xf32>
    %172 = vector.broadcast %164 : vector<2x8x1xf32> to vector<2x8x32xf32>
    %173 = arith.subf %158, %172 : vector<2x8x32xf32>
    %cst_54 = arith.constant 9.99999974E-6 : f32
    %174 = vector.broadcast %cst_54 : f32 to vector<2x8x1xf32>
    %175 = arith.addf %171, %174 : vector<2x8x1xf32>
    %176 = math.rsqrt %175 : vector<2x8x1xf32>
    %177 = vector.broadcast %176 : vector<2x8x1xf32> to vector<2x8x32xf32>
    %178 = arith.mulf %173, %177 : vector<2x8x32xf32>
    %179 = vector.shape_cast %159 : vector<1x32xf32> to vector<1x1x32xf32>
    %180 = vector.broadcast %179 : vector<1x1x32xf32> to vector<2x8x32xf32>
    %181 = arith.mulf %178, %180 : vector<2x8x32xf32>
    %182 = vector.shape_cast %160 : vector<1x32xf32> to vector<1x1x32xf32>
    %183 = vector.broadcast %182 : vector<1x1x32xf32> to vector<2x8x32xf32>
    %184 = arith.addf %181, %183 : vector<2x8x32xf32>
    %c0_55 = arith.constant 0 : index
    %c256 = arith.constant 256 : index
    %185 = vector.load %arg4[%c0_55, %c256] : memref<32x2048xf32, #tpu.memory_space<vmem>>, vector<32x32xf32>
    %c6 = arith.constant 6 : index
    %c0_56 = arith.constant 0 : index
    %186 = vector.load %arg5[%c6, %c0_56] : memref<32x128xf32, #tpu.memory_space<vmem>>, vector<1x32xf32>
    %187 = vector.shape_cast %184 : vector<2x8x32xf32> to vector<16x32xf32>
    %cst_57 = arith.constant dense<0.000000e+00> : vector<16x32xf32>
    %188 = tpu.matmul %187, %185, %cst_57 {dimension_numbers = #tpu.dot_dimension_numbers<[1], [0], [0], [1], [0, 0, 1, 1], [], []>} : vector<16x32xf32>, vector<32x32xf32>, vector<16x32xf32> -> vector<16x32xf32>
    %189 = vector.broadcast %186 : vector<1x32xf32> to vector<16x32xf32>
    %190 = arith.addf %188, %189 : vector<16x32xf32>
    %191 = vector.shape_cast %190 : vector<16x32xf32> to vector<2x8x32xf32>
    %cst_58 = arith.constant 0.000000e+00 : f32
    %192 = vector.broadcast %cst_58 : f32 to vector<2x8x32xf32>
    %193 = arith.maximumf %191, %192 : vector<2x8x32xf32>
    %c0_59 = arith.constant 0 : index
    %c384 = arith.constant 384 : index
    %194 = vector.load %arg4[%c0_59, %c384] : memref<32x2048xf32, #tpu.memory_space<vmem>>, vector<32x32xf32>
    %c7 = arith.constant 7 : index
    %c0_60 = arith.constant 0 : index
    %195 = vector.load %arg5[%c7, %c0_60] : memref<32x128xf32, #tpu.memory_space<vmem>>, vector<1x32xf32>
    %196 = vector.shape_cast %193 : vector<2x8x32xf32> to vector<16x32xf32>
    %cst_61 = arith.constant dense<0.000000e+00> : vector<16x32xf32>
    %197 = tpu.matmul %196, %194, %cst_61 {dimension_numbers = #tpu.dot_dimension_numbers<[1], [0], [0], [1], [0, 0, 1, 1], [], []>} : vector<16x32xf32>, vector<32x32xf32>, vector<16x32xf32> -> vector<16x32xf32>
    %198 = vector.broadcast %195 : vector<1x32xf32> to vector<16x32xf32>
    %199 = arith.addf %197, %198 : vector<16x32xf32>
    %200 = vector.shape_cast %199 : vector<16x32xf32> to vector<2x8x32xf32>
    %201 = arith.addf %184, %200 : vector<2x8x32xf32>
    %c4 = arith.constant 4 : index
    %c0_62 = arith.constant 0 : index
    %202 = vector.load %arg5[%c4, %c0_62] : memref<32x128xf32, #tpu.memory_space<vmem>>, vector<1x32xf32>
    %c5 = arith.constant 5 : index
    %c0_63 = arith.constant 0 : index
    %203 = vector.load %arg5[%c5, %c0_63] : memref<32x128xf32, #tpu.memory_space<vmem>>, vector<1x32xf32>
    %cst_64 = arith.constant dense<0.000000e+00> : vector<2x8xf32>
    %204 = vector.multi_reduction <add>, %201, %cst_64 [2] : vector<2x8x32xf32> to vector<2x8xf32>
    %205 = vector.shape_cast %204 : vector<2x8xf32> to vector<2x8x1xf32>
    %cst_65 = arith.constant 3.200000e+01 : f32
    %206 = vector.broadcast %cst_65 : f32 to vector<2x8x1xf32>
    %207 = arith.divf %205, %206 : vector<2x8x1xf32>
    %208 = vector.broadcast %207 : vector<2x8x1xf32> to vector<2x8x32xf32>
    %209 = arith.subf %201, %208 : vector<2x8x32xf32>
    %210 = arith.mulf %209, %209 : vector<2x8x32xf32>
    %cst_66 = arith.constant dense<0.000000e+00> : vector<2x8xf32>
    %211 = vector.multi_reduction <add>, %210, %cst_66 [2] : vector<2x8x32xf32> to vector<2x8xf32>
    %212 = vector.shape_cast %211 : vector<2x8xf32> to vector<2x8x1xf32>
    %cst_67 = arith.constant 3.200000e+01 : f32
    %213 = vector.broadcast %cst_67 : f32 to vector<2x8x1xf32>
    %214 = arith.divf %212, %213 : vector<2x8x1xf32>
    %215 = vector.broadcast %207 : vector<2x8x1xf32> to vector<2x8x32xf32>
    %216 = arith.subf %201, %215 : vector<2x8x32xf32>
    %cst_68 = arith.constant 9.99999974E-6 : f32
    %217 = vector.broadcast %cst_68 : f32 to vector<2x8x1xf32>
    %218 = arith.addf %214, %217 : vector<2x8x1xf32>
    %219 = math.rsqrt %218 : vector<2x8x1xf32>
    %220 = vector.broadcast %219 : vector<2x8x1xf32> to vector<2x8x32xf32>
    %221 = arith.mulf %216, %220 : vector<2x8x32xf32>
    %222 = vector.shape_cast %202 : vector<1x32xf32> to vector<1x1x32xf32>
    %223 = vector.broadcast %222 : vector<1x1x32xf32> to vector<2x8x32xf32>
    %224 = arith.mulf %221, %223 : vector<2x8x32xf32>
    %225 = vector.shape_cast %203 : vector<1x32xf32> to vector<1x1x32xf32>
    %226 = vector.broadcast %225 : vector<1x1x32xf32> to vector<2x8x32xf32>
    %227 = arith.addf %224, %226 : vector<2x8x32xf32>
    %c8 = arith.constant 8 : index
    %c0_69 = arith.constant 0 : index
    %228 = vector.load %arg5[%c8, %c0_69] : memref<32x128xf32, #tpu.memory_space<vmem>>, vector<1x32xf32>
    %c9 = arith.constant 9 : index
    %c0_70 = arith.constant 0 : index
    %229 = vector.load %arg5[%c9, %c0_70] : memref<32x128xf32, #tpu.memory_space<vmem>>, vector<1x32xf32>
    %cst_71 = arith.constant dense<0.000000e+00> : vector<2x8xf32>
    %230 = vector.multi_reduction <add>, %1, %cst_71 [2] : vector<2x8x32xf32> to vector<2x8xf32>
    %231 = vector.shape_cast %230 : vector<2x8xf32> to vector<2x8x1xf32>
    %cst_72 = arith.constant 3.200000e+01 : f32
    %232 = vector.broadcast %cst_72 : f32 to vector<2x8x1xf32>
    %233 = arith.divf %231, %232 : vector<2x8x1xf32>
    %234 = vector.broadcast %233 : vector<2x8x1xf32> to vector<2x8x32xf32>
    %235 = arith.subf %1, %234 : vector<2x8x32xf32>
    %236 = arith.mulf %235, %235 : vector<2x8x32xf32>
    %cst_73 = arith.constant dense<0.000000e+00> : vector<2x8xf32>
    %237 = vector.multi_reduction <add>, %236, %cst_73 [2] : vector<2x8x32xf32> to vector<2x8xf32>
    %238 = vector.shape_cast %237 : vector<2x8xf32> to vector<2x8x1xf32>
    %cst_74 = arith.constant 3.200000e+01 : f32
    %239 = vector.broadcast %cst_74 : f32 to vector<2x8x1xf32>
    %240 = arith.divf %238, %239 : vector<2x8x1xf32>
    %241 = vector.broadcast %233 : vector<2x8x1xf32> to vector<2x8x32xf32>
    %242 = arith.subf %1, %241 : vector<2x8x32xf32>
    %cst_75 = arith.constant 9.99999974E-6 : f32
    %243 = vector.broadcast %cst_75 : f32 to vector<2x8x1xf32>
    %244 = arith.addf %240, %243 : vector<2x8x1xf32>
    %245 = math.rsqrt %244 : vector<2x8x1xf32>
    %246 = vector.broadcast %245 : vector<2x8x1xf32> to vector<2x8x32xf32>
    %247 = arith.mulf %242, %246 : vector<2x8x32xf32>
    %248 = vector.shape_cast %228 : vector<1x32xf32> to vector<1x1x32xf32>
    %249 = vector.broadcast %248 : vector<1x1x32xf32> to vector<2x8x32xf32>
    %250 = arith.mulf %247, %249 : vector<2x8x32xf32>
    %251 = vector.shape_cast %229 : vector<1x32xf32> to vector<1x1x32xf32>
    %252 = vector.broadcast %251 : vector<1x1x32xf32> to vector<2x8x32xf32>
    %253 = arith.addf %250, %252 : vector<2x8x32xf32>
    %c0_76 = arith.constant 0 : index
    %c512 = arith.constant 512 : index
    %254 = vector.load %arg4[%c0_76, %c512] : memref<32x2048xf32, #tpu.memory_space<vmem>>, vector<32x96xf32>
    %c12 = arith.constant 12 : index
    %c0_77 = arith.constant 0 : index
    %255 = vector.load %arg5[%c12, %c0_77] : memref<32x128xf32, #tpu.memory_space<vmem>>, vector<1x96xf32>
    %256 = vector.shape_cast %253 : vector<2x8x32xf32> to vector<16x32xf32>
    %cst_78 = arith.constant dense<0.000000e+00> : vector<16x96xf32>
    %257 = tpu.matmul %256, %254, %cst_78 {dimension_numbers = #tpu.dot_dimension_numbers<[1], [0], [0], [1], [0, 0, 1, 1], [], []>} : vector<16x32xf32>, vector<32x96xf32>, vector<16x96xf32> -> vector<16x96xf32>
    %258 = vector.broadcast %255 : vector<1x96xf32> to vector<16x96xf32>
    %259 = arith.addf %257, %258 : vector<16x96xf32>
    %260 = vector.shape_cast %259 : vector<16x96xf32> to vector<2x8x96xf32>
    %261 = vector.extract_strided_slice %260 {offsets = [0, 0, 0], sizes = [2, 8, 32], strides = [1, 1, 1]} : vector<2x8x96xf32> to vector<2x8x32xf32>
    %262 = vector.extract_strided_slice %260 {offsets = [0, 0, 32], sizes = [2, 8, 32], strides = [1, 1, 1]} : vector<2x8x96xf32> to vector<2x8x32xf32>
    %263 = vector.extract_strided_slice %260 {offsets = [0, 0, 64], sizes = [2, 8, 32], strides = [1, 1, 1]} : vector<2x8x96xf32> to vector<2x8x32xf32>
    %c0_79 = arith.constant 0 : index
    %c640 = arith.constant 640 : index
    %264 = vector.load %arg4[%c0_79, %c640] : memref<32x2048xf32, #tpu.memory_space<vmem>>, vector<32x32xf32>
    %c13 = arith.constant 13 : index
    %c0_80 = arith.constant 0 : index
    %265 = vector.load %arg5[%c13, %c0_80] : memref<32x128xf32, #tpu.memory_space<vmem>>, vector<1x32xf32>
    %cst_81 = arith.constant 0.000000e+00 : f32
    %266 = vector.broadcast %cst_81 : f32 to vector<2x8x32xf32>
    %267 = vector.shape_cast %265 : vector<1x32xf32> to vector<1x1x32xf32>
    %268 = vector.broadcast %267 : vector<1x1x32xf32> to vector<2x8x32xf32>
    %269 = arith.addf %266, %268 : vector<2x8x32xf32>
    %270 = vector.extract_strided_slice %261 {offsets = [0, 0, 0], sizes = [2, 8, 8], strides = [1, 1, 1]} : vector<2x8x32xf32> to vector<2x8x8xf32>
    %271 = vector.extract_strided_slice %262 {offsets = [0, 0, 0], sizes = [2, 8, 8], strides = [1, 1, 1]} : vector<2x8x32xf32> to vector<2x8x8xf32>
    "tpu.trace_start"() <{level = 10 : i32, message = "bqd,bkd->bqk"}> : () -> ()
    %cst_82 = arith.constant dense<0.000000e+00> : vector<2x8x8xf32>
    %272 = tpu.matmul %270, %271, %cst_82 {dimension_numbers = #tpu.dot_dimension_numbers<[2], [2], [1], [1], [0, 0, 0, 1, 1, 1], [0], [0]>} : vector<2x8x8xf32>, vector<2x8x8xf32>, vector<2x8x8xf32> -> vector<2x8x8xf32>
    "tpu.trace_stop"() : () -> ()
    %cst_83 = arith.constant 0.353553385 : f32
    %273 = vector.broadcast %cst_83 : f32 to vector<2x8x8xf32>
    %274 = arith.mulf %272, %273 : vector<2x8x8xf32>
    %cst_84 = arith.constant -1.000000e+30 : f32
    %275 = vector.broadcast %cst_84 : f32 to vector<2x8x8xf32>
    %276 = arith.select %41, %274, %275 : vector<2x8x8xi1>, vector<2x8x8xf32>
    %cst_85 = arith.constant dense<0xFF800000> : vector<2x8xf32>
    %277 = vector.multi_reduction <maximumf>, %276, %cst_85 [2] : vector<2x8x8xf32> to vector<2x8xf32>
    %278 = vector.shape_cast %277 : vector<2x8xf32> to vector<2x8x1xf32>
    %279 = vector.broadcast %278 : vector<2x8x1xf32> to vector<2x8x8xf32>
    %280 = arith.subf %276, %279 : vector<2x8x8xf32>
    %281 = math.exp %280 : vector<2x8x8xf32>
    %cst_86 = arith.constant dense<0.000000e+00> : vector<2x8xf32>
    %282 = vector.multi_reduction <add>, %281, %cst_86 [2] : vector<2x8x8xf32> to vector<2x8xf32>
    %283 = vector.shape_cast %282 : vector<2x8xf32> to vector<2x8x1xf32>
    %284 = vector.broadcast %283 : vector<2x8x1xf32> to vector<2x8x8xf32>
    %285 = arith.divf %281, %284 : vector<2x8x8xf32>
    %286 = vector.extract_strided_slice %263 {offsets = [0, 0, 0], sizes = [2, 8, 8], strides = [1, 1, 1]} : vector<2x8x32xf32> to vector<2x8x8xf32>
    "tpu.trace_start"() <{level = 10 : i32, message = "bqk,bkd->bqd"}> : () -> ()
    %cst_87 = arith.constant dense<0.000000e+00> : vector<2x8x8xf32>
    %287 = tpu.matmul %285, %286, %cst_87 {dimension_numbers = #tpu.dot_dimension_numbers<[2], [1], [1], [2], [0, 0, 0, 1, 1, 2], [0], [0]>} : vector<2x8x8xf32>, vector<2x8x8xf32>, vector<2x8x8xf32> -> vector<2x8x8xf32>
    "tpu.trace_stop"() : () -> ()
    %288 = vector.shape_cast %287 : vector<2x8x8xf32> to vector<16x8xf32>
    %289 = vector.extract_strided_slice %264 {offsets = [0, 0], sizes = [8, 32], strides = [1, 1]} : vector<32x32xf32> to vector<8x32xf32>
    %cst_88 = arith.constant dense<0.000000e+00> : vector<16x32xf32>
    %290 = tpu.matmul %288, %289, %cst_88 {dimension_numbers = #tpu.dot_dimension_numbers<[1], [0], [0], [1], [0, 0, 1, 1], [], []>} : vector<16x8xf32>, vector<8x32xf32>, vector<16x32xf32> -> vector<16x32xf32>
    %291 = vector.shape_cast %290 : vector<16x32xf32> to vector<2x8x32xf32>
    %292 = arith.addf %269, %291 : vector<2x8x32xf32>
    %293 = vector.extract_strided_slice %261 {offsets = [0, 0, 8], sizes = [2, 8, 8], strides = [1, 1, 1]} : vector<2x8x32xf32> to vector<2x8x8xf32>
    %294 = vector.extract_strided_slice %262 {offsets = [0, 0, 8], sizes = [2, 8, 8], strides = [1, 1, 1]} : vector<2x8x32xf32> to vector<2x8x8xf32>
    "tpu.trace_start"() <{level = 10 : i32, message = "bqd,bkd->bqk"}> : () -> ()
    %cst_89 = arith.constant dense<0.000000e+00> : vector<2x8x8xf32>
    %295 = tpu.matmul %293, %294, %cst_89 {dimension_numbers = #tpu.dot_dimension_numbers<[2], [2], [1], [1], [0, 0, 0, 1, 1, 1], [0], [0]>} : vector<2x8x8xf32>, vector<2x8x8xf32>, vector<2x8x8xf32> -> vector<2x8x8xf32>
    "tpu.trace_stop"() : () -> ()
    %cst_90 = arith.constant 0.353553385 : f32
    %296 = vector.broadcast %cst_90 : f32 to vector<2x8x8xf32>
    %297 = arith.mulf %295, %296 : vector<2x8x8xf32>
    %cst_91 = arith.constant -1.000000e+30 : f32
    %298 = vector.broadcast %cst_91 : f32 to vector<2x8x8xf32>
    %299 = arith.select %41, %297, %298 : vector<2x8x8xi1>, vector<2x8x8xf32>
    %cst_92 = arith.constant dense<0xFF800000> : vector<2x8xf32>
    %300 = vector.multi_reduction <maximumf>, %299, %cst_92 [2] : vector<2x8x8xf32> to vector<2x8xf32>
    %301 = vector.shape_cast %300 : vector<2x8xf32> to vector<2x8x1xf32>
    %302 = vector.broadcast %301 : vector<2x8x1xf32> to vector<2x8x8xf32>
    %303 = arith.subf %299, %302 : vector<2x8x8xf32>
    %304 = math.exp %303 : vector<2x8x8xf32>
    %cst_93 = arith.constant dense<0.000000e+00> : vector<2x8xf32>
    %305 = vector.multi_reduction <add>, %304, %cst_93 [2] : vector<2x8x8xf32> to vector<2x8xf32>
    %306 = vector.shape_cast %305 : vector<2x8xf32> to vector<2x8x1xf32>
    %307 = vector.broadcast %306 : vector<2x8x1xf32> to vector<2x8x8xf32>
    %308 = arith.divf %304, %307 : vector<2x8x8xf32>
    %309 = vector.extract_strided_slice %263 {offsets = [0, 0, 8], sizes = [2, 8, 8], strides = [1, 1, 1]} : vector<2x8x32xf32> to vector<2x8x8xf32>
    "tpu.trace_start"() <{level = 10 : i32, message = "bqk,bkd->bqd"}> : () -> ()
    %cst_94 = arith.constant dense<0.000000e+00> : vector<2x8x8xf32>
    %310 = tpu.matmul %308, %309, %cst_94 {dimension_numbers = #tpu.dot_dimension_numbers<[2], [1], [1], [2], [0, 0, 0, 1, 1, 2], [0], [0]>} : vector<2x8x8xf32>, vector<2x8x8xf32>, vector<2x8x8xf32> -> vector<2x8x8xf32>
    "tpu.trace_stop"() : () -> ()
    %311 = vector.shape_cast %310 : vector<2x8x8xf32> to vector<16x8xf32>
    %312 = vector.extract_strided_slice %264 {offsets = [8, 0], sizes = [8, 32], strides = [1, 1]} : vector<32x32xf32> to vector<8x32xf32>
    %cst_95 = arith.constant dense<0.000000e+00> : vector<16x32xf32>
    %313 = tpu.matmul %311, %312, %cst_95 {dimension_numbers = #tpu.dot_dimension_numbers<[1], [0], [0], [1], [0, 0, 1, 1], [], []>} : vector<16x8xf32>, vector<8x32xf32>, vector<16x32xf32> -> vector<16x32xf32>
    %314 = vector.shape_cast %313 : vector<16x32xf32> to vector<2x8x32xf32>
    %315 = arith.addf %292, %314 : vector<2x8x32xf32>
    %316 = vector.extract_strided_slice %261 {offsets = [0, 0, 16], sizes = [2, 8, 8], strides = [1, 1, 1]} : vector<2x8x32xf32> to vector<2x8x8xf32>
    %317 = vector.extract_strided_slice %262 {offsets = [0, 0, 16], sizes = [2, 8, 8], strides = [1, 1, 1]} : vector<2x8x32xf32> to vector<2x8x8xf32>
    "tpu.trace_start"() <{level = 10 : i32, message = "bqd,bkd->bqk"}> : () -> ()
    %cst_96 = arith.constant dense<0.000000e+00> : vector<2x8x8xf32>
    %318 = tpu.matmul %316, %317, %cst_96 {dimension_numbers = #tpu.dot_dimension_numbers<[2], [2], [1], [1], [0, 0, 0, 1, 1, 1], [0], [0]>} : vector<2x8x8xf32>, vector<2x8x8xf32>, vector<2x8x8xf32> -> vector<2x8x8xf32>
    "tpu.trace_stop"() : () -> ()
    %cst_97 = arith.constant 0.353553385 : f32
    %319 = vector.broadcast %cst_97 : f32 to vector<2x8x8xf32>
    %320 = arith.mulf %318, %319 : vector<2x8x8xf32>
    %cst_98 = arith.constant -1.000000e+30 : f32
    %321 = vector.broadcast %cst_98 : f32 to vector<2x8x8xf32>
    %322 = arith.select %41, %320, %321 : vector<2x8x8xi1>, vector<2x8x8xf32>
    %cst_99 = arith.constant dense<0xFF800000> : vector<2x8xf32>
    %323 = vector.multi_reduction <maximumf>, %322, %cst_99 [2] : vector<2x8x8xf32> to vector<2x8xf32>
    %324 = vector.shape_cast %323 : vector<2x8xf32> to vector<2x8x1xf32>
    %325 = vector.broadcast %324 : vector<2x8x1xf32> to vector<2x8x8xf32>
    %326 = arith.subf %322, %325 : vector<2x8x8xf32>
    %327 = math.exp %326 : vector<2x8x8xf32>
    %cst_100 = arith.constant dense<0.000000e+00> : vector<2x8xf32>
    %328 = vector.multi_reduction <add>, %327, %cst_100 [2] : vector<2x8x8xf32> to vector<2x8xf32>
    %329 = vector.shape_cast %328 : vector<2x8xf32> to vector<2x8x1xf32>
    %330 = vector.broadcast %329 : vector<2x8x1xf32> to vector<2x8x8xf32>
    %331 = arith.divf %327, %330 : vector<2x8x8xf32>
    %332 = vector.extract_strided_slice %263 {offsets = [0, 0, 16], sizes = [2, 8, 8], strides = [1, 1, 1]} : vector<2x8x32xf32> to vector<2x8x8xf32>
    "tpu.trace_start"() <{level = 10 : i32, message = "bqk,bkd->bqd"}> : () -> ()
    %cst_101 = arith.constant dense<0.000000e+00> : vector<2x8x8xf32>
    %333 = tpu.matmul %331, %332, %cst_101 {dimension_numbers = #tpu.dot_dimension_numbers<[2], [1], [1], [2], [0, 0, 0, 1, 1, 2], [0], [0]>} : vector<2x8x8xf32>, vector<2x8x8xf32>, vector<2x8x8xf32> -> vector<2x8x8xf32>
    "tpu.trace_stop"() : () -> ()
    %334 = vector.shape_cast %333 : vector<2x8x8xf32> to vector<16x8xf32>
    %335 = vector.extract_strided_slice %264 {offsets = [16, 0], sizes = [8, 32], strides = [1, 1]} : vector<32x32xf32> to vector<8x32xf32>
    %cst_102 = arith.constant dense<0.000000e+00> : vector<16x32xf32>
    %336 = tpu.matmul %334, %335, %cst_102 {dimension_numbers = #tpu.dot_dimension_numbers<[1], [0], [0], [1], [0, 0, 1, 1], [], []>} : vector<16x8xf32>, vector<8x32xf32>, vector<16x32xf32> -> vector<16x32xf32>
    %337 = vector.shape_cast %336 : vector<16x32xf32> to vector<2x8x32xf32>
    %338 = arith.addf %315, %337 : vector<2x8x32xf32>
    %339 = vector.extract_strided_slice %261 {offsets = [0, 0, 24], sizes = [2, 8, 8], strides = [1, 1, 1]} : vector<2x8x32xf32> to vector<2x8x8xf32>
    %340 = vector.extract_strided_slice %262 {offsets = [0, 0, 24], sizes = [2, 8, 8], strides = [1, 1, 1]} : vector<2x8x32xf32> to vector<2x8x8xf32>
    "tpu.trace_start"() <{level = 10 : i32, message = "bqd,bkd->bqk"}> : () -> ()
    %cst_103 = arith.constant dense<0.000000e+00> : vector<2x8x8xf32>
    %341 = tpu.matmul %339, %340, %cst_103 {dimension_numbers = #tpu.dot_dimension_numbers<[2], [2], [1], [1], [0, 0, 0, 1, 1, 1], [0], [0]>} : vector<2x8x8xf32>, vector<2x8x8xf32>, vector<2x8x8xf32> -> vector<2x8x8xf32>
    "tpu.trace_stop"() : () -> ()
    %cst_104 = arith.constant 0.353553385 : f32
    %342 = vector.broadcast %cst_104 : f32 to vector<2x8x8xf32>
    %343 = arith.mulf %341, %342 : vector<2x8x8xf32>
    %cst_105 = arith.constant -1.000000e+30 : f32
    %344 = vector.broadcast %cst_105 : f32 to vector<2x8x8xf32>
    %345 = arith.select %41, %343, %344 : vector<2x8x8xi1>, vector<2x8x8xf32>
    %cst_106 = arith.constant dense<0xFF800000> : vector<2x8xf32>
    %346 = vector.multi_reduction <maximumf>, %345, %cst_106 [2] : vector<2x8x8xf32> to vector<2x8xf32>
    %347 = vector.shape_cast %346 : vector<2x8xf32> to vector<2x8x1xf32>
    %348 = vector.broadcast %347 : vector<2x8x1xf32> to vector<2x8x8xf32>
    %349 = arith.subf %345, %348 : vector<2x8x8xf32>
    %350 = math.exp %349 : vector<2x8x8xf32>
    %cst_107 = arith.constant dense<0.000000e+00> : vector<2x8xf32>
    %351 = vector.multi_reduction <add>, %350, %cst_107 [2] : vector<2x8x8xf32> to vector<2x8xf32>
    %352 = vector.shape_cast %351 : vector<2x8xf32> to vector<2x8x1xf32>
    %353 = vector.broadcast %352 : vector<2x8x1xf32> to vector<2x8x8xf32>
    %354 = arith.divf %350, %353 : vector<2x8x8xf32>
    %355 = vector.extract_strided_slice %263 {offsets = [0, 0, 24], sizes = [2, 8, 8], strides = [1, 1, 1]} : vector<2x8x32xf32> to vector<2x8x8xf32>
    "tpu.trace_start"() <{level = 10 : i32, message = "bqk,bkd->bqd"}> : () -> ()
    %cst_108 = arith.constant dense<0.000000e+00> : vector<2x8x8xf32>
    %356 = tpu.matmul %354, %355, %cst_108 {dimension_numbers = #tpu.dot_dimension_numbers<[2], [1], [1], [2], [0, 0, 0, 1, 1, 2], [0], [0]>} : vector<2x8x8xf32>, vector<2x8x8xf32>, vector<2x8x8xf32> -> vector<2x8x8xf32>
    "tpu.trace_stop"() : () -> ()
    %357 = vector.shape_cast %356 : vector<2x8x8xf32> to vector<16x8xf32>
    %358 = vector.extract_strided_slice %264 {offsets = [24, 0], sizes = [8, 32], strides = [1, 1]} : vector<32x32xf32> to vector<8x32xf32>
    %cst_109 = arith.constant dense<0.000000e+00> : vector<16x32xf32>
    %359 = tpu.matmul %357, %358, %cst_109 {dimension_numbers = #tpu.dot_dimension_numbers<[1], [0], [0], [1], [0, 0, 1, 1], [], []>} : vector<16x8xf32>, vector<8x32xf32>, vector<16x32xf32> -> vector<16x32xf32>
    %360 = vector.shape_cast %359 : vector<16x32xf32> to vector<2x8x32xf32>
    %361 = arith.addf %338, %360 : vector<2x8x32xf32>
    %362 = arith.addf %1, %361 : vector<2x8x32xf32>
    %c10 = arith.constant 10 : index
    %c0_110 = arith.constant 0 : index
    %363 = vector.load %arg5[%c10, %c0_110] : memref<32x128xf32, #tpu.memory_space<vmem>>, vector<1x32xf32>
    %c11 = arith.constant 11 : index
    %c0_111 = arith.constant 0 : index
    %364 = vector.load %arg5[%c11, %c0_111] : memref<32x128xf32, #tpu.memory_space<vmem>>, vector<1x32xf32>
    %cst_112 = arith.constant dense<0.000000e+00> : vector<2x8xf32>
    %365 = vector.multi_reduction <add>, %362, %cst_112 [2] : vector<2x8x32xf32> to vector<2x8xf32>
    %366 = vector.shape_cast %365 : vector<2x8xf32> to vector<2x8x1xf32>
    %cst_113 = arith.constant 3.200000e+01 : f32
    %367 = vector.broadcast %cst_113 : f32 to vector<2x8x1xf32>
    %368 = arith.divf %366, %367 : vector<2x8x1xf32>
    %369 = vector.broadcast %368 : vector<2x8x1xf32> to vector<2x8x32xf32>
    %370 = arith.subf %362, %369 : vector<2x8x32xf32>
    %371 = arith.mulf %370, %370 : vector<2x8x32xf32>
    %cst_114 = arith.constant dense<0.000000e+00> : vector<2x8xf32>
    %372 = vector.multi_reduction <add>, %371, %cst_114 [2] : vector<2x8x32xf32> to vector<2x8xf32>
    %373 = vector.shape_cast %372 : vector<2x8xf32> to vector<2x8x1xf32>
    %cst_115 = arith.constant 3.200000e+01 : f32
    %374 = vector.broadcast %cst_115 : f32 to vector<2x8x1xf32>
    %375 = arith.divf %373, %374 : vector<2x8x1xf32>
    %376 = vector.broadcast %368 : vector<2x8x1xf32> to vector<2x8x32xf32>
    %377 = arith.subf %362, %376 : vector<2x8x32xf32>
    %cst_116 = arith.constant 9.99999974E-6 : f32
    %378 = vector.broadcast %cst_116 : f32 to vector<2x8x1xf32>
    %379 = arith.addf %375, %378 : vector<2x8x1xf32>
    %380 = math.rsqrt %379 : vector<2x8x1xf32>
    %381 = vector.broadcast %380 : vector<2x8x1xf32> to vector<2x8x32xf32>
    %382 = arith.mulf %377, %381 : vector<2x8x32xf32>
    %383 = vector.shape_cast %363 : vector<1x32xf32> to vector<1x1x32xf32>
    %384 = vector.broadcast %383 : vector<1x1x32xf32> to vector<2x8x32xf32>
    %385 = arith.mulf %382, %384 : vector<2x8x32xf32>
    %386 = vector.shape_cast %364 : vector<1x32xf32> to vector<1x1x32xf32>
    %387 = vector.broadcast %386 : vector<1x1x32xf32> to vector<2x8x32xf32>
    %388 = arith.addf %385, %387 : vector<2x8x32xf32>
    %c0_117 = arith.constant 0 : index
    %c768 = arith.constant 768 : index
    %389 = vector.load %arg4[%c0_117, %c768] : memref<32x2048xf32, #tpu.memory_space<vmem>>, vector<32x32xf32>
    %c14 = arith.constant 14 : index
    %c0_118 = arith.constant 0 : index
    %390 = vector.load %arg5[%c14, %c0_118] : memref<32x128xf32, #tpu.memory_space<vmem>>, vector<1x32xf32>
    %391 = vector.shape_cast %388 : vector<2x8x32xf32> to vector<16x32xf32>
    %cst_119 = arith.constant dense<0.000000e+00> : vector<16x32xf32>
    %392 = tpu.matmul %391, %389, %cst_119 {dimension_numbers = #tpu.dot_dimension_numbers<[1], [0], [0], [1], [0, 0, 1, 1], [], []>} : vector<16x32xf32>, vector<32x32xf32>, vector<16x32xf32> -> vector<16x32xf32>
    %393 = vector.broadcast %390 : vector<1x32xf32> to vector<16x32xf32>
    %394 = arith.addf %392, %393 : vector<16x32xf32>
    %395 = vector.shape_cast %394 : vector<16x32xf32> to vector<2x8x32xf32>
    %c0_120 = arith.constant 0 : index
    %c896 = arith.constant 896 : index
    %396 = vector.load %arg4[%c0_120, %c896] : memref<32x2048xf32, #tpu.memory_space<vmem>>, vector<32x64xf32>
    %c15 = arith.constant 15 : index
    %c0_121 = arith.constant 0 : index
    %397 = vector.load %arg5[%c15, %c0_121] : memref<32x128xf32, #tpu.memory_space<vmem>>, vector<1x64xf32>
    %398 = vector.shape_cast %227 : vector<2x8x32xf32> to vector<16x32xf32>
    %cst_122 = arith.constant dense<0.000000e+00> : vector<16x64xf32>
    %399 = tpu.matmul %398, %396, %cst_122 {dimension_numbers = #tpu.dot_dimension_numbers<[1], [0], [0], [1], [0, 0, 1, 1], [], []>} : vector<16x32xf32>, vector<32x64xf32>, vector<16x64xf32> -> vector<16x64xf32>
    %400 = vector.broadcast %397 : vector<1x64xf32> to vector<16x64xf32>
    %401 = arith.addf %399, %400 : vector<16x64xf32>
    %402 = vector.shape_cast %401 : vector<16x64xf32> to vector<2x8x64xf32>
    %403 = vector.extract_strided_slice %402 {offsets = [0, 0, 0], sizes = [2, 8, 32], strides = [1, 1, 1]} : vector<2x8x64xf32> to vector<2x8x32xf32>
    %404 = vector.extract_strided_slice %402 {offsets = [0, 0, 32], sizes = [2, 8, 32], strides = [1, 1, 1]} : vector<2x8x64xf32> to vector<2x8x32xf32>
    %c0_123 = arith.constant 0 : index
    %c1024 = arith.constant 1024 : index
    %405 = vector.load %arg4[%c0_123, %c1024] : memref<32x2048xf32, #tpu.memory_space<vmem>>, vector<32x32xf32>
    %c16 = arith.constant 16 : index
    %c0_124 = arith.constant 0 : index
    %406 = vector.load %arg5[%c16, %c0_124] : memref<32x128xf32, #tpu.memory_space<vmem>>, vector<1x32xf32>
    %cst_125 = arith.constant 0.000000e+00 : f32
    %407 = vector.broadcast %cst_125 : f32 to vector<2x8x32xf32>
    %408 = vector.shape_cast %406 : vector<1x32xf32> to vector<1x1x32xf32>
    %409 = vector.broadcast %408 : vector<1x1x32xf32> to vector<2x8x32xf32>
    %410 = arith.addf %407, %409 : vector<2x8x32xf32>
    %411 = vector.extract_strided_slice %395 {offsets = [0, 0, 0], sizes = [2, 8, 8], strides = [1, 1, 1]} : vector<2x8x32xf32> to vector<2x8x8xf32>
    %412 = vector.extract_strided_slice %403 {offsets = [0, 0, 0], sizes = [2, 8, 8], strides = [1, 1, 1]} : vector<2x8x32xf32> to vector<2x8x8xf32>
    "tpu.trace_start"() <{level = 10 : i32, message = "bqd,bkd->bqk"}> : () -> ()
    %cst_126 = arith.constant dense<0.000000e+00> : vector<2x8x8xf32>
    %413 = tpu.matmul %411, %412, %cst_126 {dimension_numbers = #tpu.dot_dimension_numbers<[2], [2], [1], [1], [0, 0, 0, 1, 1, 1], [0], [0]>} : vector<2x8x8xf32>, vector<2x8x8xf32>, vector<2x8x8xf32> -> vector<2x8x8xf32>
    "tpu.trace_stop"() : () -> ()
    %cst_127 = arith.constant 0.353553385 : f32
    %414 = vector.broadcast %cst_127 : f32 to vector<2x8x8xf32>
    %415 = arith.mulf %413, %414 : vector<2x8x8xf32>
    %cst_128 = arith.constant -1.000000e+30 : f32
    %416 = vector.shape_cast %36 : vector<2x1x8xi1> to vector<2x1x8xi1>
    %417 = vector.broadcast %416 : vector<2x1x8xi1> to vector<2x8x8xi1>
    %418 = vector.broadcast %cst_128 : f32 to vector<2x8x8xf32>
    %419 = arith.select %417, %415, %418 : vector<2x8x8xi1>, vector<2x8x8xf32>
    %cst_129 = arith.constant dense<0xFF800000> : vector<2x8xf32>
    %420 = vector.multi_reduction <maximumf>, %419, %cst_129 [2] : vector<2x8x8xf32> to vector<2x8xf32>
    %421 = vector.shape_cast %420 : vector<2x8xf32> to vector<2x8x1xf32>
    %422 = vector.broadcast %421 : vector<2x8x1xf32> to vector<2x8x8xf32>
    %423 = arith.subf %419, %422 : vector<2x8x8xf32>
    %424 = math.exp %423 : vector<2x8x8xf32>
    %cst_130 = arith.constant dense<0.000000e+00> : vector<2x8xf32>
    %425 = vector.multi_reduction <add>, %424, %cst_130 [2] : vector<2x8x8xf32> to vector<2x8xf32>
    %426 = vector.shape_cast %425 : vector<2x8xf32> to vector<2x8x1xf32>
    %427 = vector.broadcast %426 : vector<2x8x1xf32> to vector<2x8x8xf32>
    %428 = arith.divf %424, %427 : vector<2x8x8xf32>
    %429 = vector.extract_strided_slice %404 {offsets = [0, 0, 0], sizes = [2, 8, 8], strides = [1, 1, 1]} : vector<2x8x32xf32> to vector<2x8x8xf32>
    "tpu.trace_start"() <{level = 10 : i32, message = "bqk,bkd->bqd"}> : () -> ()
    %cst_131 = arith.constant dense<0.000000e+00> : vector<2x8x8xf32>
    %430 = tpu.matmul %428, %429, %cst_131 {dimension_numbers = #tpu.dot_dimension_numbers<[2], [1], [1], [2], [0, 0, 0, 1, 1, 2], [0], [0]>} : vector<2x8x8xf32>, vector<2x8x8xf32>, vector<2x8x8xf32> -> vector<2x8x8xf32>
    "tpu.trace_stop"() : () -> ()
    %431 = vector.shape_cast %430 : vector<2x8x8xf32> to vector<16x8xf32>
    %432 = vector.extract_strided_slice %405 {offsets = [0, 0], sizes = [8, 32], strides = [1, 1]} : vector<32x32xf32> to vector<8x32xf32>
    %cst_132 = arith.constant dense<0.000000e+00> : vector<16x32xf32>
    %433 = tpu.matmul %431, %432, %cst_132 {dimension_numbers = #tpu.dot_dimension_numbers<[1], [0], [0], [1], [0, 0, 1, 1], [], []>} : vector<16x8xf32>, vector<8x32xf32>, vector<16x32xf32> -> vector<16x32xf32>
    %434 = vector.shape_cast %433 : vector<16x32xf32> to vector<2x8x32xf32>
    %435 = arith.addf %410, %434 : vector<2x8x32xf32>
    %436 = vector.extract_strided_slice %395 {offsets = [0, 0, 8], sizes = [2, 8, 8], strides = [1, 1, 1]} : vector<2x8x32xf32> to vector<2x8x8xf32>
    %437 = vector.extract_strided_slice %403 {offsets = [0, 0, 8], sizes = [2, 8, 8], strides = [1, 1, 1]} : vector<2x8x32xf32> to vector<2x8x8xf32>
    "tpu.trace_start"() <{level = 10 : i32, message = "bqd,bkd->bqk"}> : () -> ()
    %cst_133 = arith.constant dense<0.000000e+00> : vector<2x8x8xf32>
    %438 = tpu.matmul %436, %437, %cst_133 {dimension_numbers = #tpu.dot_dimension_numbers<[2], [2], [1], [1], [0, 0, 0, 1, 1, 1], [0], [0]>} : vector<2x8x8xf32>, vector<2x8x8xf32>, vector<2x8x8xf32> -> vector<2x8x8xf32>
    "tpu.trace_stop"() : () -> ()
    %cst_134 = arith.constant 0.353553385 : f32
    %439 = vector.broadcast %cst_134 : f32 to vector<2x8x8xf32>
    %440 = arith.mulf %438, %439 : vector<2x8x8xf32>
    %cst_135 = arith.constant -1.000000e+30 : f32
    %441 = vector.shape_cast %36 : vector<2x1x8xi1> to vector<2x1x8xi1>
    %442 = vector.broadcast %441 : vector<2x1x8xi1> to vector<2x8x8xi1>
    %443 = vector.broadcast %cst_135 : f32 to vector<2x8x8xf32>
    %444 = arith.select %442, %440, %443 : vector<2x8x8xi1>, vector<2x8x8xf32>
    %cst_136 = arith.constant dense<0xFF800000> : vector<2x8xf32>
    %445 = vector.multi_reduction <maximumf>, %444, %cst_136 [2] : vector<2x8x8xf32> to vector<2x8xf32>
    %446 = vector.shape_cast %445 : vector<2x8xf32> to vector<2x8x1xf32>
    %447 = vector.broadcast %446 : vector<2x8x1xf32> to vector<2x8x8xf32>
    %448 = arith.subf %444, %447 : vector<2x8x8xf32>
    %449 = math.exp %448 : vector<2x8x8xf32>
    %cst_137 = arith.constant dense<0.000000e+00> : vector<2x8xf32>
    %450 = vector.multi_reduction <add>, %449, %cst_137 [2] : vector<2x8x8xf32> to vector<2x8xf32>
    %451 = vector.shape_cast %450 : vector<2x8xf32> to vector<2x8x1xf32>
    %452 = vector.broadcast %451 : vector<2x8x1xf32> to vector<2x8x8xf32>
    %453 = arith.divf %449, %452 : vector<2x8x8xf32>
    %454 = vector.extract_strided_slice %404 {offsets = [0, 0, 8], sizes = [2, 8, 8], strides = [1, 1, 1]} : vector<2x8x32xf32> to vector<2x8x8xf32>
    "tpu.trace_start"() <{level = 10 : i32, message = "bqk,bkd->bqd"}> : () -> ()
    %cst_138 = arith.constant dense<0.000000e+00> : vector<2x8x8xf32>
    %455 = tpu.matmul %453, %454, %cst_138 {dimension_numbers = #tpu.dot_dimension_numbers<[2], [1], [1], [2], [0, 0, 0, 1, 1, 2], [0], [0]>} : vector<2x8x8xf32>, vector<2x8x8xf32>, vector<2x8x8xf32> -> vector<2x8x8xf32>
    "tpu.trace_stop"() : () -> ()
    %456 = vector.shape_cast %455 : vector<2x8x8xf32> to vector<16x8xf32>
    %457 = vector.extract_strided_slice %405 {offsets = [8, 0], sizes = [8, 32], strides = [1, 1]} : vector<32x32xf32> to vector<8x32xf32>
    %cst_139 = arith.constant dense<0.000000e+00> : vector<16x32xf32>
    %458 = tpu.matmul %456, %457, %cst_139 {dimension_numbers = #tpu.dot_dimension_numbers<[1], [0], [0], [1], [0, 0, 1, 1], [], []>} : vector<16x8xf32>, vector<8x32xf32>, vector<16x32xf32> -> vector<16x32xf32>
    %459 = vector.shape_cast %458 : vector<16x32xf32> to vector<2x8x32xf32>
    %460 = arith.addf %435, %459 : vector<2x8x32xf32>
    %461 = vector.extract_strided_slice %395 {offsets = [0, 0, 16], sizes = [2, 8, 8], strides = [1, 1, 1]} : vector<2x8x32xf32> to vector<2x8x8xf32>
    %462 = vector.extract_strided_slice %403 {offsets = [0, 0, 16], sizes = [2, 8, 8], strides = [1, 1, 1]} : vector<2x8x32xf32> to vector<2x8x8xf32>
    "tpu.trace_start"() <{level = 10 : i32, message = "bqd,bkd->bqk"}> : () -> ()
    %cst_140 = arith.constant dense<0.000000e+00> : vector<2x8x8xf32>
    %463 = tpu.matmul %461, %462, %cst_140 {dimension_numbers = #tpu.dot_dimension_numbers<[2], [2], [1], [1], [0, 0, 0, 1, 1, 1], [0], [0]>} : vector<2x8x8xf32>, vector<2x8x8xf32>, vector<2x8x8xf32> -> vector<2x8x8xf32>
    "tpu.trace_stop"() : () -> ()
    %cst_141 = arith.constant 0.353553385 : f32
    %464 = vector.broadcast %cst_141 : f32 to vector<2x8x8xf32>
    %465 = arith.mulf %463, %464 : vector<2x8x8xf32>
    %cst_142 = arith.constant -1.000000e+30 : f32
    %466 = vector.shape_cast %36 : vector<2x1x8xi1> to vector<2x1x8xi1>
    %467 = vector.broadcast %466 : vector<2x1x8xi1> to vector<2x8x8xi1>
    %468 = vector.broadcast %cst_142 : f32 to vector<2x8x8xf32>
    %469 = arith.select %467, %465, %468 : vector<2x8x8xi1>, vector<2x8x8xf32>
    %cst_143 = arith.constant dense<0xFF800000> : vector<2x8xf32>
    %470 = vector.multi_reduction <maximumf>, %469, %cst_143 [2] : vector<2x8x8xf32> to vector<2x8xf32>
    %471 = vector.shape_cast %470 : vector<2x8xf32> to vector<2x8x1xf32>
    %472 = vector.broadcast %471 : vector<2x8x1xf32> to vector<2x8x8xf32>
    %473 = arith.subf %469, %472 : vector<2x8x8xf32>
    %474 = math.exp %473 : vector<2x8x8xf32>
    %cst_144 = arith.constant dense<0.000000e+00> : vector<2x8xf32>
    %475 = vector.multi_reduction <add>, %474, %cst_144 [2] : vector<2x8x8xf32> to vector<2x8xf32>
    %476 = vector.shape_cast %475 : vector<2x8xf32> to vector<2x8x1xf32>
    %477 = vector.broadcast %476 : vector<2x8x1xf32> to vector<2x8x8xf32>
    %478 = arith.divf %474, %477 : vector<2x8x8xf32>
    %479 = vector.extract_strided_slice %404 {offsets = [0, 0, 16], sizes = [2, 8, 8], strides = [1, 1, 1]} : vector<2x8x32xf32> to vector<2x8x8xf32>
    "tpu.trace_start"() <{level = 10 : i32, message = "bqk,bkd->bqd"}> : () -> ()
    %cst_145 = arith.constant dense<0.000000e+00> : vector<2x8x8xf32>
    %480 = tpu.matmul %478, %479, %cst_145 {dimension_numbers = #tpu.dot_dimension_numbers<[2], [1], [1], [2], [0, 0, 0, 1, 1, 2], [0], [0]>} : vector<2x8x8xf32>, vector<2x8x8xf32>, vector<2x8x8xf32> -> vector<2x8x8xf32>
    "tpu.trace_stop"() : () -> ()
    %481 = vector.shape_cast %480 : vector<2x8x8xf32> to vector<16x8xf32>
    %482 = vector.extract_strided_slice %405 {offsets = [16, 0], sizes = [8, 32], strides = [1, 1]} : vector<32x32xf32> to vector<8x32xf32>
    %cst_146 = arith.constant dense<0.000000e+00> : vector<16x32xf32>
    %483 = tpu.matmul %481, %482, %cst_146 {dimension_numbers = #tpu.dot_dimension_numbers<[1], [0], [0], [1], [0, 0, 1, 1], [], []>} : vector<16x8xf32>, vector<8x32xf32>, vector<16x32xf32> -> vector<16x32xf32>
    %484 = vector.shape_cast %483 : vector<16x32xf32> to vector<2x8x32xf32>
    %485 = arith.addf %460, %484 : vector<2x8x32xf32>
    %486 = vector.extract_strided_slice %395 {offsets = [0, 0, 24], sizes = [2, 8, 8], strides = [1, 1, 1]} : vector<2x8x32xf32> to vector<2x8x8xf32>
    %487 = vector.extract_strided_slice %403 {offsets = [0, 0, 24], sizes = [2, 8, 8], strides = [1, 1, 1]} : vector<2x8x32xf32> to vector<2x8x8xf32>
    "tpu.trace_start"() <{level = 10 : i32, message = "bqd,bkd->bqk"}> : () -> ()
    %cst_147 = arith.constant dense<0.000000e+00> : vector<2x8x8xf32>
    %488 = tpu.matmul %486, %487, %cst_147 {dimension_numbers = #tpu.dot_dimension_numbers<[2], [2], [1], [1], [0, 0, 0, 1, 1, 1], [0], [0]>} : vector<2x8x8xf32>, vector<2x8x8xf32>, vector<2x8x8xf32> -> vector<2x8x8xf32>
    "tpu.trace_stop"() : () -> ()
    %cst_148 = arith.constant 0.353553385 : f32
    %489 = vector.broadcast %cst_148 : f32 to vector<2x8x8xf32>
    %490 = arith.mulf %488, %489 : vector<2x8x8xf32>
    %cst_149 = arith.constant -1.000000e+30 : f32
    %491 = vector.shape_cast %36 : vector<2x1x8xi1> to vector<2x1x8xi1>
    %492 = vector.broadcast %491 : vector<2x1x8xi1> to vector<2x8x8xi1>
    %493 = vector.broadcast %cst_149 : f32 to vector<2x8x8xf32>
    %494 = arith.select %492, %490, %493 : vector<2x8x8xi1>, vector<2x8x8xf32>
    %cst_150 = arith.constant dense<0xFF800000> : vector<2x8xf32>
    %495 = vector.multi_reduction <maximumf>, %494, %cst_150 [2] : vector<2x8x8xf32> to vector<2x8xf32>
    %496 = vector.shape_cast %495 : vector<2x8xf32> to vector<2x8x1xf32>
    %497 = vector.broadcast %496 : vector<2x8x1xf32> to vector<2x8x8xf32>
    %498 = arith.subf %494, %497 : vector<2x8x8xf32>
    %499 = math.exp %498 : vector<2x8x8xf32>
    %cst_151 = arith.constant dense<0.000000e+00> : vector<2x8xf32>
    %500 = vector.multi_reduction <add>, %499, %cst_151 [2] : vector<2x8x8xf32> to vector<2x8xf32>
    %501 = vector.shape_cast %500 : vector<2x8xf32> to vector<2x8x1xf32>
    %502 = vector.broadcast %501 : vector<2x8x1xf32> to vector<2x8x8xf32>
    %503 = arith.divf %499, %502 : vector<2x8x8xf32>
    %504 = vector.extract_strided_slice %404 {offsets = [0, 0, 24], sizes = [2, 8, 8], strides = [1, 1, 1]} : vector<2x8x32xf32> to vector<2x8x8xf32>
    "tpu.trace_start"() <{level = 10 : i32, message = "bqk,bkd->bqd"}> : () -> ()
    %cst_152 = arith.constant dense<0.000000e+00> : vector<2x8x8xf32>
    %505 = tpu.matmul %503, %504, %cst_152 {dimension_numbers = #tpu.dot_dimension_numbers<[2], [1], [1], [2], [0, 0, 0, 1, 1, 2], [0], [0]>} : vector<2x8x8xf32>, vector<2x8x8xf32>, vector<2x8x8xf32> -> vector<2x8x8xf32>
    "tpu.trace_stop"() : () -> ()
    %506 = vector.shape_cast %505 : vector<2x8x8xf32> to vector<16x8xf32>
    %507 = vector.extract_strided_slice %405 {offsets = [24, 0], sizes = [8, 32], strides = [1, 1]} : vector<32x32xf32> to vector<8x32xf32>
    %cst_153 = arith.constant dense<0.000000e+00> : vector<16x32xf32>
    %508 = tpu.matmul %506, %507, %cst_153 {dimension_numbers = #tpu.dot_dimension_numbers<[1], [0], [0], [1], [0, 0, 1, 1], [], []>} : vector<16x8xf32>, vector<8x32xf32>, vector<16x32xf32> -> vector<16x32xf32>
    %509 = vector.shape_cast %508 : vector<16x32xf32> to vector<2x8x32xf32>
    %510 = arith.addf %485, %509 : vector<2x8x32xf32>
    %511 = arith.addf %362, %510 : vector<2x8x32xf32>
    %512 = arith.addf %1, %511 : vector<2x8x32xf32>
    %c17 = arith.constant 17 : index
    %c0_154 = arith.constant 0 : index
    %513 = vector.load %arg5[%c17, %c0_154] : memref<32x128xf32, #tpu.memory_space<vmem>>, vector<1x32xf32>
    %c18 = arith.constant 18 : index
    %c0_155 = arith.constant 0 : index
    %514 = vector.load %arg5[%c18, %c0_155] : memref<32x128xf32, #tpu.memory_space<vmem>>, vector<1x32xf32>
    %cst_156 = arith.constant dense<0.000000e+00> : vector<2x8xf32>
    %515 = vector.multi_reduction <add>, %512, %cst_156 [2] : vector<2x8x32xf32> to vector<2x8xf32>
    %516 = vector.shape_cast %515 : vector<2x8xf32> to vector<2x8x1xf32>
    %cst_157 = arith.constant 3.200000e+01 : f32
    %517 = vector.broadcast %cst_157 : f32 to vector<2x8x1xf32>
    %518 = arith.divf %516, %517 : vector<2x8x1xf32>
    %519 = vector.broadcast %518 : vector<2x8x1xf32> to vector<2x8x32xf32>
    %520 = arith.subf %512, %519 : vector<2x8x32xf32>
    %521 = arith.mulf %520, %520 : vector<2x8x32xf32>
    %cst_158 = arith.constant dense<0.000000e+00> : vector<2x8xf32>
    %522 = vector.multi_reduction <add>, %521, %cst_158 [2] : vector<2x8x32xf32> to vector<2x8xf32>
    %523 = vector.shape_cast %522 : vector<2x8xf32> to vector<2x8x1xf32>
    %cst_159 = arith.constant 3.200000e+01 : f32
    %524 = vector.broadcast %cst_159 : f32 to vector<2x8x1xf32>
    %525 = arith.divf %523, %524 : vector<2x8x1xf32>
    %526 = vector.broadcast %518 : vector<2x8x1xf32> to vector<2x8x32xf32>
    %527 = arith.subf %512, %526 : vector<2x8x32xf32>
    %cst_160 = arith.constant 9.99999974E-6 : f32
    %528 = vector.broadcast %cst_160 : f32 to vector<2x8x1xf32>
    %529 = arith.addf %525, %528 : vector<2x8x1xf32>
    %530 = math.rsqrt %529 : vector<2x8x1xf32>
    %531 = vector.broadcast %530 : vector<2x8x1xf32> to vector<2x8x32xf32>
    %532 = arith.mulf %527, %531 : vector<2x8x32xf32>
    %533 = vector.shape_cast %513 : vector<1x32xf32> to vector<1x1x32xf32>
    %534 = vector.broadcast %533 : vector<1x1x32xf32> to vector<2x8x32xf32>
    %535 = arith.mulf %532, %534 : vector<2x8x32xf32>
    %536 = vector.shape_cast %514 : vector<1x32xf32> to vector<1x1x32xf32>
    %537 = vector.broadcast %536 : vector<1x1x32xf32> to vector<2x8x32xf32>
    %538 = arith.addf %535, %537 : vector<2x8x32xf32>
    %c0_161 = arith.constant 0 : index
    %c1152 = arith.constant 1152 : index
    %539 = vector.load %arg4[%c0_161, %c1152] : memref<32x2048xf32, #tpu.memory_space<vmem>>, vector<32x32xf32>
    %c21 = arith.constant 21 : index
    %c0_162 = arith.constant 0 : index
    %540 = vector.load %arg5[%c21, %c0_162] : memref<32x128xf32, #tpu.memory_space<vmem>>, vector<1x32xf32>
    %541 = vector.shape_cast %538 : vector<2x8x32xf32> to vector<16x32xf32>
    %cst_163 = arith.constant dense<0.000000e+00> : vector<16x32xf32>
    %542 = tpu.matmul %541, %539, %cst_163 {dimension_numbers = #tpu.dot_dimension_numbers<[1], [0], [0], [1], [0, 0, 1, 1], [], []>} : vector<16x32xf32>, vector<32x32xf32>, vector<16x32xf32> -> vector<16x32xf32>
    %543 = vector.broadcast %540 : vector<1x32xf32> to vector<16x32xf32>
    %544 = arith.addf %542, %543 : vector<16x32xf32>
    %545 = vector.shape_cast %544 : vector<16x32xf32> to vector<2x8x32xf32>
    %cst_164 = arith.constant 0.000000e+00 : f32
    %546 = vector.broadcast %cst_164 : f32 to vector<2x8x32xf32>
    %547 = arith.maximumf %545, %546 : vector<2x8x32xf32>
    %c0_165 = arith.constant 0 : index
    %c1280 = arith.constant 1280 : index
    %548 = vector.load %arg4[%c0_165, %c1280] : memref<32x2048xf32, #tpu.memory_space<vmem>>, vector<32x32xf32>
    %c22 = arith.constant 22 : index
    %c0_166 = arith.constant 0 : index
    %549 = vector.load %arg5[%c22, %c0_166] : memref<32x128xf32, #tpu.memory_space<vmem>>, vector<1x32xf32>
    %550 = vector.shape_cast %547 : vector<2x8x32xf32> to vector<16x32xf32>
    %cst_167 = arith.constant dense<0.000000e+00> : vector<16x32xf32>
    %551 = tpu.matmul %550, %548, %cst_167 {dimension_numbers = #tpu.dot_dimension_numbers<[1], [0], [0], [1], [0, 0, 1, 1], [], []>} : vector<16x32xf32>, vector<32x32xf32>, vector<16x32xf32> -> vector<16x32xf32>
    %552 = vector.broadcast %549 : vector<1x32xf32> to vector<16x32xf32>
    %553 = arith.addf %551, %552 : vector<16x32xf32>
    %554 = vector.shape_cast %553 : vector<16x32xf32> to vector<2x8x32xf32>
    %555 = arith.addf %538, %554 : vector<2x8x32xf32>
    %c19 = arith.constant 19 : index
    %c0_168 = arith.constant 0 : index
    %556 = vector.load %arg5[%c19, %c0_168] : memref<32x128xf32, #tpu.memory_space<vmem>>, vector<1x32xf32>
    %c20 = arith.constant 20 : index
    %c0_169 = arith.constant 0 : index
    %557 = vector.load %arg5[%c20, %c0_169] : memref<32x128xf32, #tpu.memory_space<vmem>>, vector<1x32xf32>
    %cst_170 = arith.constant dense<0.000000e+00> : vector<2x8xf32>
    %558 = vector.multi_reduction <add>, %555, %cst_170 [2] : vector<2x8x32xf32> to vector<2x8xf32>
    %559 = vector.shape_cast %558 : vector<2x8xf32> to vector<2x8x1xf32>
    %cst_171 = arith.constant 3.200000e+01 : f32
    %560 = vector.broadcast %cst_171 : f32 to vector<2x8x1xf32>
    %561 = arith.divf %559, %560 : vector<2x8x1xf32>
    %562 = vector.broadcast %561 : vector<2x8x1xf32> to vector<2x8x32xf32>
    %563 = arith.subf %555, %562 : vector<2x8x32xf32>
    %564 = arith.mulf %563, %563 : vector<2x8x32xf32>
    %cst_172 = arith.constant dense<0.000000e+00> : vector<2x8xf32>
    %565 = vector.multi_reduction <add>, %564, %cst_172 [2] : vector<2x8x32xf32> to vector<2x8xf32>
    %566 = vector.shape_cast %565 : vector<2x8xf32> to vector<2x8x1xf32>
    %cst_173 = arith.constant 3.200000e+01 : f32
    %567 = vector.broadcast %cst_173 : f32 to vector<2x8x1xf32>
    %568 = arith.divf %566, %567 : vector<2x8x1xf32>
    %569 = vector.broadcast %561 : vector<2x8x1xf32> to vector<2x8x32xf32>
    %570 = arith.subf %555, %569 : vector<2x8x32xf32>
    %cst_174 = arith.constant 9.99999974E-6 : f32
    %571 = vector.broadcast %cst_174 : f32 to vector<2x8x1xf32>
    %572 = arith.addf %568, %571 : vector<2x8x1xf32>
    %573 = math.rsqrt %572 : vector<2x8x1xf32>
    %574 = vector.broadcast %573 : vector<2x8x1xf32> to vector<2x8x32xf32>
    %575 = arith.mulf %570, %574 : vector<2x8x32xf32>
    %576 = vector.shape_cast %556 : vector<1x32xf32> to vector<1x1x32xf32>
    %577 = vector.broadcast %576 : vector<1x1x32xf32> to vector<2x8x32xf32>
    %578 = arith.mulf %575, %577 : vector<2x8x32xf32>
    %579 = vector.shape_cast %557 : vector<1x32xf32> to vector<1x1x32xf32>
    %580 = vector.broadcast %579 : vector<1x1x32xf32> to vector<2x8x32xf32>
    %581 = arith.addf %578, %580 : vector<2x8x32xf32>
    %c0_175 = arith.constant 0 : index
    %c1408 = arith.constant 1408 : index
    %582 = vector.load %arg4[%c0_175, %c1408] : memref<32x2048xf32, #tpu.memory_space<vmem>>, vector<32x128xf32>
    %c0_176 = arith.constant 0 : index
    %c1536 = arith.constant 1536 : index
    %583 = vector.load %arg4[%c0_176, %c1536] : memref<32x2048xf32, #tpu.memory_space<vmem>>, vector<32x128xf32>
    %584 = tpu.transpose %227, [1, 0, 2] : vector<2x8x32xf32> -> vector<8x2x32xf32>
    %585 = vector.shape_cast %584 : vector<8x2x32xf32> to vector<16x32xf32>
    %cst_177 = arith.constant dense<0.000000e+00> : vector<16x128xf32>
    %586 = tpu.matmul %585, %582, %cst_177 {dimension_numbers = #tpu.dot_dimension_numbers<[1], [0], [0], [1], [0, 0, 1, 1], [], []>} : vector<16x32xf32>, vector<32x128xf32>, vector<16x128xf32> -> vector<16x128xf32>
    %c23 = arith.constant 23 : index
    %c0_178 = arith.constant 0 : index
    %587 = vector.load %arg5[%c23, %c0_178] : memref<32x128xf32, #tpu.memory_space<vmem>>, vector<1x128xf32>
    %588 = vector.broadcast %587 : vector<1x128xf32> to vector<16x128xf32>
    %589 = arith.addf %586, %588 : vector<16x128xf32>
    %590 = vector.shape_cast %589 : vector<16x128xf32> to vector<8x2x128xf32>
    %cst_179 = arith.constant 0.000000e+00 : f32
    %591 = vector.broadcast %cst_179 : f32 to vector<2x32xf32>
    %cst_180 = arith.constant 0.000000e+00 : f32
    %592 = vector.broadcast %cst_180 : f32 to vector<2x32xf32>
    %593 = vector.extract_strided_slice %590 {offsets = [0, 0, 0], sizes = [1, 2, 128], strides = [1, 1, 1]} : vector<8x2x128xf32> to vector<1x2x128xf32>
    %594 = vector.shape_cast %593 : vector<1x2x128xf32> to vector<2x128xf32>
    %cst_181 = arith.constant dense<0.000000e+00> : vector<2x128xf32>
    %595 = tpu.matmul %591, %583, %cst_181 {dimension_numbers = #tpu.dot_dimension_numbers<[1], [0], [0], [1], [0, 0, 1, 1], [], []>} : vector<2x32xf32>, vector<32x128xf32>, vector<2x128xf32> -> vector<2x128xf32>
    %596 = arith.addf %594, %595 : vector<2x128xf32>
    %597 = arith.negf %596 : vector<2x128xf32>
    %598 = math.exp %597 : vector<2x128xf32>
    %cst_182 = arith.constant 1.000000e+00 : f32
    %599 = vector.broadcast %cst_182 : f32 to vector<2x128xf32>
    %600 = arith.addf %599, %598 : vector<2x128xf32>
    %601 = arith.divf %599, %600 : vector<2x128xf32>
    %602 = math.tanh %596 : vector<2x128xf32>
    %603 = vector.extract_strided_slice %601 {offsets = [0, 0], sizes = [2, 32], strides = [1, 1]} : vector<2x128xf32> to vector<2x32xf32>
    %604 = vector.extract_strided_slice %601 {offsets = [0, 32], sizes = [2, 32], strides = [1, 1]} : vector<2x128xf32> to vector<2x32xf32>
    %605 = vector.extract_strided_slice %602 {offsets = [0, 64], sizes = [2, 32], strides = [1, 1]} : vector<2x128xf32> to vector<2x32xf32>
    %606 = vector.extract_strided_slice %601 {offsets = [0, 96], sizes = [2, 32], strides = [1, 1]} : vector<2x128xf32> to vector<2x32xf32>
    %607 = arith.mulf %604, %592 : vector<2x32xf32>
    %608 = arith.mulf %603, %605 : vector<2x32xf32>
    %609 = arith.addf %607, %608 : vector<2x32xf32>
    %610 = math.tanh %609 : vector<2x32xf32>
    %611 = arith.mulf %606, %610 : vector<2x32xf32>
    %c0_i32_183 = arith.constant 0 : i32
    %612 = vector.broadcast %c0_i32_183 : i32 to vector<2x1xi32>
    %613 = arith.cmpi sgt, %13, %612 : vector<2x1xi32>
    %614 = vector.shape_cast %613 : vector<2x1xi1> to vector<2x1xi1>
    %615 = vector.broadcast %614 : vector<2x1xi1> to vector<2x32xi1>
    %616 = arith.select %615, %611, %591 : vector<2x32xi1>, vector<2x32xf32>
    %617 = vector.shape_cast %613 : vector<2x1xi1> to vector<2x1xi1>
    %618 = vector.broadcast %617 : vector<2x1xi1> to vector<2x32xi1>
    %619 = arith.select %618, %609, %592 : vector<2x32xi1>, vector<2x32xf32>
    %620 = vector.extract_strided_slice %590 {offsets = [1, 0, 0], sizes = [1, 2, 128], strides = [1, 1, 1]} : vector<8x2x128xf32> to vector<1x2x128xf32>
    %621 = vector.shape_cast %620 : vector<1x2x128xf32> to vector<2x128xf32>
    %cst_184 = arith.constant dense<0.000000e+00> : vector<2x128xf32>
    %622 = tpu.matmul %616, %583, %cst_184 {dimension_numbers = #tpu.dot_dimension_numbers<[1], [0], [0], [1], [0, 0, 1, 1], [], []>} : vector<2x32xf32>, vector<32x128xf32>, vector<2x128xf32> -> vector<2x128xf32>
    %623 = arith.addf %621, %622 : vector<2x128xf32>
    %624 = arith.negf %623 : vector<2x128xf32>
    %625 = math.exp %624 : vector<2x128xf32>
    %cst_185 = arith.constant 1.000000e+00 : f32
    %626 = vector.broadcast %cst_185 : f32 to vector<2x128xf32>
    %627 = arith.addf %626, %625 : vector<2x128xf32>
    %628 = arith.divf %626, %627 : vector<2x128xf32>
    %629 = math.tanh %623 : vector<2x128xf32>
    %630 = vector.extract_strided_slice %628 {offsets = [0, 0], sizes = [2, 32], strides = [1, 1]} : vector<2x128xf32> to vector<2x32xf32>
    %631 = vector.extract_strided_slice %628 {offsets = [0, 32], sizes = [2, 32], strides = [1, 1]} : vector<2x128xf32> to vector<2x32xf32>
    %632 = vector.extract_strided_slice %629 {offsets = [0, 64], sizes = [2, 32], strides = [1, 1]} : vector<2x128xf32> to vector<2x32xf32>
    %633 = vector.extract_strided_slice %628 {offsets = [0, 96], sizes = [2, 32], strides = [1, 1]} : vector<2x128xf32> to vector<2x32xf32>
    %634 = arith.mulf %631, %619 : vector<2x32xf32>
    %635 = arith.mulf %630, %632 : vector<2x32xf32>
    %636 = arith.addf %634, %635 : vector<2x32xf32>
    %637 = math.tanh %636 : vector<2x32xf32>
    %638 = arith.mulf %633, %637 : vector<2x32xf32>
    %c1_i32_186 = arith.constant 1 : i32
    %639 = vector.broadcast %c1_i32_186 : i32 to vector<2x1xi32>
    %640 = arith.cmpi sgt, %13, %639 : vector<2x1xi32>
    %641 = vector.shape_cast %640 : vector<2x1xi1> to vector<2x1xi1>
    %642 = vector.broadcast %641 : vector<2x1xi1> to vector<2x32xi1>
    %643 = arith.select %642, %638, %616 : vector<2x32xi1>, vector<2x32xf32>
    %644 = vector.shape_cast %640 : vector<2x1xi1> to vector<2x1xi1>
    %645 = vector.broadcast %644 : vector<2x1xi1> to vector<2x32xi1>
    %646 = arith.select %645, %636, %619 : vector<2x32xi1>, vector<2x32xf32>
    %647 = vector.extract_strided_slice %590 {offsets = [2, 0, 0], sizes = [1, 2, 128], strides = [1, 1, 1]} : vector<8x2x128xf32> to vector<1x2x128xf32>
    %648 = vector.shape_cast %647 : vector<1x2x128xf32> to vector<2x128xf32>
    %cst_187 = arith.constant dense<0.000000e+00> : vector<2x128xf32>
    %649 = tpu.matmul %643, %583, %cst_187 {dimension_numbers = #tpu.dot_dimension_numbers<[1], [0], [0], [1], [0, 0, 1, 1], [], []>} : vector<2x32xf32>, vector<32x128xf32>, vector<2x128xf32> -> vector<2x128xf32>
    %650 = arith.addf %648, %649 : vector<2x128xf32>
    %651 = arith.negf %650 : vector<2x128xf32>
    %652 = math.exp %651 : vector<2x128xf32>
    %cst_188 = arith.constant 1.000000e+00 : f32
    %653 = vector.broadcast %cst_188 : f32 to vector<2x128xf32>
    %654 = arith.addf %653, %652 : vector<2x128xf32>
    %655 = arith.divf %653, %654 : vector<2x128xf32>
    %656 = math.tanh %650 : vector<2x128xf32>
    %657 = vector.extract_strided_slice %655 {offsets = [0, 0], sizes = [2, 32], strides = [1, 1]} : vector<2x128xf32> to vector<2x32xf32>
    %658 = vector.extract_strided_slice %655 {offsets = [0, 32], sizes = [2, 32], strides = [1, 1]} : vector<2x128xf32> to vector<2x32xf32>
    %659 = vector.extract_strided_slice %656 {offsets = [0, 64], sizes = [2, 32], strides = [1, 1]} : vector<2x128xf32> to vector<2x32xf32>
    %660 = vector.extract_strided_slice %655 {offsets = [0, 96], sizes = [2, 32], strides = [1, 1]} : vector<2x128xf32> to vector<2x32xf32>
    %661 = arith.mulf %658, %646 : vector<2x32xf32>
    %662 = arith.mulf %657, %659 : vector<2x32xf32>
    %663 = arith.addf %661, %662 : vector<2x32xf32>
    %664 = math.tanh %663 : vector<2x32xf32>
    %665 = arith.mulf %660, %664 : vector<2x32xf32>
    %c2_i32 = arith.constant 2 : i32
    %666 = vector.broadcast %c2_i32 : i32 to vector<2x1xi32>
    %667 = arith.cmpi sgt, %13, %666 : vector<2x1xi32>
    %668 = vector.shape_cast %667 : vector<2x1xi1> to vector<2x1xi1>
    %669 = vector.broadcast %668 : vector<2x1xi1> to vector<2x32xi1>
    %670 = arith.select %669, %665, %643 : vector<2x32xi1>, vector<2x32xf32>
    %671 = vector.shape_cast %667 : vector<2x1xi1> to vector<2x1xi1>
    %672 = vector.broadcast %671 : vector<2x1xi1> to vector<2x32xi1>
    %673 = arith.select %672, %663, %646 : vector<2x32xi1>, vector<2x32xf32>
    %674 = vector.extract_strided_slice %590 {offsets = [3, 0, 0], sizes = [1, 2, 128], strides = [1, 1, 1]} : vector<8x2x128xf32> to vector<1x2x128xf32>
    %675 = vector.shape_cast %674 : vector<1x2x128xf32> to vector<2x128xf32>
    %cst_189 = arith.constant dense<0.000000e+00> : vector<2x128xf32>
    %676 = tpu.matmul %670, %583, %cst_189 {dimension_numbers = #tpu.dot_dimension_numbers<[1], [0], [0], [1], [0, 0, 1, 1], [], []>} : vector<2x32xf32>, vector<32x128xf32>, vector<2x128xf32> -> vector<2x128xf32>
    %677 = arith.addf %675, %676 : vector<2x128xf32>
    %678 = arith.negf %677 : vector<2x128xf32>
    %679 = math.exp %678 : vector<2x128xf32>
    %cst_190 = arith.constant 1.000000e+00 : f32
    %680 = vector.broadcast %cst_190 : f32 to vector<2x128xf32>
    %681 = arith.addf %680, %679 : vector<2x128xf32>
    %682 = arith.divf %680, %681 : vector<2x128xf32>
    %683 = math.tanh %677 : vector<2x128xf32>
    %684 = vector.extract_strided_slice %682 {offsets = [0, 0], sizes = [2, 32], strides = [1, 1]} : vector<2x128xf32> to vector<2x32xf32>
    %685 = vector.extract_strided_slice %682 {offsets = [0, 32], sizes = [2, 32], strides = [1, 1]} : vector<2x128xf32> to vector<2x32xf32>
    %686 = vector.extract_strided_slice %683 {offsets = [0, 64], sizes = [2, 32], strides = [1, 1]} : vector<2x128xf32> to vector<2x32xf32>
    %687 = vector.extract_strided_slice %682 {offsets = [0, 96], sizes = [2, 32], strides = [1, 1]} : vector<2x128xf32> to vector<2x32xf32>
    %688 = arith.mulf %685, %673 : vector<2x32xf32>
    %689 = arith.mulf %684, %686 : vector<2x32xf32>
    %690 = arith.addf %688, %689 : vector<2x32xf32>
    %691 = math.tanh %690 : vector<2x32xf32>
    %692 = arith.mulf %687, %691 : vector<2x32xf32>
    %c3_i32 = arith.constant 3 : i32
    %693 = vector.broadcast %c3_i32 : i32 to vector<2x1xi32>
    %694 = arith.cmpi sgt, %13, %693 : vector<2x1xi32>
    %695 = vector.shape_cast %694 : vector<2x1xi1> to vector<2x1xi1>
    %696 = vector.broadcast %695 : vector<2x1xi1> to vector<2x32xi1>
    %697 = arith.select %696, %692, %670 : vector<2x32xi1>, vector<2x32xf32>
    %698 = vector.shape_cast %694 : vector<2x1xi1> to vector<2x1xi1>
    %699 = vector.broadcast %698 : vector<2x1xi1> to vector<2x32xi1>
    %700 = arith.select %699, %690, %673 : vector<2x32xi1>, vector<2x32xf32>
    %701 = vector.extract_strided_slice %590 {offsets = [4, 0, 0], sizes = [1, 2, 128], strides = [1, 1, 1]} : vector<8x2x128xf32> to vector<1x2x128xf32>
    %702 = vector.shape_cast %701 : vector<1x2x128xf32> to vector<2x128xf32>
    %cst_191 = arith.constant dense<0.000000e+00> : vector<2x128xf32>
    %703 = tpu.matmul %697, %583, %cst_191 {dimension_numbers = #tpu.dot_dimension_numbers<[1], [0], [0], [1], [0, 0, 1, 1], [], []>} : vector<2x32xf32>, vector<32x128xf32>, vector<2x128xf32> -> vector<2x128xf32>
    %704 = arith.addf %702, %703 : vector<2x128xf32>
    %705 = arith.negf %704 : vector<2x128xf32>
    %706 = math.exp %705 : vector<2x128xf32>
    %cst_192 = arith.constant 1.000000e+00 : f32
    %707 = vector.broadcast %cst_192 : f32 to vector<2x128xf32>
    %708 = arith.addf %707, %706 : vector<2x128xf32>
    %709 = arith.divf %707, %708 : vector<2x128xf32>
    %710 = math.tanh %704 : vector<2x128xf32>
    %711 = vector.extract_strided_slice %709 {offsets = [0, 0], sizes = [2, 32], strides = [1, 1]} : vector<2x128xf32> to vector<2x32xf32>
    %712 = vector.extract_strided_slice %709 {offsets = [0, 32], sizes = [2, 32], strides = [1, 1]} : vector<2x128xf32> to vector<2x32xf32>
    %713 = vector.extract_strided_slice %710 {offsets = [0, 64], sizes = [2, 32], strides = [1, 1]} : vector<2x128xf32> to vector<2x32xf32>
    %714 = vector.extract_strided_slice %709 {offsets = [0, 96], sizes = [2, 32], strides = [1, 1]} : vector<2x128xf32> to vector<2x32xf32>
    %715 = arith.mulf %712, %700 : vector<2x32xf32>
    %716 = arith.mulf %711, %713 : vector<2x32xf32>
    %717 = arith.addf %715, %716 : vector<2x32xf32>
    %718 = math.tanh %717 : vector<2x32xf32>
    %719 = arith.mulf %714, %718 : vector<2x32xf32>
    %c4_i32 = arith.constant 4 : i32
    %720 = vector.broadcast %c4_i32 : i32 to vector<2x1xi32>
    %721 = arith.cmpi sgt, %13, %720 : vector<2x1xi32>
    %722 = vector.shape_cast %721 : vector<2x1xi1> to vector<2x1xi1>
    %723 = vector.broadcast %722 : vector<2x1xi1> to vector<2x32xi1>
    %724 = arith.select %723, %719, %697 : vector<2x32xi1>, vector<2x32xf32>
    %725 = vector.shape_cast %721 : vector<2x1xi1> to vector<2x1xi1>
    %726 = vector.broadcast %725 : vector<2x1xi1> to vector<2x32xi1>
    %727 = arith.select %726, %717, %700 : vector<2x32xi1>, vector<2x32xf32>
    %728 = vector.extract_strided_slice %590 {offsets = [5, 0, 0], sizes = [1, 2, 128], strides = [1, 1, 1]} : vector<8x2x128xf32> to vector<1x2x128xf32>
    %729 = vector.shape_cast %728 : vector<1x2x128xf32> to vector<2x128xf32>
    %cst_193 = arith.constant dense<0.000000e+00> : vector<2x128xf32>
    %730 = tpu.matmul %724, %583, %cst_193 {dimension_numbers = #tpu.dot_dimension_numbers<[1], [0], [0], [1], [0, 0, 1, 1], [], []>} : vector<2x32xf32>, vector<32x128xf32>, vector<2x128xf32> -> vector<2x128xf32>
    %731 = arith.addf %729, %730 : vector<2x128xf32>
    %732 = arith.negf %731 : vector<2x128xf32>
    %733 = math.exp %732 : vector<2x128xf32>
    %cst_194 = arith.constant 1.000000e+00 : f32
    %734 = vector.broadcast %cst_194 : f32 to vector<2x128xf32>
    %735 = arith.addf %734, %733 : vector<2x128xf32>
    %736 = arith.divf %734, %735 : vector<2x128xf32>
    %737 = math.tanh %731 : vector<2x128xf32>
    %738 = vector.extract_strided_slice %736 {offsets = [0, 0], sizes = [2, 32], strides = [1, 1]} : vector<2x128xf32> to vector<2x32xf32>
    %739 = vector.extract_strided_slice %736 {offsets = [0, 32], sizes = [2, 32], strides = [1, 1]} : vector<2x128xf32> to vector<2x32xf32>
    %740 = vector.extract_strided_slice %737 {offsets = [0, 64], sizes = [2, 32], strides = [1, 1]} : vector<2x128xf32> to vector<2x32xf32>
    %741 = vector.extract_strided_slice %736 {offsets = [0, 96], sizes = [2, 32], strides = [1, 1]} : vector<2x128xf32> to vector<2x32xf32>
    %742 = arith.mulf %739, %727 : vector<2x32xf32>
    %743 = arith.mulf %738, %740 : vector<2x32xf32>
    %744 = arith.addf %742, %743 : vector<2x32xf32>
    %745 = math.tanh %744 : vector<2x32xf32>
    %746 = arith.mulf %741, %745 : vector<2x32xf32>
    %c5_i32 = arith.constant 5 : i32
    %747 = vector.broadcast %c5_i32 : i32 to vector<2x1xi32>
    %748 = arith.cmpi sgt, %13, %747 : vector<2x1xi32>
    %749 = vector.shape_cast %748 : vector<2x1xi1> to vector<2x1xi1>
    %750 = vector.broadcast %749 : vector<2x1xi1> to vector<2x32xi1>
    %751 = arith.select %750, %746, %724 : vector<2x32xi1>, vector<2x32xf32>
    %752 = vector.shape_cast %748 : vector<2x1xi1> to vector<2x1xi1>
    %753 = vector.broadcast %752 : vector<2x1xi1> to vector<2x32xi1>
    %754 = arith.select %753, %744, %727 : vector<2x32xi1>, vector<2x32xf32>
    %755 = vector.extract_strided_slice %590 {offsets = [6, 0, 0], sizes = [1, 2, 128], strides = [1, 1, 1]} : vector<8x2x128xf32> to vector<1x2x128xf32>
    %756 = vector.shape_cast %755 : vector<1x2x128xf32> to vector<2x128xf32>
    %cst_195 = arith.constant dense<0.000000e+00> : vector<2x128xf32>
    %757 = tpu.matmul %751, %583, %cst_195 {dimension_numbers = #tpu.dot_dimension_numbers<[1], [0], [0], [1], [0, 0, 1, 1], [], []>} : vector<2x32xf32>, vector<32x128xf32>, vector<2x128xf32> -> vector<2x128xf32>
    %758 = arith.addf %756, %757 : vector<2x128xf32>
    %759 = arith.negf %758 : vector<2x128xf32>
    %760 = math.exp %759 : vector<2x128xf32>
    %cst_196 = arith.constant 1.000000e+00 : f32
    %761 = vector.broadcast %cst_196 : f32 to vector<2x128xf32>
    %762 = arith.addf %761, %760 : vector<2x128xf32>
    %763 = arith.divf %761, %762 : vector<2x128xf32>
    %764 = math.tanh %758 : vector<2x128xf32>
    %765 = vector.extract_strided_slice %763 {offsets = [0, 0], sizes = [2, 32], strides = [1, 1]} : vector<2x128xf32> to vector<2x32xf32>
    %766 = vector.extract_strided_slice %763 {offsets = [0, 32], sizes = [2, 32], strides = [1, 1]} : vector<2x128xf32> to vector<2x32xf32>
    %767 = vector.extract_strided_slice %764 {offsets = [0, 64], sizes = [2, 32], strides = [1, 1]} : vector<2x128xf32> to vector<2x32xf32>
    %768 = vector.extract_strided_slice %763 {offsets = [0, 96], sizes = [2, 32], strides = [1, 1]} : vector<2x128xf32> to vector<2x32xf32>
    %769 = arith.mulf %766, %754 : vector<2x32xf32>
    %770 = arith.mulf %765, %767 : vector<2x32xf32>
    %771 = arith.addf %769, %770 : vector<2x32xf32>
    %772 = math.tanh %771 : vector<2x32xf32>
    %773 = arith.mulf %768, %772 : vector<2x32xf32>
    %c6_i32 = arith.constant 6 : i32
    %774 = vector.broadcast %c6_i32 : i32 to vector<2x1xi32>
    %775 = arith.cmpi sgt, %13, %774 : vector<2x1xi32>
    %776 = vector.shape_cast %775 : vector<2x1xi1> to vector<2x1xi1>
    %777 = vector.broadcast %776 : vector<2x1xi1> to vector<2x32xi1>
    %778 = arith.select %777, %773, %751 : vector<2x32xi1>, vector<2x32xf32>
    %779 = vector.shape_cast %775 : vector<2x1xi1> to vector<2x1xi1>
    %780 = vector.broadcast %779 : vector<2x1xi1> to vector<2x32xi1>
    %781 = arith.select %780, %771, %754 : vector<2x32xi1>, vector<2x32xf32>
    %782 = vector.extract_strided_slice %590 {offsets = [7, 0, 0], sizes = [1, 2, 128], strides = [1, 1, 1]} : vector<8x2x128xf32> to vector<1x2x128xf32>
    %783 = vector.shape_cast %782 : vector<1x2x128xf32> to vector<2x128xf32>
    %cst_197 = arith.constant dense<0.000000e+00> : vector<2x128xf32>
    %784 = tpu.matmul %778, %583, %cst_197 {dimension_numbers = #tpu.dot_dimension_numbers<[1], [0], [0], [1], [0, 0, 1, 1], [], []>} : vector<2x32xf32>, vector<32x128xf32>, vector<2x128xf32> -> vector<2x128xf32>
    %785 = arith.addf %783, %784 : vector<2x128xf32>
    %786 = arith.negf %785 : vector<2x128xf32>
    %787 = math.exp %786 : vector<2x128xf32>
    %cst_198 = arith.constant 1.000000e+00 : f32
    %788 = vector.broadcast %cst_198 : f32 to vector<2x128xf32>
    %789 = arith.addf %788, %787 : vector<2x128xf32>
    %790 = arith.divf %788, %789 : vector<2x128xf32>
    %791 = math.tanh %785 : vector<2x128xf32>
    %792 = vector.extract_strided_slice %790 {offsets = [0, 0], sizes = [2, 32], strides = [1, 1]} : vector<2x128xf32> to vector<2x32xf32>
    %793 = vector.extract_strided_slice %790 {offsets = [0, 32], sizes = [2, 32], strides = [1, 1]} : vector<2x128xf32> to vector<2x32xf32>
    %794 = vector.extract_strided_slice %791 {offsets = [0, 64], sizes = [2, 32], strides = [1, 1]} : vector<2x128xf32> to vector<2x32xf32>
    %795 = vector.extract_strided_slice %790 {offsets = [0, 96], sizes = [2, 32], strides = [1, 1]} : vector<2x128xf32> to vector<2x32xf32>
    %796 = arith.mulf %793, %781 : vector<2x32xf32>
    %797 = arith.mulf %792, %794 : vector<2x32xf32>
    %798 = arith.addf %796, %797 : vector<2x32xf32>
    %799 = math.tanh %798 : vector<2x32xf32>
    %800 = arith.mulf %795, %799 : vector<2x32xf32>
    %c7_i32 = arith.constant 7 : i32
    %801 = vector.broadcast %c7_i32 : i32 to vector<2x1xi32>
    %802 = arith.cmpi sgt, %13, %801 : vector<2x1xi32>
    %803 = vector.shape_cast %802 : vector<2x1xi1> to vector<2x1xi1>
    %804 = vector.broadcast %803 : vector<2x1xi1> to vector<2x32xi1>
    %805 = arith.select %804, %800, %778 : vector<2x32xi1>, vector<2x32xf32>
    %806 = vector.shape_cast %802 : vector<2x1xi1> to vector<2x1xi1>
    %807 = vector.broadcast %806 : vector<2x1xi1> to vector<2x32xi1>
    %808 = arith.select %807, %798, %781 : vector<2x32xi1>, vector<2x32xf32>
    %c0_199 = arith.constant 0 : index
    %c1664 = arith.constant 1664 : index
    %809 = vector.load %arg4[%c0_199, %c1664] : memref<32x2048xf32, #tpu.memory_space<vmem>>, vector<32x128xf32>
    %c0_200 = arith.constant 0 : index
    %c1792 = arith.constant 1792 : index
    %810 = vector.load %arg4[%c0_200, %c1792] : memref<32x2048xf32, #tpu.memory_space<vmem>>, vector<32x128xf32>
    %811 = tpu.transpose %581, [1, 0, 2] : vector<2x8x32xf32> -> vector<8x2x32xf32>
    %812 = vector.shape_cast %811 : vector<8x2x32xf32> to vector<16x32xf32>
    %cst_201 = arith.constant dense<0.000000e+00> : vector<16x128xf32>
    %813 = tpu.matmul %812, %809, %cst_201 {dimension_numbers = #tpu.dot_dimension_numbers<[1], [0], [0], [1], [0, 0, 1, 1], [], []>} : vector<16x32xf32>, vector<32x128xf32>, vector<16x128xf32> -> vector<16x128xf32>
    %c24 = arith.constant 24 : index
    %c0_202 = arith.constant 0 : index
    %814 = vector.load %arg5[%c24, %c0_202] : memref<32x128xf32, #tpu.memory_space<vmem>>, vector<1x128xf32>
    %815 = vector.broadcast %814 : vector<1x128xf32> to vector<16x128xf32>
    %816 = arith.addf %813, %815 : vector<16x128xf32>
    %817 = vector.shape_cast %816 : vector<16x128xf32> to vector<8x2x128xf32>
    %818 = vector.extract_strided_slice %817 {offsets = [0, 0, 0], sizes = [1, 2, 128], strides = [1, 1, 1]} : vector<8x2x128xf32> to vector<1x2x128xf32>
    %819 = vector.shape_cast %818 : vector<1x2x128xf32> to vector<2x128xf32>
    %cst_203 = arith.constant dense<0.000000e+00> : vector<2x128xf32>
    %820 = tpu.matmul %805, %810, %cst_203 {dimension_numbers = #tpu.dot_dimension_numbers<[1], [0], [0], [1], [0, 0, 1, 1], [], []>} : vector<2x32xf32>, vector<32x128xf32>, vector<2x128xf32> -> vector<2x128xf32>
    %821 = arith.addf %819, %820 : vector<2x128xf32>
    %822 = arith.negf %821 : vector<2x128xf32>
    %823 = math.exp %822 : vector<2x128xf32>
    %cst_204 = arith.constant 1.000000e+00 : f32
    %824 = vector.broadcast %cst_204 : f32 to vector<2x128xf32>
    %825 = arith.addf %824, %823 : vector<2x128xf32>
    %826 = arith.divf %824, %825 : vector<2x128xf32>
    %827 = math.tanh %821 : vector<2x128xf32>
    %828 = vector.extract_strided_slice %826 {offsets = [0, 0], sizes = [2, 32], strides = [1, 1]} : vector<2x128xf32> to vector<2x32xf32>
    %829 = vector.extract_strided_slice %826 {offsets = [0, 32], sizes = [2, 32], strides = [1, 1]} : vector<2x128xf32> to vector<2x32xf32>
    %830 = vector.extract_strided_slice %827 {offsets = [0, 64], sizes = [2, 32], strides = [1, 1]} : vector<2x128xf32> to vector<2x32xf32>
    %831 = vector.extract_strided_slice %826 {offsets = [0, 96], sizes = [2, 32], strides = [1, 1]} : vector<2x128xf32> to vector<2x32xf32>
    %832 = arith.mulf %829, %808 : vector<2x32xf32>
    %833 = arith.mulf %828, %830 : vector<2x32xf32>
    %834 = arith.addf %832, %833 : vector<2x32xf32>
    %835 = math.tanh %834 : vector<2x32xf32>
    %836 = arith.mulf %831, %835 : vector<2x32xf32>
    %837 = vector.extract_strided_slice %817 {offsets = [1, 0, 0], sizes = [1, 2, 128], strides = [1, 1, 1]} : vector<8x2x128xf32> to vector<1x2x128xf32>
    %838 = vector.shape_cast %837 : vector<1x2x128xf32> to vector<2x128xf32>
    %cst_205 = arith.constant dense<0.000000e+00> : vector<2x128xf32>
    %839 = tpu.matmul %836, %810, %cst_205 {dimension_numbers = #tpu.dot_dimension_numbers<[1], [0], [0], [1], [0, 0, 1, 1], [], []>} : vector<2x32xf32>, vector<32x128xf32>, vector<2x128xf32> -> vector<2x128xf32>
    %840 = arith.addf %838, %839 : vector<2x128xf32>
    %841 = arith.negf %840 : vector<2x128xf32>
    %842 = math.exp %841 : vector<2x128xf32>
    %cst_206 = arith.constant 1.000000e+00 : f32
    %843 = vector.broadcast %cst_206 : f32 to vector<2x128xf32>
    %844 = arith.addf %843, %842 : vector<2x128xf32>
    %845 = arith.divf %843, %844 : vector<2x128xf32>
    %846 = math.tanh %840 : vector<2x128xf32>
    %847 = vector.extract_strided_slice %845 {offsets = [0, 0], sizes = [2, 32], strides = [1, 1]} : vector<2x128xf32> to vector<2x32xf32>
    %848 = vector.extract_strided_slice %845 {offsets = [0, 32], sizes = [2, 32], strides = [1, 1]} : vector<2x128xf32> to vector<2x32xf32>
    %849 = vector.extract_strided_slice %846 {offsets = [0, 64], sizes = [2, 32], strides = [1, 1]} : vector<2x128xf32> to vector<2x32xf32>
    %850 = vector.extract_strided_slice %845 {offsets = [0, 96], sizes = [2, 32], strides = [1, 1]} : vector<2x128xf32> to vector<2x32xf32>
    %851 = arith.mulf %848, %834 : vector<2x32xf32>
    %852 = arith.mulf %847, %849 : vector<2x32xf32>
    %853 = arith.addf %851, %852 : vector<2x32xf32>
    %854 = math.tanh %853 : vector<2x32xf32>
    %855 = arith.mulf %850, %854 : vector<2x32xf32>
    %856 = vector.extract_strided_slice %817 {offsets = [2, 0, 0], sizes = [1, 2, 128], strides = [1, 1, 1]} : vector<8x2x128xf32> to vector<1x2x128xf32>
    %857 = vector.shape_cast %856 : vector<1x2x128xf32> to vector<2x128xf32>
    %cst_207 = arith.constant dense<0.000000e+00> : vector<2x128xf32>
    %858 = tpu.matmul %855, %810, %cst_207 {dimension_numbers = #tpu.dot_dimension_numbers<[1], [0], [0], [1], [0, 0, 1, 1], [], []>} : vector<2x32xf32>, vector<32x128xf32>, vector<2x128xf32> -> vector<2x128xf32>
    %859 = arith.addf %857, %858 : vector<2x128xf32>
    %860 = arith.negf %859 : vector<2x128xf32>
    %861 = math.exp %860 : vector<2x128xf32>
    %cst_208 = arith.constant 1.000000e+00 : f32
    %862 = vector.broadcast %cst_208 : f32 to vector<2x128xf32>
    %863 = arith.addf %862, %861 : vector<2x128xf32>
    %864 = arith.divf %862, %863 : vector<2x128xf32>
    %865 = math.tanh %859 : vector<2x128xf32>
    %866 = vector.extract_strided_slice %864 {offsets = [0, 0], sizes = [2, 32], strides = [1, 1]} : vector<2x128xf32> to vector<2x32xf32>
    %867 = vector.extract_strided_slice %864 {offsets = [0, 32], sizes = [2, 32], strides = [1, 1]} : vector<2x128xf32> to vector<2x32xf32>
    %868 = vector.extract_strided_slice %865 {offsets = [0, 64], sizes = [2, 32], strides = [1, 1]} : vector<2x128xf32> to vector<2x32xf32>
    %869 = vector.extract_strided_slice %864 {offsets = [0, 96], sizes = [2, 32], strides = [1, 1]} : vector<2x128xf32> to vector<2x32xf32>
    %870 = arith.mulf %867, %853 : vector<2x32xf32>
    %871 = arith.mulf %866, %868 : vector<2x32xf32>
    %872 = arith.addf %870, %871 : vector<2x32xf32>
    %873 = math.tanh %872 : vector<2x32xf32>
    %874 = arith.mulf %869, %873 : vector<2x32xf32>
    %875 = vector.extract_strided_slice %817 {offsets = [3, 0, 0], sizes = [1, 2, 128], strides = [1, 1, 1]} : vector<8x2x128xf32> to vector<1x2x128xf32>
    %876 = vector.shape_cast %875 : vector<1x2x128xf32> to vector<2x128xf32>
    %cst_209 = arith.constant dense<0.000000e+00> : vector<2x128xf32>
    %877 = tpu.matmul %874, %810, %cst_209 {dimension_numbers = #tpu.dot_dimension_numbers<[1], [0], [0], [1], [0, 0, 1, 1], [], []>} : vector<2x32xf32>, vector<32x128xf32>, vector<2x128xf32> -> vector<2x128xf32>
    %878 = arith.addf %876, %877 : vector<2x128xf32>
    %879 = arith.negf %878 : vector<2x128xf32>
    %880 = math.exp %879 : vector<2x128xf32>
    %cst_210 = arith.constant 1.000000e+00 : f32
    %881 = vector.broadcast %cst_210 : f32 to vector<2x128xf32>
    %882 = arith.addf %881, %880 : vector<2x128xf32>
    %883 = arith.divf %881, %882 : vector<2x128xf32>
    %884 = math.tanh %878 : vector<2x128xf32>
    %885 = vector.extract_strided_slice %883 {offsets = [0, 0], sizes = [2, 32], strides = [1, 1]} : vector<2x128xf32> to vector<2x32xf32>
    %886 = vector.extract_strided_slice %883 {offsets = [0, 32], sizes = [2, 32], strides = [1, 1]} : vector<2x128xf32> to vector<2x32xf32>
    %887 = vector.extract_strided_slice %884 {offsets = [0, 64], sizes = [2, 32], strides = [1, 1]} : vector<2x128xf32> to vector<2x32xf32>
    %888 = vector.extract_strided_slice %883 {offsets = [0, 96], sizes = [2, 32], strides = [1, 1]} : vector<2x128xf32> to vector<2x32xf32>
    %889 = arith.mulf %886, %872 : vector<2x32xf32>
    %890 = arith.mulf %885, %887 : vector<2x32xf32>
    %891 = arith.addf %889, %890 : vector<2x32xf32>
    %892 = math.tanh %891 : vector<2x32xf32>
    %893 = arith.mulf %888, %892 : vector<2x32xf32>
    %894 = vector.extract_strided_slice %817 {offsets = [4, 0, 0], sizes = [1, 2, 128], strides = [1, 1, 1]} : vector<8x2x128xf32> to vector<1x2x128xf32>
    %895 = vector.shape_cast %894 : vector<1x2x128xf32> to vector<2x128xf32>
    %cst_211 = arith.constant dense<0.000000e+00> : vector<2x128xf32>
    %896 = tpu.matmul %893, %810, %cst_211 {dimension_numbers = #tpu.dot_dimension_numbers<[1], [0], [0], [1], [0, 0, 1, 1], [], []>} : vector<2x32xf32>, vector<32x128xf32>, vector<2x128xf32> -> vector<2x128xf32>
    %897 = arith.addf %895, %896 : vector<2x128xf32>
    %898 = arith.negf %897 : vector<2x128xf32>
    %899 = math.exp %898 : vector<2x128xf32>
    %cst_212 = arith.constant 1.000000e+00 : f32
    %900 = vector.broadcast %cst_212 : f32 to vector<2x128xf32>
    %901 = arith.addf %900, %899 : vector<2x128xf32>
    %902 = arith.divf %900, %901 : vector<2x128xf32>
    %903 = math.tanh %897 : vector<2x128xf32>
    %904 = vector.extract_strided_slice %902 {offsets = [0, 0], sizes = [2, 32], strides = [1, 1]} : vector<2x128xf32> to vector<2x32xf32>
    %905 = vector.extract_strided_slice %902 {offsets = [0, 32], sizes = [2, 32], strides = [1, 1]} : vector<2x128xf32> to vector<2x32xf32>
    %906 = vector.extract_strided_slice %903 {offsets = [0, 64], sizes = [2, 32], strides = [1, 1]} : vector<2x128xf32> to vector<2x32xf32>
    %907 = vector.extract_strided_slice %902 {offsets = [0, 96], sizes = [2, 32], strides = [1, 1]} : vector<2x128xf32> to vector<2x32xf32>
    %908 = arith.mulf %905, %891 : vector<2x32xf32>
    %909 = arith.mulf %904, %906 : vector<2x32xf32>
    %910 = arith.addf %908, %909 : vector<2x32xf32>
    %911 = math.tanh %910 : vector<2x32xf32>
    %912 = arith.mulf %907, %911 : vector<2x32xf32>
    %913 = vector.extract_strided_slice %817 {offsets = [5, 0, 0], sizes = [1, 2, 128], strides = [1, 1, 1]} : vector<8x2x128xf32> to vector<1x2x128xf32>
    %914 = vector.shape_cast %913 : vector<1x2x128xf32> to vector<2x128xf32>
    %cst_213 = arith.constant dense<0.000000e+00> : vector<2x128xf32>
    %915 = tpu.matmul %912, %810, %cst_213 {dimension_numbers = #tpu.dot_dimension_numbers<[1], [0], [0], [1], [0, 0, 1, 1], [], []>} : vector<2x32xf32>, vector<32x128xf32>, vector<2x128xf32> -> vector<2x128xf32>
    %916 = arith.addf %914, %915 : vector<2x128xf32>
    %917 = arith.negf %916 : vector<2x128xf32>
    %918 = math.exp %917 : vector<2x128xf32>
    %cst_214 = arith.constant 1.000000e+00 : f32
    %919 = vector.broadcast %cst_214 : f32 to vector<2x128xf32>
    %920 = arith.addf %919, %918 : vector<2x128xf32>
    %921 = arith.divf %919, %920 : vector<2x128xf32>
    %922 = math.tanh %916 : vector<2x128xf32>
    %923 = vector.extract_strided_slice %921 {offsets = [0, 0], sizes = [2, 32], strides = [1, 1]} : vector<2x128xf32> to vector<2x32xf32>
    %924 = vector.extract_strided_slice %921 {offsets = [0, 32], sizes = [2, 32], strides = [1, 1]} : vector<2x128xf32> to vector<2x32xf32>
    %925 = vector.extract_strided_slice %922 {offsets = [0, 64], sizes = [2, 32], strides = [1, 1]} : vector<2x128xf32> to vector<2x32xf32>
    %926 = vector.extract_strided_slice %921 {offsets = [0, 96], sizes = [2, 32], strides = [1, 1]} : vector<2x128xf32> to vector<2x32xf32>
    %927 = arith.mulf %924, %910 : vector<2x32xf32>
    %928 = arith.mulf %923, %925 : vector<2x32xf32>
    %929 = arith.addf %927, %928 : vector<2x32xf32>
    %930 = math.tanh %929 : vector<2x32xf32>
    %931 = arith.mulf %926, %930 : vector<2x32xf32>
    %932 = vector.extract_strided_slice %817 {offsets = [6, 0, 0], sizes = [1, 2, 128], strides = [1, 1, 1]} : vector<8x2x128xf32> to vector<1x2x128xf32>
    %933 = vector.shape_cast %932 : vector<1x2x128xf32> to vector<2x128xf32>
    %cst_215 = arith.constant dense<0.000000e+00> : vector<2x128xf32>
    %934 = tpu.matmul %931, %810, %cst_215 {dimension_numbers = #tpu.dot_dimension_numbers<[1], [0], [0], [1], [0, 0, 1, 1], [], []>} : vector<2x32xf32>, vector<32x128xf32>, vector<2x128xf32> -> vector<2x128xf32>
    %935 = arith.addf %933, %934 : vector<2x128xf32>
    %936 = arith.negf %935 : vector<2x128xf32>
    %937 = math.exp %936 : vector<2x128xf32>
    %cst_216 = arith.constant 1.000000e+00 : f32
    %938 = vector.broadcast %cst_216 : f32 to vector<2x128xf32>
    %939 = arith.addf %938, %937 : vector<2x128xf32>
    %940 = arith.divf %938, %939 : vector<2x128xf32>
    %941 = math.tanh %935 : vector<2x128xf32>
    %942 = vector.extract_strided_slice %940 {offsets = [0, 0], sizes = [2, 32], strides = [1, 1]} : vector<2x128xf32> to vector<2x32xf32>
    %943 = vector.extract_strided_slice %940 {offsets = [0, 32], sizes = [2, 32], strides = [1, 1]} : vector<2x128xf32> to vector<2x32xf32>
    %944 = vector.extract_strided_slice %941 {offsets = [0, 64], sizes = [2, 32], strides = [1, 1]} : vector<2x128xf32> to vector<2x32xf32>
    %945 = vector.extract_strided_slice %940 {offsets = [0, 96], sizes = [2, 32], strides = [1, 1]} : vector<2x128xf32> to vector<2x32xf32>
    %946 = arith.mulf %943, %929 : vector<2x32xf32>
    %947 = arith.mulf %942, %944 : vector<2x32xf32>
    %948 = arith.addf %946, %947 : vector<2x32xf32>
    %949 = math.tanh %948 : vector<2x32xf32>
    %950 = arith.mulf %945, %949 : vector<2x32xf32>
    %951 = vector.shape_cast %836 : vector<2x32xf32> to vector<1x2x32xf32>
    %952 = vector.shape_cast %855 : vector<2x32xf32> to vector<1x2x32xf32>
    %953 = vector.shape_cast %874 : vector<2x32xf32> to vector<1x2x32xf32>
    %954 = vector.shape_cast %893 : vector<2x32xf32> to vector<1x2x32xf32>
    %955 = vector.shape_cast %912 : vector<2x32xf32> to vector<1x2x32xf32>
    %956 = vector.shape_cast %931 : vector<2x32xf32> to vector<1x2x32xf32>
    %957 = vector.shape_cast %950 : vector<2x32xf32> to vector<1x2x32xf32>
    %958 = tpu.concatenate %951, %952, %953, %954, %955, %956, %957 in 0 : vector<1x2x32xf32>, vector<1x2x32xf32>, vector<1x2x32xf32>, vector<1x2x32xf32>, vector<1x2x32xf32>, vector<1x2x32xf32>, vector<1x2x32xf32> -> vector<7x2x32xf32>
    %959 = vector.shape_cast %958 : vector<7x2x32xf32> to vector<14x32xf32>
    %c0_217 = arith.constant 0 : index
    %c1920 = arith.constant 1920 : index
    %960 = vector.load %arg4[%c0_217, %c1920] : memref<32x2048xf32, #tpu.memory_space<vmem>>, vector<32x16xf32>
    %cst_218 = arith.constant dense<0.000000e+00> : vector<14x16xf32>
    %961 = tpu.matmul %959, %960, %cst_218 {dimension_numbers = #tpu.dot_dimension_numbers<[1], [0], [0], [1], [0, 0, 1, 1], [], []>} : vector<14x32xf32>, vector<32x16xf32>, vector<14x16xf32> -> vector<14x16xf32>
    %c25 = arith.constant 25 : index
    %c0_219 = arith.constant 0 : index
    %962 = vector.load %arg5[%c25, %c0_219] : memref<32x128xf32, #tpu.memory_space<vmem>>, vector<1x16xf32>
    %963 = vector.broadcast %962 : vector<1x16xf32> to vector<14x16xf32>
    %964 = arith.addf %961, %963 : vector<14x16xf32>
    %965 = vector.shape_cast %964 : vector<14x16xf32> to vector<7x2x16xf32>
    %cst_220 = arith.constant 0.000000e+00 : f32
    %966 = vector.broadcast %cst_220 : f32 to vector<2x16xf32>
    %967 = vector.extract_strided_slice %965 {offsets = [0, 0, 0], sizes = [1, 2, 16], strides = [1, 1, 1]} : vector<7x2x16xf32> to vector<1x2x16xf32>
    %968 = vector.shape_cast %967 : vector<1x2x16xf32> to vector<2x16xf32>
    %969 = vector.extract_strided_slice %965 {offsets = [1, 0, 0], sizes = [1, 2, 16], strides = [1, 1, 1]} : vector<7x2x16xf32> to vector<1x2x16xf32>
    %970 = vector.shape_cast %969 : vector<1x2x16xf32> to vector<2x16xf32>
    %971 = vector.extract_strided_slice %965 {offsets = [2, 0, 0], sizes = [1, 2, 16], strides = [1, 1, 1]} : vector<7x2x16xf32> to vector<1x2x16xf32>
    %972 = vector.shape_cast %971 : vector<1x2x16xf32> to vector<2x16xf32>
    %973 = vector.extract_strided_slice %965 {offsets = [3, 0, 0], sizes = [1, 2, 16], strides = [1, 1, 1]} : vector<7x2x16xf32> to vector<1x2x16xf32>
    %974 = vector.shape_cast %973 : vector<1x2x16xf32> to vector<2x16xf32>
    %975 = vector.extract_strided_slice %965 {offsets = [4, 0, 0], sizes = [1, 2, 16], strides = [1, 1, 1]} : vector<7x2x16xf32> to vector<1x2x16xf32>
    %976 = vector.shape_cast %975 : vector<1x2x16xf32> to vector<2x16xf32>
    %977 = vector.extract_strided_slice %965 {offsets = [5, 0, 0], sizes = [1, 2, 16], strides = [1, 1, 1]} : vector<7x2x16xf32> to vector<1x2x16xf32>
    %978 = vector.shape_cast %977 : vector<1x2x16xf32> to vector<2x16xf32>
    %979 = vector.extract_strided_slice %965 {offsets = [6, 0, 0], sizes = [1, 2, 16], strides = [1, 1, 1]} : vector<7x2x16xf32> to vector<1x2x16xf32>
    %980 = vector.shape_cast %979 : vector<1x2x16xf32> to vector<2x16xf32>
    %981 = tpu.concatenate %966, %968, %970, %972, %974, %976, %978, %980 in 1 : vector<2x16xf32>, vector<2x16xf32>, vector<2x16xf32>, vector<2x16xf32>, vector<2x16xf32>, vector<2x16xf32>, vector<2x16xf32>, vector<2x16xf32> -> vector<2x128xf32>
    %c0_221 = arith.constant 0 : index
    %c0_222 = arith.constant 0 : index
    %982 = vector.load %arg6[%c0_221, %c0_222] : memref<2x128xf32, #tpu.memory_space<vmem>>, vector<2x128xf32>
    tpu.vector_store %arg6[%c0_221, %c0_222], %981 {strides = array<i32>} : memref<2x128xf32, #tpu.memory_space<vmem>>, vector<2x128xf32>,
    return
  }
}

</mosaic_0001>

<bundles_post_ra>
// kernel: seq2seq_forward.1
= control target key start
LH: loop header
LB: loop body
LE: loop exit
PB: predicated region body
PF: predicated region fallthrough
CT: control target
= control target key end

     0   :  { %11 = vsyncpa [#allocation3], 0  ;;  %s11532_s0 = inlined_call_operand.vmem [shape: f32[2,8,32], index: 0, kind: input, shape index: {}]   ;;  %s11533_s1 = inlined_call_operand.hbm [shape: f32[2,8,32], index: 1, kind: input, shape index: {}]   ;;  %s11534_s2 = inlined_call_operand.vmem [shape: s32[2], index: 2, kind: input, shape index: {}]   ;;  %s11535_s3 = inlined_call_operand.vmem [shape: s32[2], index: 3, kind: input, shape index: {}]   ;;  %s11536_s4 = inlined_call_operand.hbm [shape: f32[32,2048], index: 4, kind: input, shape index: {}]   ;;  %s11537_s5 = inlined_call_operand.hbm [shape: f32[32,128], index: 5, kind: input, shape index: {}]   ;;  %s11538_s6 = inlined_call_operand.vmem [shape: f32[2,128], index: 6, kind: output, shape index: {}]  }
   0x1   :  { %12 = vsyncpa [#allocation4], 0 }
   0x2   :  { %13 = vsyncpa [#allocation7], 0 }
   0x3   :  { %14 = vsyncpa [#allocation9], 0  ;;  %s10368_s21 = smov [#allocation8]   ;;  %s10270_s25 = scalar_lea.hbm %s11536_s4, 8192 }
   0x4   :  { %s54_s22 = sshll.u32 %s10368_s21, 4  ;;  %p10271_p0 = scmp.ne.s32.totalorder %s11536_s4, %s10270_s25  ;;  %s55_s22 = int_to_ptr.vmem [resolvable:$true] %s54_s22 }
   0x5   :  { %p10274_p1 = scmp.lt.u32.totalorder %s10270_s25, %s11536_s4 }
   0x7   :  { %p10276_p2 = pnand %p10274_p1, %p10271_p0 }
   0x9   :  { %10279 = shalt.err (!%p10276_p2)
}
   0xa   :  { %s10280_s30 = scalar_lea.vmem %s55_s22, 8192  ;;  %p10285_p4 = scmp.lt.s32.totalorder %s55_s22, %s55_s22 }
   0xb   :  { %p10281_p3 = scmp.ne.s32.totalorder %s55_s22, %s10280_s30  ;;  %p10286_p5 = scmp.lt.s32.totalorder %s10280_s30, %s10280_s30 }
   0xd   :  { %p10287_p6 = por %p10286_p5, %p10285_p4 }
   0xf   :  { %p10288_p7 = pnand %p10287_p6, %p10281_p3 }
  0x11   :  { %10291 = shalt.err (!%p10288_p7)
}
  0x12   :  { %s10369_s7 = smov 2048   ;;  %s10370_s8 = smov 128  }
  0x13   :  { %60 = dma.hbm_to_vmem [thread:$0]  %s11536_s4, 8192, %s55_s22, [#allocation9], %s10369_s7, %s10369_s7, %s10370_s8  }
  0x14   :  { %s10371_s11 = smov [#allocation2]   ;;  %s35_s15 = sshll.u32 %s11534_s2, 4  ;;  %s36_s15 = int_to_ptr.vmem [resolvable:$true] %s35_s15 }
  0x15   :  { %s22_s12 = sshll.u32 %s10371_s11, 4  ;;  %s10292_s18 = scalar_lea.hbm %s11533_s1, 256  ;;  %s23_s12 = int_to_ptr.vmem [resolvable:$true] %s22_s12 }
  0x16   :  { %p10293_p8 = scmp.ne.s32.totalorder %s11533_s1, %s10292_s18  ;;  %p10296_p9 = scmp.lt.u32.totalorder %s10292_s18, %s11533_s1 }
  0x18   :  { %p10298_p10 = pnand %p10296_p9, %p10293_p8 }
  0x1a   :  { %10301 = shalt.err (!%p10298_p10)
}
  0x1b   :  { %s10302_s4 = scalar_lea.vmem %s23_s12, 256  ;;  %p10307_p12 = scmp.lt.s32.totalorder %s23_s12, %s23_s12 }
  0x1c   :  { %p10303_p11 = scmp.ne.s32.totalorder %s23_s12, %s10302_s4  ;;  %p10308_p13 = scmp.lt.s32.totalorder %s10302_s4, %s10302_s4 }
  0x1e   :  { %p10309_p0 = por %p10308_p13, %p10307_p12 }
  0x20   :  { %p10310_p1 = pnand %p10309_p0, %p10303_p11 }
  0x22   :  { %10313 = shalt.err (!%p10310_p1)
}
  0x23   :  { %s10372_s2 = smov 8   ;;  %s10314_s25 = scalar_lea.vmem %s36_s15, 16 }
  0x24   :  { %28 = dma.hbm_to_vmem [thread:$0]  %s11533_s1, 256, %s23_s12, [#allocation3], %s10370_s8, %s10370_s8, %s10372_s2  }
  0x25   :  { %p10315_p2 = scmp.ne.s32.totalorder %s36_s15, %s10314_s25  ;;  %p10319_p3 = scmp.lt.s32.totalorder %s36_s15, %s36_s15 }
  0x26   :  { %p10320_p4 = scmp.lt.s32.totalorder %s10314_s25, %s10314_s25 }
  0x28   :  { %p10321_p5 = por %p10320_p4, %p10319_p3 }
  0x2a   :  { %p10322_p6 = pnand %p10321_p5, %p10315_p2 }
  0x2c   :  { %10325 = shalt.err (!%p10322_p6)
}
  0x2d   :  { %s10373_s26 = smov [#allocation5]   ;;  %s45_s29 = sshll.u32 %s11535_s3, 4  ;;  %s46_s29 = int_to_ptr.vmem [resolvable:$true] %s45_s29 }
  0x2e   :  { %38 = dma.vmem_to_smem %s36_s15, 16, %s10373_s26, [#allocation4]  }
  0x2f   :  { %s10326_s30 = scalar_lea.vmem %s46_s29, 16  ;;  %p10331_p8 = scmp.lt.s32.totalorder %s46_s29, %s46_s29 }
  0x30   :  { %p10327_p7 = scmp.ne.s32.totalorder %s46_s29, %s10326_s30  ;;  %p10332_p9 = scmp.lt.s32.totalorder %s10326_s30, %s10326_s30 }
  0x32   :  { %p10333_p10 = por %p10332_p9, %p10331_p8 }
  0x34   :  { %p10334_p11 = pnand %p10333_p10, %p10327_p7 }
  0x36   :  { %10337 = shalt.err (!%p10334_p11)
}
  0x37   :  { %s10374_s1 = smov [#allocation6]   ;;  %s10375_s7 = smov [#allocation10]  }
  0x38   :  { %48 = dma.vmem_to_smem %s46_s29, 16, %s10374_s1, [#allocation7]  }
  0x39   :  { %s66_s9 = sshll.u32 %s10375_s7, 4  ;;  %s10338_s12 = scalar_lea.hbm %s11537_s5, 512  ;;  %s67_s9 = int_to_ptr.vmem [resolvable:$true] %s66_s9 }
  0x3a   :  { %p10339_p12 = scmp.ne.s32.totalorder %s11537_s5, %s10338_s12  ;;  %p10342_p13 = scmp.lt.u32.totalorder %s10338_s12, %s11537_s5 }
  0x3c   :  { %p10344_p0 = pnand %p10342_p13, %p10339_p12 }
  0x3e   :  { %10347 = shalt.err (!%p10344_p0)
}
  0x3f   :  { %s10348_s16 = scalar_lea.vmem %s67_s9, 512  ;;  %p10353_p2 = scmp.lt.s32.totalorder %s67_s9, %s67_s9 }
  0x40   :  { %p10349_p1 = scmp.ne.s32.totalorder %s67_s9, %s10348_s16  ;;  %p10354_p3 = scmp.lt.s32.totalorder %s10348_s16, %s10348_s16 }
  0x42   :  { %p10355_p4 = por %p10354_p3, %p10353_p2 }
  0x44   :  { %p10356_p5 = pnand %p10355_p4, %p10349_p1 }
  0x46   :  { %10359 = shalt.err (!%p10356_p5)
}
  0x47   :  { %72 = dma.hbm_to_vmem [thread:$0]  %s11537_s5, 512, %s67_s9, [#allocation9], %s10370_s8, %s10370_s8, %s10372_s2  }
  0x48   :  { %10360 = dma.done.wait [#allocation3], 256  }
  0x49   :  { %10361 = vsyncadd [#allocation3], 4294967040 }
  0x4a   :  { %10362 = dma.done.wait [#allocation4], 16  }
  0x4b   :  { %10363 = vsyncadd [#allocation4], 4294967280 }
  0x4c   :  { %10364 = dma.done.wait [#allocation7], 16  }
  0x4d   :  { %10365 = vsyncadd [#allocation7], 4294967280 }
  0x4e   :  { %10366 = dma.done.wait [#allocation9], 8704  }
  0x4f   :  { %10367 = vsyncadd [#allocation9], 4294958592 }
  0x50   :  { %88 = sfence }
  0x51   :  { %v180_v0 = vld [vmem:[#allocation8] sm:$0xff]  ;;  %vm189_vm0 = vcmask 261120   ;;  %v10483_v5 = vld [vmem:[%s11532_s0] sm:$0xff]  ;;  %v10490_v7 = vld [vmem:[%s11532_s0 + $0x8] sm:$0xff]  ;;  %v10376_v8 = vmov 0.0   ;;  %vm10377_vm1 = vmmov 0   ;;  %v93_v16 = vlaneseq }
  0x52   :  { %v181_v1 = vld [vmem:[#allocation8 + $0x80] sm:$0xff]  ;;  %9220 = vmatprep.mubr.msk.f32.mxu0 %vm189_vm0, %v10483_v5  ;;  %9223 = vmatprep.subr.mxu1 %v10376_v8  ;;  %s10378_s21 = smov 96   ;;  %vm284_vm2 = vcmask 64512   ;;  %s96_s0 = sld [smem:[#allocation5]]  ;;  %v10379_v21 = vmov 1966171168  }
  0x53   :  { %v182_v2 = vld [vmem:[#allocation8 + $0x100] sm:$0xff]  ;;  %v9798_v3 = vpack.c.bf16 %v181_v1, %v180_v0  ;;  %9225 = vmatprep.mubr.msk.f32.mxu1 %vm10377_vm1, %v10376_v8  ;;  %s8764_s23 = sld [smem:[#allocation5 + $0x1]]  ;;  %v10517_v17 = vshrl.u32 %v93_v16, 7  ;;  %v116_v22 = vunpack.c.l.s4 %v10379_v21  ;;  %v10523_v23 = vand.u32 127, %v93_v16  ;;  %s10381_s4 = smov 64   ;;  %v271_v61 = vld [vmem:[#allocation8 + $0x8] sm:$0xff] }
  0x54   :  { %v183_v4 = vld [vmem:[#allocation8 + $0x180] sm:$0xff]  ;;  %v10380_v27 = vmov 0   ;;  %s10382_s2 = smov 88   ;;  %s10383_s22 = smov 120  }
  0x55   :  { %v9802_v6 = vpack.c.bf16 %v183_v4, %v182_v2  ;;  %9799 = vmatprep.subr.bf16.mxu0 %v9798_v3  ;;  %v8766_v9 = vld [vmem:[#allocation10] ss:$0 sm:$0xff]  ;;  %vm95_vm3 = vcmp.eq.s32.totalorder %v10517_v17, 0  ;;  %vm99_vm4 = vcmp.eq.s32.totalorder %v10517_v17, 1  ;;  %v117_v25 = vunpack.c.0.s8 %v116_v22  ;;  %s10384_s24 = smov 56   ;;  %s10385_s25 = smov 112  }
  0x56   :  { %9801 = vmatpush3.bf16.msra.mxu0 %v9798_v3  ;;  %v10539_v33 = vsub.s32 0, %v10517_v17  ;;  %s10386_s26 = smov 80   ;;  %s10387_s27 = smov 48   ;;  %vm113_vm13 = vcmp.le.s32.totalorder %v10523_v23, %v10517_v17 }
  0x57   :  { %9803 = vmatprep.subr.bf16.mxu0 %v9802_v6  ;;  %v10532_v26 = vsub.s32 %v117_v25, %v10517_v17  ;;  %s10388_s28 = smov 72   ;;  %s10389_s29 = smov 104  }
  0x58   :  { %v97_v18 = vstv %s96_s0  ;;  %s10390_s30 = smov 40   ;;  %s103_s1 = sld [smem:[#allocation6]] }
  0x59   :  { %v98_v19 = vsel %vm95_vm3, %v97_v18, 0  ;;  %v101_v20 = vstv %s8764_s23  ;;  %s8765_s7 = sld [smem:[#allocation6 + $0x1]]  ;;  %s10394_s9 = smov 32  }
  0x5a   :  { %9805 = vmatpush3.bf16.msra.mxu0 %v9802_v6  ;;  %v10527_v24 = vsel %vm99_vm4, %v101_v20, %v98_v19  ;;  %s10395_s10 = smov 16  }
  0x5b   :  { %vm111_vm5 = vcmp.lt.s32.totalorder %v10523_v23, %v10527_v24  ;;  %9243 = vmatprep.subr.mxu0 %v271_v61 }
  0x5c   :  { %v114_v28 = vsel %vm111_vm5, 1, %v10380_v27  ;;  %vm6675_vm5 = vcmp.gt.s32.totalorder %v10527_v24, 1 }
  0x5d   :  { %9221 = vmatmul.mubr.msk.f32.vlgmr.msra.gmra.mrb[0].mxu0 %vm189_vm0, %v10490_v7  ;;  %v121_v29 = vrot.slane %v114_v28, %v10532_v26 }
  0x5e   :  { %9244 = vmatpush3.msra.mxu0 %v271_v61 }
  0x5f   :  { %v129_v30 = vrot.slane %v121_v29, %v10532_v26  ;;  %v122_v31 = vcombine.high %v121_v29, %v121_v29  ;;  %9253 = vmatprep.subr.mxu0 %v10376_v8 }
  0x61   :  { %vm137_vm6 = vcmp.ne.s32.totalorder %v129_v30, 0  ;;  %v136_v32 = vrot.slane %v122_v31, %v10532_v26 }
  0x62   :  { %v438_v34 = vsel %vm137_vm6, 1, %v10380_v27  ;;  %vm6811_vm6 = vcmp.gt.s32.totalorder %v10527_v24, 2 }
  0x63   :  { %vm138_vm7 = vcmp.ne.s32.totalorder %v136_v32, 0  ;;  %v443_v35 = vrot.slane %v438_v34, %v10539_v33 }
  0x64   :  { %v439_v36 = vsel %vm138_vm7, 1, %v10380_v27  ;;  %vm6947_vm7 = vcmp.gt.s32.totalorder %v10527_v24, 3 }
  0x65   :  { %vm10544_vm8 = vcmp.eq.s32.totalorder %v443_v35, 1  ;;  %v447_v39 = vrot.slane %v439_v36, %v10539_v33 }
  0x67   :  { %vm10552_vm9 = vcmp.eq.s32.totalorder %v447_v39, 1 }
 0x130   :  { %v9222_v10 = vpop.f32.mrb[0].mxu0 }
 0x131   :  { %v262_v11 = vpop.f32.mrb[1].mxu0  ;;  %v10501_v13 = vadd.f32 %v9222_v10, %v8766_v9 }
 0x132   :  { %v10497_v12 = vadd.f32 %v8766_v9, %v262_v11 }
 0x134   :  { %282 = vrot.lane.b32.xlu0 %v10497_v12, %s10378_s21 }
 0x138   :  { %360 = vrot.lane.b32.xlu0 %v10501_v13, %s10378_s21 }
 0x1a6   :  { %v283_v14 = vpop.permute.xlu0 %282 }
 0x1a7   :  { %9224 = vmatpush3.xpose.msk.msra.mxu1 %vm284_vm2, %v283_v14 }
 0x1a8   :  { %9228 = vmatprep.subr.mxu1 %v10376_v8 }
 0x1aa   :  { %9226 = vmatmul.mubr.msk.f32.vlgmr.msra.gmra.mrb[0].mxu1 %vm284_vm2, %v10497_v12  ;;  %v361_v15 = vpop.permute.xlu0 %360 }
 0x1ab   :  { %9229 = vmatpush3.xpose.msk.msra.mxu1 %vm284_vm2, %v361_v15  ;;  %9230 = vmatprep.mubr.msk.f32.mxu1 %vm10377_vm1, %v10376_v8 }
 0x1ac   :  { %9233 = vmatprep.subr.mxu1 %v10376_v8 }
 0x1ae   :  { %9231 = vmatmul.mubr.msk.f32.vlgmr.msra.gmra.mrb[2].mxu1 %vm284_vm2, %v10501_v13 }
 0x1af   :  { %9235 = vmatprep.mubr.msk.f32.mxu1 %vm10377_vm1, %v10376_v8 }
 0x27d   :  { %v355_v37 = vpop.f32.mrb[0].mxu1 }
 0x27e   :  { %v436_v40 = vmul.f32 0.35355338, %v355_v37  ;;  %v9227_v41 = vpop.f32.mrb[1].mxu1 }
 0x280   :  { %v450_v42 = vsel %vm10544_vm8, %v436_v40, -1e+30 }
 0x281   :  { %v432_v43 = vpop.f32.mrb[2].mxu1  ;;  %v452_v44 = vsel %vm284_vm2, %v450_v42, -inf }
 0x282   :  { %v437_v46 = vmul.f32 0.35355338, %v432_v43  ;;  %453 = vmax.xlane.f32.xlu1 %v452_v44  ;;  %v9232_v47 = vpop.f32.mrb[3].mxu1 }
 0x284   :  { %v451_v48 = vsel %vm10552_vm9, %v437_v46, -1e+30 }
 0x285   :  { %v455_v49 = vsel %vm284_vm2, %v451_v48, -inf }
 0x286   :  { %456 = vmax.xlane.f32.xlu1 %v455_v49 }
 0x297   :  { %474 = vrot.lane.b32.xlu1 %v10497_v12, %s10381_s4 }
 0x30f   :  { %v454_v50 = vpop.xlane.xlu1 %453 }
 0x310   :  { %v458_v51 = vsub.f32 %v450_v42, %v454_v50 }
 0x312   :  { %v460_v52 = vmul.f32 1.442695, %v458_v51 }
 0x313   :  { %v457_v53 = vpop.xlane.xlu1 %456 }
 0x314   :  { %10028 = vpow2.f32 %v460_v52  ;;  %v459_v54 = vsub.f32 %v451_v48, %v457_v53 }
 0x316   :  { %v462_v55 = vmul.f32 1.442695, %v459_v54 }
 0x317   :  { %v475_v56 = vpop.permute.xlu1 %474 }
 0x318   :  { %10030 = vpow2.f32 %v462_v55  ;;  %9234 = vmatpush3.msra.mxu1 %v475_v56 }
 0x319   :  { %9238 = vmatprep.subr.mxu1 %v10376_v8 }
 0x31e   :  { %v10029_v57 = vpop.eup %10028 }
 0x31f   :  { %v464_v58 = vsel %vm284_vm2, %v10029_v57, 0.0 }
 0x320   :  { %465 = vadd.xlane.f32.xlu0 %v464_v58 }
 0x322   :  { %v10031_v59 = vpop.eup %10030 }
 0x323   :  { %v467_v60 = vsel %vm284_vm2, %v10031_v59, 0.0 }
 0x324   :  { %468 = vadd.xlane.f32.xlu1 %v467_v60 }
 0x335   :  { %550 = vrot.lane.b32.xlu1 %v10501_v13, %s10381_s4 }
 0x336   :  { %789 = vrot.lane.b32.xlu0 %v10501_v13, %s10382_s2 }
 0x339   :  { %711 = vrot.lane.b32.xlu1 %v10497_v12, %s10382_s2 }
 0x33d   :  { %709 = vrot.lane.b32.xlu1 %v10497_v12, %s10383_s22 }
 0x341   :  { %787 = vrot.lane.b32.xlu1 %v10501_v13, %s10383_s22 }
 0x3ad   :  { %v466_v62 = vpop.xlane.xlu0 %465 }
 0x3ae   :  { %10032 = vrcp.f32 %v466_v62 }
 0x3b1   :  { %v469_v63 = vpop.xlane.xlu1 %468  ;;  %v790_v15 = vpop.permute.xlu0 %789 }
 0x3b2   :  { %10034 = vrcp.f32 %v469_v63 }
 0x3b5   :  { %v551_v1 = vpop.permute.xlu1 %550 }
 0x3b8   :  { %v10033_v0 = vpop.eup %10032 }
 0x3b9   :  { %v471_v2 = vmul.f32 %v10033_v0, %v10029_v57  ;;  %v712_v6 = vpop.permute.xlu1 %711 }
 0x3bb   :  { %9236 = vmatmul.mubr.msk.f32.vlgmr.msra.gmra.mrb[4].mxu1 %vm284_vm2, %v471_v2 }
 0x3bc   :  { %v10035_v3 = vpop.eup %10034  ;;  %9239 = vmatpush3.msra.mxu1 %v551_v1  ;;  %9240 = vmatprep.mubr.msk.f32.mxu1 %vm10377_vm1, %v10376_v8 }
 0x3bd   :  { %v473_v4 = vmul.f32 %v10035_v3, %v10031_v59  ;;  %9248 = vmatprep.subr.mxu1 %v10376_v8  ;;  %v710_v9 = vpop.permute.xlu1 %709 }
 0x3bf   :  { %9241 = vmatmul.mubr.msk.f32.vlgmr.msra.gmra.mrb[6].mxu1 %vm284_vm2, %v473_v4 }
 0x3c0   :  { %9250 = vmatprep.mubr.msk.f32.mxu1 %vm10377_vm1, %v10376_v8 }
 0x3c1   :  { %v788_v18 = vpop.permute.xlu1 %787 }
 0x3c3   :  { %9249 = vmatpush3.xpose.msk.msra.mxu1 %vm284_vm2, %v712_v6 }
 0x3c4   :  { %9258 = vmatprep.subr.mxu1 %v10376_v8 }
 0x3c6   :  { %9251 = vmatmul.mubr.msk.f32.vlgmr.msra.gmra.mrb[8].mxu1 %vm284_vm2, %v710_v9 }
 0x3c7   :  { %9260 = vmatprep.mubr.msk.f32.mxu1 %vm10377_vm1, %v10376_v8 }
 0x48e   :  { %v546_v10 = vpop.f32.mrb[4].mxu1 }
 0x48f   :  { %v9237_v11 = vpop.f32.mrb[5].mxu1  ;;  %9245 = vmatprep.mubr.msk.f32.mxu0 %vm284_vm2, %v546_v10  ;;  %v272_v10 = vld [vmem:[#allocation8 + $0x88] sm:$0xff] }
 0x492   :  { %v622_v14 = vpop.f32.mrb[6].mxu1 }
 0x493   :  { %v9242_v16 = vpop.f32.mrb[7].mxu1  ;;  %9246 = vmatmul.mubr.msk.f32.vlgmr.msra.gmra.mrb[2].mxu0 %vm284_vm2, %v622_v14 }
 0x494   :  { %9254 = vmatpush3.xpose.msk.msra.mxu0 %vm284_vm2, %v790_v15  ;;  %9255 = vmatprep.mubr.msk.f32.mxu0 %vm10377_vm1, %v10376_v8 }
 0x495   :  { %9263 = vmatprep.subr.mxu0 %v10376_v8 }
 0x497   :  { %9256 = vmatmul.mubr.msk.f32.vlgmr.msra.gmra.mrb[4].mxu0 %vm284_vm2, %v788_v18 }
 0x498   :  { %9265 = vmatprep.mubr.msk.f32.mxu0 %vm10377_vm1, %v10376_v8 }
 0x499   :  { %v783_v19 = vpop.f32.mrb[8].mxu1 }
 0x49a   :  { %v865_v20 = vmul.f32 0.35355338, %v783_v19  ;;  %v9252_v21 = vpop.f32.mrb[9].mxu1 }
 0x49c   :  { %v867_v22 = vsel %vm10544_vm8, %v865_v20, -1e+30 }
 0x49d   :  { %v869_v25 = vsel %vm284_vm2, %v867_v22, -inf }
 0x49e   :  { %870 = vmax.xlane.f32.xlu1 %v869_v25 }
 0x4af   :  { %891 = vrot.lane.b32.xlu1 %v10497_v12, %s10384_s24 }
 0x4b3   :  { %1126 = vrot.lane.b32.xlu1 %v10497_v12, %s10385_s25 }
 0x4b7   :  { %1206 = vrot.lane.b32.xlu1 %v10501_v13, %s10386_s26 }
 0x4bb   :  { %1204 = vrot.lane.b32.xlu1 %v10501_v13, %s10385_s25 }
 0x52b   :  { %v871_v28 = vpop.xlane.xlu1 %870 }
 0x52c   :  { %v875_v29 = vsub.f32 %v867_v22, %v871_v28 }
 0x52e   :  { %v877_v30 = vmul.f32 1.442695, %v875_v29 }
 0x52f   :  { %v892_v31 = vpop.permute.xlu1 %891 }
 0x530   :  { %10036 = vpow2.f32 %v877_v30  ;;  %9259 = vmatpush3.msra.mxu1 %v892_v31 }
 0x531   :  { %9273 = vmatprep.subr.mxu1 %v10376_v8 }
 0x533   :  { %v1127_v42 = vpop.permute.xlu1 %1126 }
 0x537   :  { %v1207_v47 = vpop.permute.xlu1 %1206 }
 0x53a   :  { %v10037_v32 = vpop.eup %10036 }
 0x53b   :  { %v881_v34 = vsel %vm284_vm2, %v10037_v32, 0.0  ;;  %v1205_v48 = vpop.permute.xlu1 %1204 }
 0x53c   :  { %882 = vadd.xlane.f32.xlu0 %v881_v34 }
 0x552   :  { %1128 = vrot.lane.b32.xlu0 %v10497_v12, %s10386_s26 }
 0x56a   :  { %v861_v35 = vpop.f32.mrb[4].mxu0 }
 0x56b   :  { %v866_v36 = vmul.f32 0.35355338, %v861_v35  ;;  %v9257_v37 = vpop.f32.mrb[5].mxu0 }
 0x56d   :  { %v868_v39 = vsel %vm10552_vm9, %v866_v36, -1e+30 }
 0x56e   :  { %v872_v40 = vsel %vm284_vm2, %v868_v39, -inf }
 0x56f   :  { %873 = vmax.xlane.f32.xlu1 %v872_v40 }
 0x5c9   :  { %v883_v41 = vpop.xlane.xlu0 %882 }
 0x5ca   :  { %10038 = vrcp.f32 %v883_v41 }
 0x5cd   :  { %v1129_v46 = vpop.permute.xlu0 %1128 }
 0x5d4   :  { %v10039_v43 = vpop.eup %10038 }
 0x5d5   :  { %v888_v44 = vmul.f32 %v10039_v43, %v10037_v32  ;;  %v273_v32 = vld [vmem:[#allocation8 + $0x108] sm:$0xff] }
 0x5d7   :  { %9261 = vmatmul.mubr.msk.f32.vlgmr.msra.gmra.mrb[10].mxu1 %vm284_vm2, %v888_v44 }
 0x5d8   :  { %9274 = vmatpush3.xpose.msk.msra.mxu1 %vm284_vm2, %v1129_v46  ;;  %9275 = vmatprep.mubr.msk.f32.mxu1 %vm10377_vm1, %v10376_v8 }
 0x5d9   :  { %9278 = vmatprep.subr.mxu1 %v10376_v8 }
 0x5db   :  { %9276 = vmatmul.mubr.msk.f32.vlgmr.msra.gmra.mrb[12].mxu1 %vm284_vm2, %v1127_v42 }
 0x5dc   :  { %9279 = vmatpush3.xpose.msk.msra.mxu1 %vm284_vm2, %v1207_v47  ;;  %9280 = vmatprep.mubr.msk.f32.mxu1 %vm10377_vm1, %v10376_v8 }
 0x5dd   :  { %9288 = vmatprep.subr.mxu1 %v10376_v8 }
 0x5df   :  { %9281 = vmatmul.mubr.msk.f32.vlgmr.msra.gmra.mrb[14].mxu1 %vm284_vm2, %v1205_v48 }
 0x5e0   :  { %9290 = vmatprep.mubr.msk.f32.mxu1 %vm10377_vm1, %v10376_v8 }
 0x5fc   :  { %v874_v49 = vpop.xlane.xlu1 %873 }
 0x5fd   :  { %v876_v50 = vsub.f32 %v868_v39, %v874_v49 }
 0x5ff   :  { %v879_v51 = vmul.f32 1.442695, %v876_v50 }
 0x601   :  { %10040 = vpow2.f32 %v879_v51 }
 0x60b   :  { %v10041_v52 = vpop.eup %10040 }
 0x60c   :  { %v884_v53 = vsel %vm284_vm2, %v10041_v52, 0.0 }
 0x60d   :  { %885 = vadd.xlane.f32.xlu0 %v884_v53 }
 0x623   :  { %967 = vrot.lane.b32.xlu0 %v10501_v13, %s10384_s24 }
 0x627   :  { %1384 = vrot.lane.b32.xlu0 %v10501_v13, %s10387_s27 }
 0x62b   :  { %1545 = vrot.lane.b32.xlu0 %v10497_v12, %s10388_s28 }
 0x62f   :  { %1623 = vrot.lane.b32.xlu0 %v10501_v13, %s10388_s28 }
 0x633   :  { %1543 = vrot.lane.b32.xlu0 %v10497_v12, %s10389_s29 }
 0x69a   :  { %v886_v54 = vpop.xlane.xlu0 %885 }
 0x69b   :  { %10042 = vrcp.f32 %v886_v54 }
 0x69e   :  { %v968_v55 = vpop.permute.xlu0 %967 }
 0x69f   :  { %9264 = vmatpush3.msra.mxu0 %v968_v55 }
 0x6a0   :  { %9268 = vmatprep.subr.mxu0 %v272_v10 }
 0x6a2   :  { %v1385_v56 = vpop.permute.xlu0 %1384 }
 0x6a3   :  { %9289 = vmatpush3.msra.mxu1 %v1385_v56 }
 0x6a4   :  { %9298 = vmatprep.subr.mxu1 %v10376_v8 }
 0x6a5   :  { %v10043_v57 = vpop.eup %10042 }
 0x6a6   :  { %v890_v58 = vmul.f32 %v10043_v57, %v10041_v52  ;;  %v1546_v35 = vpop.permute.xlu0 %1545 }
 0x6a8   :  { %9266 = vmatmul.mubr.msk.f32.vlgmr.msra.gmra.mrb[6].mxu0 %vm284_vm2, %v890_v58 }
 0x6a9   :  { %9269 = vmatpush3.msra.mxu0 %v272_v10 }
 0x6aa   :  { %v963_v59 = vpop.f32.mrb[10].mxu1  ;;  %9283 = vmatprep.subr.mxu0 %v10376_v8  ;;  %v1624_v40 = vpop.permute.xlu0 %1623 }
 0x6ab   :  { %v9262_v60 = vpop.f32.mrb[11].mxu1  ;;  %9270 = vmatprep.mubr.msk.f32.mxu0 %vm284_vm2, %v963_v59 }
 0x6ae   :  { %v1200_v61 = vpop.f32.mrb[12].mxu1  ;;  %v1544_v42 = vpop.permute.xlu0 %1543 }
 0x6af   :  { %v1282_v62 = vmul.f32 0.35355338, %v1200_v61  ;;  %v9277_v63 = vpop.f32.mrb[13].mxu1 }
 0x6b1   :  { %v1284_v0 = vsel %vm10544_vm8, %v1282_v62, -1e+30 }
 0x6b2   :  { %v1278_v1 = vpop.f32.mrb[14].mxu1  ;;  %v1286_v2 = vsel %vm284_vm2, %v1284_v0, -inf }
 0x6b3   :  { %v1283_v3 = vmul.f32 0.35355338, %v1278_v1  ;;  %1287 = vmax.xlane.f32.xlu1 %v1286_v2  ;;  %v9282_v4 = vpop.f32.mrb[15].mxu1 }
 0x6b5   :  { %v1285_v6 = vsel %vm10552_vm9, %v1283_v3, -1e+30 }
 0x6b6   :  { %v1289_v9 = vsel %vm284_vm2, %v1285_v6, -inf }
 0x6b7   :  { %1290 = vmax.xlane.f32.xlu1 %v1289_v9 }
 0x740   :  { %v1288_v11 = vpop.xlane.xlu1 %1287 }
 0x741   :  { %v1292_v14 = vsub.f32 %v1284_v0, %v1288_v11 }
 0x743   :  { %v1294_v15 = vmul.f32 1.442695, %v1292_v14  ;;  %v274_v14 = vld [vmem:[#allocation8 + $0x188] sm:$0xff] }
 0x744   :  { %v1291_v16 = vpop.xlane.xlu1 %1290 }
 0x745   :  { %10044 = vpow2.f32 %v1294_v15  ;;  %v1293_v18 = vsub.f32 %v1285_v6, %v1291_v16 }
 0x747   :  { %v1296_v19 = vmul.f32 1.442695, %v1293_v18 }
 0x749   :  { %10046 = vpow2.f32 %v1296_v19 }
 0x74f   :  { %v10045_v20 = vpop.eup %10044 }
 0x750   :  { %v1298_v21 = vsel %vm284_vm2, %v10045_v20, 0.0 }
 0x751   :  { %1299 = vadd.xlane.f32.xlu1 %v1298_v21 }
 0x753   :  { %v10047_v22 = vpop.eup %10046 }
 0x754   :  { %v1301_v25 = vsel %vm284_vm2, %v10047_v22, 0.0 }
 0x755   :  { %1302 = vadd.xlane.f32.xlu1 %v1301_v25 }
 0x766   :  { %1308 = vrot.lane.b32.xlu1 %v10497_v12, %s10387_s27 }
 0x76a   :  { %1621 = vrot.lane.b32.xlu1 %v10501_v13, %s10389_s29 }
 0x77b   :  { %v1039_v28 = vpop.f32.mrb[6].mxu0 }
 0x77c   :  { %v9267_v29 = vpop.f32.mrb[7].mxu0  ;;  %9271 = vmatmul.mubr.msk.f32.vlgmr.msra.gmra.mrb[2].mxu0 %vm284_vm2, %v1039_v28 }
 0x77d   :  { %9285 = vmatprep.mubr.msk.f32.mxu0 %vm10377_vm1, %v10376_v8 }
 0x7de   :  { %v1300_v30 = vpop.xlane.xlu1 %1299 }
 0x7df   :  { %10048 = vrcp.f32 %v1300_v30 }
 0x7e2   :  { %v1303_v31 = vpop.xlane.xlu1 %1302 }
 0x7e3   :  { %10050 = vrcp.f32 %v1303_v31 }
 0x7e6   :  { %v1309_v34 = vpop.permute.xlu1 %1308 }
 0x7e7   :  { %9284 = vmatpush3.msra.mxu0 %v1309_v34  ;;  %v10694_v34 = vld [vmem:[#allocation2 + $0x8] sm:$0xff] }
 0x7e8   :  { %9293 = vmatprep.subr.mxu0 %v273_v32 }
 0x7e9   :  { %v10049_v36 = vpop.eup %10048 }
 0x7ea   :  { %v1305_v37 = vmul.f32 %v10049_v36, %v10045_v20  ;;  %v1622_v48 = vpop.permute.xlu1 %1621  ;;  %v10697_v36 = vld [vmem:[#allocation2] sm:$0xff] }
 0x7ec   :  { %9286 = vmatmul.mubr.msk.f32.vlgmr.msra.gmra.mrb[8].mxu0 %vm284_vm2, %v1305_v37 }
 0x7ed   :  { %v10051_v39 = vpop.eup %10050  ;;  %9294 = vmatpush3.msra.mxu0 %v273_v32 }
 0x7ee   :  { %v1307_v41 = vmul.f32 %v10051_v39, %v10047_v22  ;;  %9303 = vmatprep.subr.mxu0 %v10376_v8  ;;  %v2232_v39 = vsel %vm189_vm0, %v10694_v34, 0.0 }
 0x7f0   :  { %9291 = vmatmul.mubr.msk.f32.vlgmr.msra.gmra.mrb[16].mxu1 %vm284_vm2, %v1307_v41 }
 0x7f1   :  { %9299 = vmatpush3.xpose.msk.msra.mxu1 %vm284_vm2, %v1546_v35  ;;  %9300 = vmatprep.mubr.msk.f32.mxu1 %vm10377_vm1, %v10376_v8 }
 0x7f2   :  { %9308 = vmatprep.subr.mxu1 %v10376_v8 }
 0x7f4   :  { %9301 = vmatmul.mubr.msk.f32.vlgmr.msra.gmra.mrb[18].mxu1 %vm284_vm2, %v1544_v42 }
 0x7f5   :  { %9310 = vmatprep.mubr.msk.f32.mxu1 %vm10377_vm1, %v10376_v8 }
 0x8bf   :  { %v1380_v43 = vpop.f32.mrb[8].mxu0 }
 0x8c0   :  { %v9287_v44 = vpop.f32.mrb[9].mxu0  ;;  %9295 = vmatprep.mubr.msk.f32.mxu0 %vm284_vm2, %v1380_v43 }
 0x8c3   :  { %v1456_v46 = vpop.f32.mrb[16].mxu1 }
 0x8c4   :  { %v9292_v47 = vpop.f32.mrb[17].mxu1  ;;  %9296 = vmatmul.mubr.msk.f32.vlgmr.msra.gmra.mrb[2].mxu0 %vm284_vm2, %v1456_v46 }
 0x8c5   :  { %9304 = vmatpush3.xpose.msk.msra.mxu0 %vm284_vm2, %v1624_v40  ;;  %9305 = vmatprep.mubr.msk.f32.mxu0 %vm10377_vm1, %v10376_v8  ;;  %v2229_v40 = vsel %vm189_vm0, %v10697_v36, 0.0 }
 0x8c6   :  { %9313 = vmatprep.subr.mxu0 %v10376_v8 }
 0x8c7   :  { %v1617_v49 = vpop.f32.mrb[18].mxu1 }
 0x8c8   :  { %v1699_v50 = vmul.f32 0.35355338, %v1617_v49  ;;  %v9302_v51 = vpop.f32.mrb[19].mxu1  ;;  %9306 = vmatmul.mubr.msk.f32.vlgmr.msra.gmra.mrb[10].mxu0 %vm284_vm2, %v1622_v48 }
 0x8c9   :  { %9315 = vmatprep.mubr.msk.f32.mxu0 %vm10377_vm1, %v10376_v8 }
 0x8ca   :  { %v1701_v52 = vsel %vm10544_vm8, %v1699_v50, -1e+30 }
 0x8cb   :  { %v1703_v53 = vsel %vm284_vm2, %v1701_v52, -inf }
 0x8cc   :  { %1704 = vmax.xlane.f32.xlu0 %v1703_v53 }
 0x959   :  { %v1705_v54 = vpop.xlane.xlu0 %1704 }
 0x95a   :  { %v1709_v55 = vsub.f32 %v1701_v52, %v1705_v54 }
 0x95c   :  { %v1711_v56 = vmul.f32 1.442695, %v1709_v55 }
 0x95e   :  { %10052 = vpow2.f32 %v1711_v56 }
 0x968   :  { %v10053_v57 = vpop.eup %10052 }
 0x969   :  { %v1715_v58 = vsel %vm284_vm2, %v10053_v57, 0.0 }
 0x96a   :  { %1716 = vadd.xlane.f32.xlu0 %v1715_v58 }
 0x99b   :  { %v1695_v59 = vpop.f32.mrb[10].mxu0 }
 0x99c   :  { %v1700_v60 = vmul.f32 0.35355338, %v1695_v59  ;;  %v9307_v61 = vpop.f32.mrb[11].mxu0 }
 0x99d   :  { %v2004_v61 = vld [vmem:[#allocation8 + $0x90] sm:$0xff] }
 0x99e   :  { %v1702_v62 = vsel %vm10552_vm9, %v1700_v60, -1e+30  ;;  %v2003_v60 = vld [vmem:[#allocation8 + $0x10] sm:$0xff] }
 0x99f   :  { %v1706_v63 = vsel %vm284_vm2, %v1702_v62, -inf }
 0x9a0   :  { %1707 = vmax.xlane.f32.xlu1 %v1706_v63  ;;  %v9806_v63 = vpack.c.bf16 %v2004_v61, %v2003_v60 }
 0x9b1   :  { %1725 = vrot.lane.b32.xlu1 %v10497_v12, %s10390_s30 }
 0x9f7   :  { %v1717_v0 = vpop.xlane.xlu0 %1716 }
 0x9f8   :  { %10054 = vrcp.f32 %v1717_v0  ;;  %v2006_v0 = vld [vmem:[#allocation8 + $0x190] sm:$0xff] }
 0xa02   :  { %v10055_v2 = vpop.eup %10054 }
 0xa03   :  { %v1722_v9 = vmul.f32 %v10055_v2, %v10053_v57  ;;  %v2267_v2 = vld [vmem:[#allocation8 + $0x20] sm:$0xff] }
 0xa2d   :  { %v1708_v1 = vpop.xlane.xlu1 %1707 }
 0xa2e   :  { %v1710_v3 = vsub.f32 %v1702_v62, %v1708_v1  ;;  %v2005_v62 = vld [vmem:[#allocation8 + $0x110] sm:$0xff] }
 0xa2f   :  { %v9810_v1 = vpack.c.bf16 %v2006_v0, %v2005_v62  ;;  %v8814_v0 = vld [vmem:[#allocation10 + $0xc] ss:$0 sm:$0xff] }
 0xa30   :  { %v1713_v4 = vmul.f32 1.442695, %v1710_v3  ;;  %v2268_v3 = vld [vmem:[#allocation8 + $0xa0] sm:$0xff] }
 0xa31   :  { %v1726_v6 = vpop.permute.xlu1 %1725 }
 0xa32   :  { %10056 = vpow2.f32 %v1713_v4  ;;  %9309 = vmatpush3.msra.mxu1 %v1726_v6  ;;  %v9822_v4 = vpack.c.bf16 %v2268_v3, %v2267_v2  ;;  %v2095_v6 = vld [vmem:[#allocation8 + $0x18] sm:$0xff] }
 0xa33   :  { %9311 = vmatmul.mubr.msk.f32.vlgmr.msra.gmra.mrb[20].mxu1 %vm284_vm2, %v1722_v9  ;;  %9807 = vmatprep.subr.bf16.mxu1 %v9806_v63  ;;  %v2096_v9 = vld [vmem:[#allocation8 + $0x98] sm:$0xff] }
 0xa34   :  { %9809 = vmatpush3.bf16.msra.mxu1 %v9806_v63 }
 0xa35   :  { %9811 = vmatprep.subr.bf16.mxu1 %v9810_v1 }
 0xa38   :  { %9813 = vmatpush3.bf16.msra.mxu1 %v9810_v1 }
 0xa39   :  { %9823 = vmatprep.subr.bf16.mxu1 %v9822_v4 }
 0xa3c   :  { %v10057_v10 = vpop.eup %10056 }
 0xa3d   :  { %v1718_v11 = vsel %vm284_vm2, %v10057_v10, 0.0 }
 0xa3e   :  { %1719 = vadd.xlane.f32.xlu0 %v1718_v11 }
 0xa54   :  { %1801 = vrot.lane.b32.xlu0 %v10501_v13, %s10390_s30  ;;  %v8769_v13 = vld [vmem:[#allocation10 + $0x1] ss:$0 sm:$0xff] }
 0xacb   :  { %v1720_v12 = vpop.xlane.xlu0 %1719 }
 0xacc   :  { %10058 = vrcp.f32 %v1720_v12 }
 0xacf   :  { %v1802_v15 = vpop.permute.xlu0 %1801 }
 0xad0   :  { %9314 = vmatpush3.msra.mxu0 %v1802_v15 }
 0xad1   :  { %9318 = vmatprep.subr.mxu0 %v274_v14 }
 0xad6   :  { %v10059_v16 = vpop.eup %10058 }
 0xad7   :  { %v1724_v18 = vmul.f32 %v10059_v16, %v10057_v10  ;;  %v9814_v10 = vpack.c.bf16 %v2096_v9, %v2095_v6 }
 0xad9   :  { %9316 = vmatmul.mubr.msk.f32.vlgmr.msra.gmra.mrb[12].mxu0 %vm284_vm2, %v1724_v18 }
 0xada   :  { %9319 = vmatpush3.msra.mxu0 %v274_v14 }
 0xadb   :  { %9815 = vmatprep.subr.bf16.mxu0 %v9814_v10 }
 0xb06   :  { %v1797_v19 = vpop.f32.mrb[20].mxu1 }
 0xb07   :  { %v9312_v20 = vpop.f32.mrb[21].mxu1  ;;  %9320 = vmatprep.mubr.msk.f32.mxu0 %vm284_vm2, %v1797_v19 }
 0xbac   :  { %v1873_v21 = vpop.f32.mrb[12].mxu0 }
 0xbad   :  { %v9317_v22 = vpop.f32.mrb[13].mxu0  ;;  %9321 = vmatmul.mubr.msk.f32.vlgmr.msra.gmra.mrb[2].mxu0 %vm284_vm2, %v1873_v21 }
 0xbae   :  { %9817 = vmatpush3.bf16.msra.mxu0 %v9814_v10  ;;  %v10753_v10 = vld [vmem:[#allocation10 + $0x7] ss:$0 sm:$0xff] }
 0xc80   :  { %v9322_v25 = vpop.f32.mrb[2].mxu0 }
 0xc81   :  { %v9976_v28 = vadd.f32 %v9322_v25, %v8769_v13  ;;  %v1949_v29 = vpop.f32.mrb[3].mxu0 }
 0xc82   :  { %v9977_v30 = vadd.f32 %v8769_v13, %v1949_v29  ;;  %v8802_v29 = vld [vmem:[#allocation10 + $0x2] ss:$0 sm:$0xff] }
 0xc83   :  { %v1961_v31 = vadd.f32 %v9976_v28, %v10490_v7 }
 0xc84   :  { %v1960_v32 = vadd.f32 %v9977_v30, %v10483_v5 }
 0xc85   :  { %v1967_v35 = vsel %vm189_vm0, %v1961_v31, 0.0 }
 0xc86   :  { %1968 = vadd.xlane.f32.xlu0 %v1967_v35  ;;  %v1964_v37 = vsel %vm189_vm0, %v1960_v32, 0.0  ;;  %v8803_v35 = vld [vmem:[#allocation10 + $0x3] ss:$0 sm:$0xff] }
 0xc87   :  { %1965 = vadd.xlane.f32.xlu1 %v1964_v37 }
 0xc8a   :  { %2233 = vadd.xlane.f32.xlu0 %v2232_v39 }
 0xc8b   :  { %2230 = vadd.xlane.f32.xlu1 %v2229_v40 }
 0xd13   :  { %v1969_v7 = vpop.xlane.xlu0 %1968 }
 0xd14   :  { %v1972_v5 = vmul.f32 0.03125, %v1969_v7  ;;  %v1966_v41 = vpop.xlane.xlu1 %1965  ;;  %v2269_v7 = vld [vmem:[#allocation8 + $0x120] sm:$0xff] }
 0xd15   :  { %v1971_v42 = vmul.f32 0.03125, %v1966_v41 }
 0xd16   :  { %v1974_v43 = vsub.f32 %v1961_v31, %v1972_v5  ;;  %v2270_v5 = vld [vmem:[#allocation8 + $0x1a0] sm:$0xff] }
 0xd17   :  { %v1973_v44 = vsub.f32 %v1960_v32, %v1971_v42  ;;  %v2234_v46 = vpop.xlane.xlu0 %2233  ;;  %v8812_v42 = vld [vmem:[#allocation10 + $0x8] ss:$0 sm:$0xff] }
 0xd18   :  { %v2236_v47 = vmul.f32 0.03125, %v2234_v46  ;;  %v2231_v48 = vpop.xlane.xlu1 %2230  ;;  %v1976_v49 = vmul.f32 %v1974_v43, %v1974_v43 }
 0xd19   :  { %v2235_v50 = vmul.f32 0.03125, %v2231_v48  ;;  %v1975_v51 = vmul.f32 %v1973_v44, %v1973_v44 }
 0xd1a   :  { %v10705_v52 = vsub.f32 %v10694_v34, %v2236_v47  ;;  %v1980_v53 = vsel %vm189_vm0, %v1976_v49, 0.0  ;;  %v9826_v49 = vpack.c.bf16 %v2270_v5, %v2269_v7 }
 0xd1b   :  { %v2237_v54 = vsub.f32 %v10697_v36, %v2235_v50  ;;  %1981 = vadd.xlane.f32.xlu0 %v1980_v53  ;;  %v1977_v55 = vsel %vm189_vm0, %v1975_v51, 0.0  ;;  %v8813_v50 = vld [vmem:[#allocation10 + $0x9] ss:$0 sm:$0xff] }
 0xd1c   :  { %1978 = vadd.xlane.f32.xlu1 %v1977_v55  ;;  %v2240_v56 = vmul.f32 %v10705_v52, %v10705_v52  ;;  %v2098_v55 = vld [vmem:[#allocation8 + $0x198] sm:$0xff] }
 0xd1d   :  { %v2239_v57 = vmul.f32 %v2237_v54, %v2237_v54 }
 0xd1e   :  { %v2244_v58 = vsel %vm189_vm0, %v2240_v56, 0.0 }
 0xd1f   :  { %2245 = vadd.xlane.f32.xlu0 %v2244_v58  ;;  %v2241_v59 = vsel %vm189_vm0, %v2239_v57, 0.0  ;;  %v8804_v57 = vld [vmem:[#allocation10 + $0x6] ss:$0 sm:$0xff] }
 0xd20   :  { %2242 = vadd.xlane.f32.xlu1 %v2241_v59 }
 0xda8   :  { %v1982_v11 = vpop.xlane.xlu0 %1981 }
 0xda9   :  { %v1984_v12 = vmul.f32 0.03125, %v1982_v11  ;;  %v1979_v14 = vpop.xlane.xlu1 %1978 }
 0xdaa   :  { %v1983_v15 = vmul.f32 0.03125, %v1979_v14 }
 0xdab   :  { %v1986_v16 = vadd.f32 1e-05, %v1984_v12 }
 0xdac   :  { %v1985_v18 = vadd.f32 1e-05, %v1983_v15  ;;  %v2246_v19 = vpop.xlane.xlu0 %2245  ;;  %v104_v15 = vstv %s103_s1 }
 0xdad   :  { %10060 = vrsqrt.f32 %v1986_v16  ;;  %v2248_v20 = vmul.f32 0.03125, %v2246_v19  ;;  %v2243_v21 = vpop.xlane.xlu1 %2242  ;;  %v105_v16 = vsel %vm95_vm3, %v104_v15, 0 }
 0xdae   :  { %10062 = vrsqrt.f32 %v1985_v18  ;;  %v2247_v22 = vmul.f32 0.03125, %v2243_v21  ;;  %v107_v18 = vstv %s8765_s7 }
 0xdaf   :  { %v2250_v13 = vadd.f32 1e-05, %v2248_v20  ;;  %v108_v19 = vsel %vm99_vm4, %v107_v18, %v105_v16 }
 0xdb0   :  { %v2249_v25 = vadd.f32 1e-05, %v2247_v22  ;;  %vm112_vm10 = vcmp.lt.s32.totalorder %v10523_v23, %v108_v19 }
 0xdb1   :  { %10064 = vrsqrt.f32 %v2250_v13  ;;  %v139_v20 = vsel %vm112_vm10, 1, %v10380_v27  ;;  %vm7355_vm10 = vcmp.gt.s32.totalorder %v10527_v24, 6 }
 0xdb2   :  { %10066 = vrsqrt.f32 %v2249_v25  ;;  %v146_v21 = vrot.slane %v139_v20, %v10532_v26 }
 0xdb4   :  { %v147_v22 = vcombine.high %v146_v21, %v146_v21  ;;  %v154_v25 = vrot.slane %v146_v21, %v10532_v26 }
 0xdb6   :  { %v161_v13 = vrot.slane %v147_v22, %v10532_v26  ;;  %vm162_vm12 = vcmp.ne.s32.totalorder %v154_v25, 0 }
 0xdb7   :  { %v10061_v28 = vpop.eup %10060 }
 0xdb8   :  { %v10063_v30 = vpop.eup %10062  ;;  %v1990_v31 = vmul.f32 %v10061_v28, %v1974_v43  ;;  %vm163_vm11 = vcmp.ne.s32.totalorder %v161_v13, 0 }
 0xdb9   :  { %v1989_v32 = vmul.f32 %v10063_v30, %v1973_v44  ;;  %v165_v28 = vsel %vm163_vm11, 1, %v10380_v27  ;;  %vm7491_vm11 = vcmp.gt.s32.totalorder %v10527_v24, 7 }
 0xdba   :  { %v1996_v37 = vmul.f32 %v8802_v29, %v1990_v31  ;;  %v173_v30 = vrot.slane %v165_v28, %v10539_v33 }
 0xdbb   :  { %v10065_v39 = vpop.eup %10064  ;;  %v1995_v40 = vmul.f32 %v8802_v29, %v1989_v32  ;;  %v164_v29 = vsel %vm162_vm12, 1, %v10380_v27  ;;  %vm8745_vm12 = vcmask 392192  }
 0xdbc   :  { %v10067_v41 = vpop.eup %10066  ;;  %v10716_v48 = vadd.f32 %v8803_v35, %v1996_v37  ;;  %v2254_v51 = vmul.f32 %v10065_v39, %v10705_v52  ;;  %v2097_v52 = vld [vmem:[#allocation8 + $0x118] sm:$0xff]  ;;  %v169_v31 = vrot.slane %v164_v29, %v10539_v33  ;;  %vm175_vm14 = vcmp.eq.s32.totalorder %v173_v30, 1 }
 0xdbd   :  { %v10714_v46 = vadd.f32 %v8803_v35, %v1995_v40  ;;  %v2253_v47 = vmul.f32 %v10067_v41, %v2237_v54  ;;  %v9818_v56 = vpack.c.bf16 %v2098_v55, %v2097_v52  ;;  %vm10775_vm3 = vmand %vm175_vm14, %vm113_vm13  ;;  %vm8749_vm14 = vcmask 654336  }
 0xdbe   :  { %v2260_v53 = vmul.f32 %v8812_v42, %v2254_v51  ;;  %vm174_vm15 = vcmp.eq.s32.totalorder %v169_v31, 1 }
 0xdbf   :  { %9331 = vmatprep.mubr.msk.f32.mxu1 %vm189_vm0, %v10714_v46  ;;  %v2259_v43 = vmul.f32 %v8812_v42, %v2253_v47  ;;  %9819 = vmatprep.subr.bf16.mxu0 %v9818_v56  ;;  %vm10779_vm4 = vmand %vm174_vm15, %vm113_vm13  ;;  %vm8747_vm13 = vcmask 523264   ;;  %vm8751_vm15 = vcmask 785408  }
 0xdc0   :  { %9332 = vmatmul.mubr.msk.f32.vlgmr.msra.gmra.mrb[22].mxu1 %vm189_vm0, %v10716_v48  ;;  %v2266_v54 = vadd.f32 %v8813_v50, %v2260_v53  ;;  %9821 = vmatpush3.bf16.msra.mxu0 %v9818_v56 }
 0xdc1   :  { %9825 = vmatpush3.bf16.msra.mxu1 %v9822_v4  ;;  %v2265_v44 = vadd.f32 %v8813_v50, %v2259_v43  ;;  %9356 = vmatprep.subr.mxu0 %v10376_v8 }
 0xdc2   :  { %9827 = vmatprep.subr.bf16.mxu1 %v9826_v49 }
 0xdc3   :  { %9353 = vmatprep.mubr.msk.f32.mxu1 %vm189_vm0, %v2265_v44 }
 0xdc5   :  { %9829 = vmatpush3.bf16.msra.mxu1 %v9826_v49 }
 0xdc6   :  { %9361 = vmatprep.subr.mxu1 %v10376_v8 }
 0xdc8   :  { %9354 = vmatmul.mubr.msk.f32.vlgmr.msra.gmra.mrb[24].mxu1 %vm189_vm0, %v2266_v54 }
 0xdc9   :  { %9363 = vmatprep.mubr.msk.f32.mxu1 %vm10377_vm1, %v10376_v8 }
 0xe93   :  { %v9333_v58 = vpop.f32.mrb[22].mxu1 }
 0xe94   :  { %v2090_v59 = vadd.f32 %v9333_v58, %v8804_v57  ;;  %v2084_v60 = vpop.f32.mrb[23].mxu1  ;;  %v2357_v58 = vld [vmem:[#allocation8 + $0x28] sm:$0xff] }
 0xe95   :  { %v2085_v61 = vadd.f32 %v8804_v57, %v2084_v60 }
 0xe96   :  { %v2094_v63 = vmax.f32 %v2090_v59, 0.0 }
 0xe97   :  { %v2093_v62 = vmax.f32 %v2085_v61, 0.0 }
 0xe99   :  { %9342 = vmatprep.mubr.msk.f32.mxu0 %vm189_vm0, %v2093_v62 }
 0xe9a   :  { %9343 = vmatmul.mubr.msk.f32.vlgmr.msra.gmra.mrb[14].mxu0 %vm189_vm0, %v2094_v63 }
 0xe9b   :  { %v9355_v1 = vpop.f32.mrb[24].mxu1  ;;  %9358 = vmatprep.mubr.msk.f32.mxu0 %vm10377_vm1, %v10376_v8 }
 0xe9c   :  { %v10733_v2 = vadd.f32 %v9355_v1, %v8814_v0  ;;  %v2348_v3 = vpop.f32.mrb[25].mxu1 }
 0xe9d   :  { %v10735_v4 = vadd.f32 %v8814_v0, %v2348_v3 }
 0xe9e   :  { %2445 = vrot.lane.b32.xlu0 %v10733_v2, %s10378_s21 }
 0xe9f   :  { %2368 = vrot.lane.b32.xlu1 %v10735_v4, %s10378_s21 }
 0xf10   :  { %v2446_v6 = vpop.permute.xlu0 %2445 }
 0xf11   :  { %9362 = vmatpush3.xpose.msk.msra.mxu1 %vm284_vm2, %v2446_v6  ;;  %v2369_v9 = vpop.permute.xlu1 %2368 }
 0xf12   :  { %9357 = vmatpush3.xpose.msk.msra.mxu0 %vm284_vm2, %v2369_v9  ;;  %9371 = vmatprep.subr.mxu1 %v10376_v8 }
 0xf13   :  { %9366 = vmatprep.subr.mxu0 %v10376_v8 }
 0xf14   :  { %9364 = vmatmul.mubr.msk.f32.vlgmr.msra.gmra.mrb[26].mxu1 %vm284_vm2, %v10733_v2 }
 0xf15   :  { %9359 = vmatmul.mubr.msk.f32.vlgmr.msra.gmra.mrb[16].mxu0 %vm284_vm2, %v10735_v4  ;;  %9373 = vmatprep.mubr.msk.f32.mxu1 %vm10377_vm1, %v10376_v8 }
 0xf16   :  { %9368 = vmatprep.mubr.msk.f32.mxu0 %vm10377_vm1, %v10376_v8 }
 0xf6d   :  { %v9344_v11 = vpop.f32.mrb[14].mxu0 }
 0xf6e   :  { %v10756_v12 = vadd.f32 %v9344_v11, %v10753_v10  ;;  %v10758_v14 = vpop.f32.mrb[15].mxu0 }
 0xfe7   :  { %v2517_v32 = vpop.f32.mrb[26].mxu1 }
 0xfe8   :  { %v2522_v26 = vmul.f32 0.35355338, %v2517_v32  ;;  %v2440_v37 = vpop.f32.mrb[16].mxu0  ;;  %v9365_v39 = vpop.f32.mrb[27].mxu1 }
 0xfe9   :  { %v2521_v27 = vmul.f32 0.35355338, %v2440_v37  ;;  %v9360_v7 = vpop.f32.mrb[17].mxu0 }
 0xfea   :  { %v2524_v33 = vsel %vm10775_vm3, %v2522_v26, -1e+30 }
 0xfeb   :  { %v2528_v23 = vsel %vm284_vm2, %v2524_v33, -inf  ;;  %v2523_v5 = vsel %vm10779_vm4, %v2521_v27, -1e+30 }
 0xfec   :  { %2529 = vmax.xlane.f32.xlu0 %v2528_v23  ;;  %v2525_v41 = vsel %vm284_vm2, %v2523_v5, -inf }
 0xfed   :  { %2526 = vmax.xlane.f32.xlu1 %v2525_v41 }
0x1079   :  { %v2530_v42 = vpop.xlane.xlu0 %2529 }
0x107a   :  { %v2532_v47 = vsub.f32 %v2524_v33, %v2530_v42  ;;  %v2527_v49 = vpop.xlane.xlu1 %2526 }
0x107b   :  { %v2531_v50 = vsub.f32 %v2523_v5, %v2527_v49 }
0x107c   :  { %v2535_v51 = vmul.f32 1.442695, %v2532_v47 }
0x107d   :  { %v2533_v43 = vmul.f32 1.442695, %v2531_v50 }
0x107e   :  { %10068 = vpow2.f32 %v2535_v51 }
0x107f   :  { %10070 = vpow2.f32 %v2533_v43 }
0x1088   :  { %v10069_v44 = vpop.eup %10068 }
0x1089   :  { %v10071_v53 = vpop.eup %10070  ;;  %v2540_v54 = vsel %vm284_vm2, %v10069_v44, 0.0 }
0x108a   :  { %2541 = vadd.xlane.f32.xlu0 %v2540_v54  ;;  %v2537_v52 = vsel %vm284_vm2, %v10071_v53, 0.0 }
0x108b   :  { %2538 = vadd.xlane.f32.xlu1 %v2537_v52 }
0x109c   :  { %2547 = vrot.lane.b32.xlu1 %v10735_v4, %s10381_s4 }
0x10a0   :  { %2623 = vrot.lane.b32.xlu0 %v10733_v2, %s10381_s4  ;;  %2784 = vrot.lane.b32.xlu1 %v10735_v4, %s10382_s2 }
0x10a4   :  { %2862 = vrot.lane.b32.xlu0 %v10733_v2, %s10382_s2  ;;  %2782 = vrot.lane.b32.xlu1 %v10735_v4, %s10383_s22 }
0x10a8   :  { %2860 = vrot.lane.b32.xlu1 %v10733_v2, %s10383_s22 }
0x10ac   :  { %3201 = vrot.lane.b32.xlu1 %v10735_v4, %s10386_s26 }
0x1117   :  { %v2542_v55 = vpop.xlane.xlu0 %2541 }
0x1118   :  { %10072 = vrcp.f32 %v2542_v55  ;;  %v2539_v56 = vpop.xlane.xlu1 %2538 }
0x1119   :  { %10074 = vrcp.f32 %v2539_v56 }
0x111b   :  { %v2624_v57 = vpop.permute.xlu0 %2623 }
0x111c   :  { %9372 = vmatpush3.msra.mxu1 %v2624_v57  ;;  %v2548_v59 = vpop.permute.xlu1 %2547 }
0x111d   :  { %9367 = vmatpush3.msra.mxu0 %v2548_v59  ;;  %9381 = vmatprep.subr.mxu1 %v10376_v8 }
0x111e   :  { %9376 = vmatprep.subr.mxu0 %v2357_v58 }
0x111f   :  { %v2863_v15 = vpop.permute.xlu0 %2862 }
0x1120   :  { %v2785_v61 = vpop.permute.xlu1 %2784 }
0x1122   :  { %v10073_v60 = vpop.eup %10072 }
0x1123   :  { %v10075_v62 = vpop.eup %10074  ;;  %v2546_v63 = vmul.f32 %v10073_v60, %v10069_v44 }
0x1124   :  { %v2544_v0 = vmul.f32 %v10075_v62, %v10071_v53  ;;  %v2783_v1 = vpop.permute.xlu1 %2782 }
0x1125   :  { %9374 = vmatmul.mubr.msk.f32.vlgmr.msra.gmra.mrb[28].mxu1 %vm284_vm2, %v2546_v63 }
0x1126   :  { %9382 = vmatpush3.xpose.msk.msra.mxu1 %vm284_vm2, %v2785_v61  ;;  %9369 = vmatmul.mubr.msk.f32.vlgmr.msra.gmra.mrb[18].mxu0 %vm284_vm2, %v2544_v0 }
0x1127   :  { %9383 = vmatprep.mubr.msk.f32.mxu1 %vm10377_vm1, %v10376_v8  ;;  %9377 = vmatpush3.msra.mxu0 %v2357_v58 }
0x1128   :  { %9386 = vmatprep.subr.mxu0 %v10376_v8  ;;  %9391 = vmatprep.subr.mxu1 %v10376_v8  ;;  %v2861_v20 = vpop.permute.xlu1 %2860 }
0x1129   :  { %9384 = vmatmul.mubr.msk.f32.vlgmr.msra.gmra.mrb[30].mxu1 %vm284_vm2, %v2783_v1 }
0x112a   :  { %9393 = vmatprep.mubr.msk.f32.mxu1 %vm10377_vm1, %v10376_v8 }
0x112c   :  { %v3202_v7 = vpop.permute.xlu1 %3201 }
0x11f8   :  { %v2695_v3 = vpop.f32.mrb[28].mxu1 }
0x11f9   :  { %v2619_v6 = vpop.f32.mrb[18].mxu0  ;;  %v9375_v9 = vpop.f32.mrb[29].mxu1 }
0x11fa   :  { %v9370_v11 = vpop.f32.mrb[19].mxu0  ;;  %9378 = vmatprep.mubr.msk.f32.mxu0 %vm284_vm2, %v2619_v6 }
0x11fb   :  { %9379 = vmatmul.mubr.msk.f32.vlgmr.msra.gmra.mrb[20].mxu0 %vm284_vm2, %v2695_v3  ;;  %v2358_v11 = vld [vmem:[#allocation8 + $0xa8] sm:$0xff] }
0x11fc   :  { %9387 = vmatpush3.xpose.msk.msra.mxu0 %vm284_vm2, %v2863_v15  ;;  %v2856_v16 = vpop.f32.mrb[30].mxu1  ;;  %9388 = vmatprep.mubr.msk.f32.mxu0 %vm10377_vm1, %v10376_v8 }
0x11fd   :  { %v2938_v18 = vmul.f32 0.35355338, %v2856_v16  ;;  %v9385_v19 = vpop.f32.mrb[31].mxu1  ;;  %9396 = vmatprep.subr.mxu0 %v10376_v8 }
0x11ff   :  { %9389 = vmatmul.mubr.msk.f32.vlgmr.msra.gmra.mrb[22].mxu0 %vm284_vm2, %v2861_v20  ;;  %v2940_v21 = vsel %vm10779_vm4, %v2938_v18, -1e+30 }
0x1200   :  { %v2942_v22 = vsel %vm284_vm2, %v2940_v21, -inf  ;;  %9398 = vmatprep.mubr.msk.f32.mxu0 %vm10377_vm1, %v10376_v8 }
0x1201   :  { %2943 = vmax.xlane.f32.xlu0 %v2942_v22 }
0x1217   :  { %2964 = vrot.lane.b32.xlu0 %v10735_v4, %s10384_s24 }
0x121b   :  { %3199 = vrot.lane.b32.xlu0 %v10735_v4, %s10385_s25 }
0x121f   :  { %3277 = vrot.lane.b32.xlu0 %v10733_v2, %s10385_s25 }
0x128e   :  { %v2944_v13 = vpop.xlane.xlu0 %2943 }
0x128f   :  { %v2948_v25 = vsub.f32 %v2940_v21, %v2944_v13 }
0x1291   :  { %v2950_v28 = vmul.f32 1.442695, %v2948_v25 }
0x1292   :  { %v2965_v29 = vpop.permute.xlu0 %2964 }
0x1293   :  { %10076 = vpow2.f32 %v2950_v28  ;;  %9392 = vmatpush3.msra.mxu1 %v2965_v29 }
0x1294   :  { %9406 = vmatprep.subr.mxu1 %v10376_v8 }
0x1296   :  { %v3200_v41 = vpop.permute.xlu0 %3199 }
0x129a   :  { %v3278_v47 = vpop.permute.xlu0 %3277 }
0x129d   :  { %v10077_v30 = vpop.eup %10076 }
0x129e   :  { %v2954_v31 = vsel %vm284_vm2, %v10077_v30, 0.0 }
0x129f   :  { %2955 = vadd.xlane.f32.xlu1 %v2954_v31 }
0x12b0   :  { %3279 = vrot.lane.b32.xlu1 %v10733_v2, %s10386_s26 }
0x12d2   :  { %v2934_v32 = vpop.f32.mrb[22].mxu0 }
0x12d3   :  { %v2939_v26 = vmul.f32 0.35355338, %v2934_v32  ;;  %v9390_v37 = vpop.f32.mrb[23].mxu0 }
0x12d5   :  { %v2941_v39 = vsel %vm10775_vm3, %v2939_v26, -1e+30  ;;  %v2359_v26 = vld [vmem:[#allocation8 + $0x128] sm:$0xff] }
0x12d6   :  { %v2945_v27 = vsel %vm284_vm2, %v2941_v39, -inf }
0x12d7   :  { %2946 = vmax.xlane.f32.xlu1 %v2945_v27 }
0x132c   :  { %v2956_v33 = vpop.xlane.xlu1 %2955 }
0x132d   :  { %10078 = vrcp.f32 %v2956_v33 }
0x1330   :  { %v3280_v42 = vpop.permute.xlu1 %3279 }
0x1337   :  { %v10079_v23 = vpop.eup %10078 }
0x1338   :  { %v2961_v5 = vmul.f32 %v10079_v23, %v10077_v30 }
0x133a   :  { %9394 = vmatmul.mubr.msk.f32.vlgmr.msra.gmra.mrb[32].mxu1 %vm284_vm2, %v2961_v5 }
0x133b   :  { %9407 = vmatpush3.xpose.msk.msra.mxu1 %vm284_vm2, %v3202_v7  ;;  %9408 = vmatprep.mubr.msk.f32.mxu1 %vm10377_vm1, %v10376_v8 }
0x133c   :  { %9411 = vmatprep.subr.mxu1 %v10376_v8 }
0x133e   :  { %9409 = vmatmul.mubr.msk.f32.vlgmr.msra.gmra.mrb[34].mxu1 %vm284_vm2, %v3200_v41 }
0x133f   :  { %9412 = vmatpush3.xpose.msk.msra.mxu1 %vm284_vm2, %v3280_v42  ;;  %9413 = vmatprep.mubr.msk.f32.mxu1 %vm10377_vm1, %v10376_v8 }
0x1340   :  { %9421 = vmatprep.subr.mxu1 %v10376_v8 }
0x1342   :  { %9414 = vmatmul.mubr.msk.f32.vlgmr.msra.gmra.mrb[36].mxu1 %vm284_vm2, %v3278_v47 }
0x1343   :  { %9423 = vmatprep.mubr.msk.f32.mxu1 %vm10377_vm1, %v10376_v8 }
0x1364   :  { %v2947_v49 = vpop.xlane.xlu1 %2946 }
0x1365   :  { %v2949_v50 = vsub.f32 %v2941_v39, %v2947_v49 }
0x1367   :  { %v2952_v51 = vmul.f32 1.442695, %v2949_v50 }
0x1369   :  { %10080 = vpow2.f32 %v2952_v51 }
0x1373   :  { %v10081_v43 = vpop.eup %10080 }
0x1374   :  { %v2957_v44 = vsel %vm284_vm2, %v10081_v43, 0.0 }
0x1375   :  { %2958 = vadd.xlane.f32.xlu0 %v2957_v44 }
0x138b   :  { %3040 = vrot.lane.b32.xlu0 %v10733_v2, %s10384_s24 }
0x138f   :  { %3457 = vrot.lane.b32.xlu0 %v10733_v2, %s10387_s27 }
0x1393   :  { %3618 = vrot.lane.b32.xlu0 %v10735_v4, %s10388_s28 }
0x1397   :  { %3696 = vrot.lane.b32.xlu0 %v10733_v2, %s10388_s28 }
0x139b   :  { %3616 = vrot.lane.b32.xlu0 %v10735_v4, %s10389_s29 }
0x1402   :  { %v2959_v53 = vpop.xlane.xlu0 %2958 }
0x1403   :  { %10082 = vrcp.f32 %v2959_v53 }
0x1406   :  { %v3041_v54 = vpop.permute.xlu0 %3040 }
0x1407   :  { %9397 = vmatpush3.msra.mxu0 %v3041_v54 }
0x1408   :  { %9401 = vmatprep.subr.mxu0 %v2358_v11 }
0x140a   :  { %v3458_v52 = vpop.permute.xlu0 %3457 }
0x140b   :  { %9422 = vmatpush3.msra.mxu1 %v3458_v52 }
0x140c   :  { %9431 = vmatprep.subr.mxu1 %v10376_v8 }
0x140d   :  { %v10083_v55 = vpop.eup %10082  ;;  %v3036_v56 = vpop.f32.mrb[32].mxu1 }
0x140e   :  { %v9395_v57 = vpop.f32.mrb[33].mxu1  ;;  %v2963_v58 = vmul.f32 %v10083_v55, %v10081_v43  ;;  %v3619_v39 = vpop.permute.xlu0 %3618 }
0x1410   :  { %9399 = vmatmul.mubr.msk.f32.vlgmr.msra.gmra.mrb[24].mxu0 %vm284_vm2, %v2963_v58 }
0x1411   :  { %9403 = vmatprep.mubr.msk.f32.mxu0 %vm284_vm2, %v3036_v56  ;;  %v3273_v59 = vpop.f32.mrb[34].mxu1  ;;  %9402 = vmatpush3.msra.mxu0 %v2358_v11 }
0x1412   :  { %v3355_v60 = vmul.f32 0.35355338, %v3273_v59  ;;  %v9410_v61 = vpop.f32.mrb[35].mxu1  ;;  %9416 = vmatprep.subr.mxu0 %v10376_v8  ;;  %v3697_v23 = vpop.permute.xlu0 %3696 }
0x1414   :  { %v3357_v62 = vsel %vm10779_vm4, %v3355_v60, -1e+30 }
0x1415   :  { %v3351_v63 = vpop.f32.mrb[36].mxu1  ;;  %v3359_v0 = vsel %vm284_vm2, %v3357_v62, -inf }
0x1416   :  { %v3356_v1 = vmul.f32 0.35355338, %v3351_v63  ;;  %v9415_v3 = vpop.f32.mrb[37].mxu1  ;;  %3360 = vmax.xlane.f32.xlu1 %v3359_v0  ;;  %v3617_v41 = vpop.permute.xlu0 %3616  ;;  %v2177_v0 = vadd.f32 %v10753_v10, %v10758_v14 }
0x1418   :  { %v3358_v6 = vsel %vm10775_vm3, %v3356_v1, -1e+30  ;;  %v2185_v1 = vadd.f32 %v2177_v0, %v10714_v46  ;;  %v2186_v46 = vadd.f32 %v10756_v12, %v10716_v48 }
0x1419   :  { %v3362_v9 = vsel %vm284_vm2, %v3358_v6, -inf }
0x141a   :  { %3363 = vmax.xlane.f32.xlu1 %v3362_v9  ;;  %v2189_v3 = vsel %vm189_vm0, %v2185_v1, 0.0  ;;  %v2192_v14 = vsel %vm189_vm0, %v2186_v46, 0.0 }
0x14a3   :  { %v3361_v15 = vpop.xlane.xlu1 %3360 }
0x14a4   :  { %v3365_v16 = vsub.f32 %v3357_v62, %v3361_v15 }
0x14a6   :  { %v3367_v18 = vmul.f32 1.442695, %v3365_v16 }
0x14a7   :  { %v3364_v19 = vpop.xlane.xlu1 %3363 }
0x14a8   :  { %10084 = vpow2.f32 %v3367_v18  ;;  %v3366_v20 = vsub.f32 %v3358_v6, %v3364_v19 }
0x14aa   :  { %v3369_v21 = vmul.f32 1.442695, %v3366_v20  ;;  %v2360_v20 = vld [vmem:[#allocation8 + $0x1a8] sm:$0xff] }
0x14ac   :  { %10086 = vpow2.f32 %v3369_v21 }
0x14b2   :  { %v10085_v22 = vpop.eup %10084 }
0x14b3   :  { %v3371_v13 = vsel %vm284_vm2, %v10085_v22, 0.0 }
0x14b4   :  { %3372 = vadd.xlane.f32.xlu1 %v3371_v13 }
0x14b6   :  { %v10087_v25 = vpop.eup %10086 }
0x14b7   :  { %v3374_v28 = vsel %vm284_vm2, %v10087_v25, 0.0 }
0x14b8   :  { %3375 = vadd.xlane.f32.xlu1 %v3374_v28 }
0x14c9   :  { %3381 = vrot.lane.b32.xlu1 %v10735_v4, %s10387_s27 }
0x14cd   :  { %3694 = vrot.lane.b32.xlu1 %v10733_v2, %s10389_s29 }
0x14e3   :  { %v3112_v29 = vpop.f32.mrb[24].mxu0 }
0x14e4   :  { %v9400_v30 = vpop.f32.mrb[25].mxu0  ;;  %9404 = vmatmul.mubr.msk.f32.vlgmr.msra.gmra.mrb[20].mxu0 %vm284_vm2, %v3112_v29 }
0x14e5   :  { %9418 = vmatprep.mubr.msk.f32.mxu0 %vm10377_vm1, %v10376_v8 }
0x1541   :  { %v3373_v31 = vpop.xlane.xlu1 %3372 }
0x1542   :  { %10088 = vrcp.f32 %v3373_v31 }
0x1545   :  { %v3376_v32 = vpop.xlane.xlu1 %3375 }
0x1546   :  { %10090 = vrcp.f32 %v3376_v32  ;;  %v8817_v32 = vld [vmem:[#allocation10 + $0xd] ss:$0 sm:$0xff] }
0x1549   :  { %v3382_v37 = vpop.permute.xlu1 %3381 }
0x154a   :  { %9417 = vmatpush3.msra.mxu0 %v3382_v37 }
0x154b   :  { %9426 = vmatprep.subr.mxu0 %v2359_v26 }
0x154c   :  { %v10089_v27 = vpop.eup %10088 }
0x154d   :  { %v3378_v7 = vmul.f32 %v10089_v27, %v10085_v22  ;;  %v3695_v51 = vpop.permute.xlu1 %3694 }
0x154f   :  { %9419 = vmatmul.mubr.msk.f32.vlgmr.msra.gmra.mrb[26].mxu0 %vm284_vm2, %v3378_v7 }
0x1550   :  { %v10091_v33 = vpop.eup %10090  ;;  %9427 = vmatpush3.msra.mxu0 %v2359_v26 }
0x1551   :  { %v3380_v5 = vmul.f32 %v10091_v33, %v10087_v25  ;;  %9436 = vmatprep.subr.mxu0 %v10376_v8 }
0x1553   :  { %9424 = vmatmul.mubr.msk.f32.vlgmr.msra.gmra.mrb[38].mxu1 %vm284_vm2, %v3380_v5 }
0x1554   :  { %9432 = vmatpush3.xpose.msk.msra.mxu1 %vm284_vm2, %v3619_v39  ;;  %9433 = vmatprep.mubr.msk.f32.mxu1 %vm10377_vm1, %v10376_v8 }
0x1555   :  { %9441 = vmatprep.subr.mxu1 %v10376_v8 }
0x1557   :  { %9434 = vmatmul.mubr.msk.f32.vlgmr.msra.gmra.mrb[40].mxu1 %vm284_vm2, %v3617_v41 }
0x1558   :  { %9443 = vmatprep.mubr.msk.f32.mxu1 %vm10377_vm1, %v10376_v8 }
0x1622   :  { %v3453_v42 = vpop.f32.mrb[26].mxu0 }
0x1623   :  { %v9420_v47 = vpop.f32.mrb[27].mxu0  ;;  %9428 = vmatprep.mubr.msk.f32.mxu0 %vm284_vm2, %v3453_v42 }
0x1626   :  { %v3529_v49 = vpop.f32.mrb[38].mxu1 }
0x1627   :  { %v9425_v50 = vpop.f32.mrb[39].mxu1  ;;  %9429 = vmatmul.mubr.msk.f32.vlgmr.msra.gmra.mrb[20].mxu0 %vm284_vm2, %v3529_v49 }
0x1628   :  { %9437 = vmatpush3.xpose.msk.msra.mxu0 %vm284_vm2, %v3697_v23  ;;  %9438 = vmatprep.mubr.msk.f32.mxu0 %vm10377_vm1, %v10376_v8 }
0x1629   :  { %9446 = vmatprep.subr.mxu0 %v10376_v8 }
0x162a   :  { %v3690_v43 = vpop.f32.mrb[40].mxu1 }
0x162b   :  { %v3772_v44 = vmul.f32 0.35355338, %v3690_v43  ;;  %v9435_v53 = vpop.f32.mrb[41].mxu1  ;;  %9439 = vmatmul.mubr.msk.f32.vlgmr.msra.gmra.mrb[28].mxu0 %vm284_vm2, %v3695_v51  ;;  %v4166_v43 = vld [vmem:[#allocation8 + $0xb8] sm:$0xff] }
0x162c   :  { %9448 = vmatprep.mubr.msk.f32.mxu0 %vm10377_vm1, %v10376_v8  ;;  %v4168_v53 = vld [vmem:[#allocation8 + $0x1b8] sm:$0xff] }
0x162d   :  { %v3774_v54 = vsel %vm10779_vm4, %v3772_v44, -1e+30 }
0x162e   :  { %v3776_v52 = vsel %vm284_vm2, %v3774_v54, -inf }
0x162f   :  { %3777 = vmax.xlane.f32.xlu0 %v3776_v52 }
0x16bc   :  { %v3778_v55 = vpop.xlane.xlu0 %3777 }
0x16bd   :  { %v3782_v56 = vsub.f32 %v3774_v54, %v3778_v55 }
0x16bf   :  { %v3784_v57 = vmul.f32 1.442695, %v3782_v56 }
0x16c1   :  { %10092 = vpow2.f32 %v3784_v57 }
0x16cb   :  { %v10093_v58 = vpop.eup %10092 }
0x16cc   :  { %v3788_v59 = vsel %vm284_vm2, %v10093_v58, 0.0 }
0x16cd   :  { %3789 = vadd.xlane.f32.xlu0 %v3788_v59 }
0x16fe   :  { %v3768_v60 = vpop.f32.mrb[28].mxu0 }
0x16ff   :  { %v3773_v61 = vmul.f32 0.35355338, %v3768_v60  ;;  %v9440_v62 = vpop.f32.mrb[29].mxu0 }
0x1701   :  { %v3775_v63 = vsel %vm10775_vm3, %v3773_v61, -1e+30  ;;  %vm8753_vm3 = vcmask 916480  }
0x1702   :  { %v3779_v40 = vsel %vm284_vm2, %v3775_v63, -inf }
0x1703   :  { %3780 = vmax.xlane.f32.xlu1 %v3779_v40 }
0x1714   :  { %3798 = vrot.lane.b32.xlu1 %v10735_v4, %s10390_s30 }
0x1738   :  { %2190 = vadd.xlane.f32.xlu1 %v2189_v3 }
0x175a   :  { %v3790_v6 = vpop.xlane.xlu0 %3789 }
0x175b   :  { %10094 = vrcp.f32 %v3790_v6 }
0x1765   :  { %v10095_v11 = vpop.eup %10094 }
0x1766   :  { %v3795_v18 = vmul.f32 %v10095_v11, %v10093_v58  ;;  %v10391_v11 = vmov 1983009808  }
0x1790   :  { %v3781_v9 = vpop.xlane.xlu1 %3780 }
0x1791   :  { %v3783_v35 = vsub.f32 %v3775_v63, %v3781_v9 }
0x1793   :  { %v3786_v15 = vmul.f32 1.442695, %v3783_v35  ;;  %v6207_v35 = vunpack.c.l.s4 %v10391_v11 }
0x1794   :  { %v3799_v16 = vpop.permute.xlu1 %3798 }
0x1795   :  { %10096 = vpow2.f32 %v3786_v15  ;;  %9442 = vmatpush3.msra.mxu1 %v3799_v16  ;;  %v6208_v15 = vunpack.c.0.s8 %v6207_v35 }
0x1796   :  { %9444 = vmatmul.mubr.msk.f32.vlgmr.msra.gmra.mrb[42].mxu1 %vm284_vm2, %v3795_v18  ;;  %v8810_v18 = vld [vmem:[#allocation10 + $0x4] ss:$0 sm:$0xff] }
0x179f   :  { %v10097_v4 = vpop.eup %10096 }
0x17a0   :  { %v3791_v10 = vsel %vm284_vm2, %v10097_v4, 0.0 }
0x17a1   :  { %3792 = vadd.xlane.f32.xlu0 %v3791_v10 }
0x17b7   :  { %3874 = vrot.lane.b32.xlu0 %v10733_v2, %s10390_s30 }
0x17c5   :  { %v2191_v29 = vpop.xlane.xlu1 %2190 }
0x17c6   :  { %v2195_v31 = vmul.f32 0.03125, %v2191_v29 }
0x17c8   :  { %v2197_v7 = vsub.f32 %v2185_v1, %v2195_v31  ;;  %v4075_v31 = vld [vmem:[#allocation8 + $0x30] sm:$0xff] }
0x17ca   :  { %v2199_v49 = vmul.f32 %v2197_v7, %v2197_v7 }
0x17cc   :  { %v2201_v51 = vsel %vm189_vm0, %v2199_v49, 0.0 }
0x17d6   :  { %2193 = vadd.xlane.f32.xlu0 %v2192_v14 }
0x182e   :  { %v3793_v19 = vpop.xlane.xlu0 %3792 }
0x182f   :  { %10098 = vrcp.f32 %v3793_v19  ;;  %v8811_v19 = vld [vmem:[#allocation10 + $0x5] ss:$0 sm:$0xff] }
0x1832   :  { %v3875_v21 = vpop.permute.xlu0 %3874 }
0x1833   :  { %9447 = vmatpush3.msra.mxu0 %v3875_v21  ;;  %v10952_v21 = vsub.s32 %v6208_v15, %v10517_v17 }
0x1834   :  { %9451 = vmatprep.subr.mxu0 %v2360_v20 }
0x1839   :  { %v10099_v22 = vpop.eup %10098 }
0x183a   :  { %v3797_v13 = vmul.f32 %v10099_v22, %v10097_v4  ;;  %v10392_v4 = vmov 1934713408  }
0x183b   :  { %v6238_v10 = vunpack.c.l.s4 %v10392_v4 }
0x183c   :  { %9449 = vmatmul.mubr.msk.f32.vlgmr.msra.gmra.mrb[30].mxu0 %vm284_vm2, %v3797_v13 }
0x183d   :  { %9452 = vmatpush3.msra.mxu0 %v2360_v20 }
0x1863   :  { %v2194_v12 = vpop.xlane.xlu0 %2193 }
0x1864   :  { %v2196_v30 = vmul.f32 0.03125, %v2194_v12 }
0x1866   :  { %v2198_v37 = vsub.f32 %v2186_v46, %v2196_v30 }
0x1868   :  { %v2200_v42 = vmul.f32 %v2198_v37, %v2198_v37 }
0x1869   :  { %v3870_v25 = vpop.f32.mrb[42].mxu1 }
0x186a   :  { %v9445_v28 = vpop.f32.mrb[43].mxu1  ;;  %9453 = vmatprep.mubr.msk.f32.mxu0 %vm284_vm2, %v3870_v25  ;;  %v2204_v50 = vsel %vm189_vm0, %v2200_v42, 0.0  ;;  %v6239_v25 = vunpack.c.0.s8 %v6238_v10 }
0x190f   :  { %v3946_v2 = vpop.f32.mrb[30].mxu0 }
0x1910   :  { %v9450_v48 = vpop.f32.mrb[31].mxu0  ;;  %9454 = vmatmul.mubr.msk.f32.vlgmr.msra.gmra.mrb[20].mxu0 %vm284_vm2, %v3946_v2 }
0x19e3   :  { %v9455_v26 = vpop.f32.mrb[20].mxu0 }
0x19e4   :  { %v9978_v39 = vadd.f32 %v9455_v26, %v8817_v32  ;;  %v4022_v27 = vpop.f32.mrb[21].mxu0  ;;  %v4077_v26 = vld [vmem:[#allocation8 + $0x130] sm:$0xff] }
0x19e5   :  { %v9979_v33 = vadd.f32 %v8817_v32, %v4022_v27  ;;  %v4076_v32 = vld [vmem:[#allocation8 + $0xb0] sm:$0xff] }
0x19e6   :  { %v10927_v23 = vadd.f32 %v9978_v39, %v10694_v34  ;;  %v4165_v34 = vld [vmem:[#allocation8 + $0x38] sm:$0xff]  ;;  %v9830_v27 = vpack.c.bf16 %v4076_v32, %v4075_v31 }
0x19e7   :  { %v10930_v5 = vadd.f32 %v9979_v33, %v10697_v36  ;;  %v4167_v36 = vld [vmem:[#allocation8 + $0x138] sm:$0xff]  ;;  %v9838_v44 = vpack.c.bf16 %v4166_v43, %v4165_v34 }
0x19e8   :  { %v4040_v41 = vsel %vm189_vm0, %v10927_v23, 0.0  ;;  %v9842_v54 = vpack.c.bf16 %v4168_v53, %v4167_v36  ;;  %9831 = vmatprep.subr.bf16.mxu1 %v9830_v27 }
0x19e9   :  { %4041 = vadd.xlane.f32.xlu0 %v4040_v41  ;;  %v4037_v47 = vsel %vm189_vm0, %v10930_v5, 0.0  ;;  %9839 = vmatprep.subr.bf16.mxu0 %v9838_v44 }
0x19ea   :  { %4038 = vadd.xlane.f32.xlu1 %v4037_v47  ;;  %9841 = vmatpush3.bf16.msra.mxu0 %v9838_v44 }
0x19eb   :  { %9843 = vmatprep.subr.bf16.mxu0 %v9842_v54  ;;  %9833 = vmatpush3.bf16.msra.mxu1 %v9830_v27 }
0x19ed   :  { %2205 = vadd.xlane.f32.xlu0 %v2204_v50 }
0x19ee   :  { %2202 = vadd.xlane.f32.xlu1 %v2201_v51  ;;  %9845 = vmatpush3.bf16.msra.mxu0 %v9842_v54 }
0x19ef   :  { %9488 = vmatprep.subr.mxu0 %v10376_v8 }
0x1a76   :  { %v4042_v52 = vpop.xlane.xlu0 %4041 }
0x1a77   :  { %v4044_v55 = vmul.f32 0.03125, %v4042_v52  ;;  %v4039_v56 = vpop.xlane.xlu1 %4038 }
0x1a78   :  { %v4043_v57 = vmul.f32 0.03125, %v4039_v56 }
0x1a79   :  { %v10940_v58 = vsub.f32 %v10927_v23, %v4044_v55 }
0x1a7a   :  { %v10943_v59 = vsub.f32 %v10930_v5, %v4043_v57  ;;  %v2206_v60 = vpop.xlane.xlu0 %2205 }
0x1a7b   :  { %v2208_v61 = vmul.f32 0.03125, %v2206_v60  ;;  %v2203_v62 = vpop.xlane.xlu1 %2202  ;;  %v4048_v63 = vmul.f32 %v10940_v58, %v10940_v58 }
0x1a7c   :  { %v2207_v40 = vmul.f32 0.03125, %v2203_v62  ;;  %v4047_v0 = vmul.f32 %v10943_v59, %v10943_v59 }
0x1a7d   :  { %v2210_v1 = vadd.f32 1e-05, %v2208_v61  ;;  %v4052_v3 = vsel %vm189_vm0, %v4048_v63, 0.0 }
0x1a7e   :  { %v2209_v6 = vadd.f32 1e-05, %v2207_v40  ;;  %4053 = vadd.xlane.f32.xlu0 %v4052_v3  ;;  %v4049_v9 = vsel %vm189_vm0, %v4047_v0, 0.0 }
0x1a7f   :  { %10100 = vrsqrt.f32 %v2210_v1  ;;  %4050 = vadd.xlane.f32.xlu1 %v4049_v9 }
0x1a80   :  { %10102 = vrsqrt.f32 %v2209_v6 }
0x1a89   :  { %v10101_v16 = vpop.eup %10100 }
0x1a8a   :  { %v10103_v46 = vpop.eup %10102  ;;  %v2214_v14 = vmul.f32 %v10101_v16, %v2198_v37  ;;  %v10960_v37 = vsub.s32 %v6239_v25, %v10517_v17  ;;  %v8850_v16 = vld [vmem:[#allocation10 + $0xa] ss:$0 sm:$0xff] }
0x1a8b   :  { %v2213_v20 = vmul.f32 %v10103_v46, %v2197_v7  ;;  %v4078_v7 = vld [vmem:[#allocation8 + $0x1b0] sm:$0xff]  ;;  %v8851_v46 = vld [vmem:[#allocation10 + $0xb] ss:$0 sm:$0xff] }
0x1a8c   :  { %v2220_v22 = vmul.f32 %v8810_v18, %v2214_v14  ;;  %v9834_v47 = vpack.c.bf16 %v4078_v7, %v4077_v26 }
0x1a8d   :  { %v2219_v13 = vmul.f32 %v8810_v18, %v2213_v20 }
0x1a8e   :  { %v2226_v28 = vadd.f32 %v8811_v19, %v2220_v22  ;;  %9835 = vmatprep.subr.bf16.mxu1 %v9834_v47 }
0x1a8f   :  { %v2225_v2 = vadd.f32 %v8811_v19, %v2219_v13  ;;  %9837 = vmatpush3.bf16.msra.mxu1 %v9834_v47  ;;  %v8855_v13 = vld [vmem:[#allocation10 + $0xf] ss:$0 sm:$0xff] }
0x1a90   :  { %v6220_v48 = vcombine.high %v2226_v28, %v10376_v8  ;;  %v6227_v12 = vrot.slane %v2226_v28, %v10952_v21  ;;  %9478 = vmatprep.subr.mxu1 %v10376_v8 }
0x1a91   :  { %9475 = vmatprep.mubr.msk.f32.mxu0 %vm189_vm0, %v2225_v2  ;;  %v6205_v29 = vcombine.high %v2225_v2, %v10376_v8  ;;  %v6212_v30 = vrot.slane %v2225_v2, %v10952_v21 }
0x1a92   :  { %v6234_v39 = vrot.slane %v6220_v48, %v10952_v21  ;;  %9476 = vmatmul.mubr.msk.f32.vlgmr.msra.gmra.mrb[32].mxu0 %vm189_vm0, %v2226_v28 }
0x1a93   :  { %v6219_v33 = vrot.slane %v6205_v29, %v10952_v21  ;;  %v6235_v41 = vcombine.low %v6212_v30, %v6227_v12  ;;  %v6236_v42 = vcombine.high %v6212_v30, %v6227_v12  ;;  %9490 = vmatprep.mubr.msk.f32.mxu0 %vm10377_vm1, %v10376_v8 }
0x1a95   :  { %v6251_v49 = vcombine.low %v6219_v33, %v6234_v39  ;;  %v6252_v50 = vcombine.high %v6219_v33, %v6234_v39  ;;  %v6243_v17 = vrot.slane %v6235_v41, %v10960_v37  ;;  %v6250_v51 = vrot.slane %v6236_v42, %v10960_v37 }
0x1a97   :  { %v6267_v34 = vcombine.high %v6243_v17, %v10376_v8  ;;  %v6268_v43 = vcombine.high %v6250_v51, %v10376_v8  ;;  %v6259_v36 = vrot.slane %v6251_v49, %v10960_v37  ;;  %v6266_v44 = vrot.slane %v6252_v50, %v10960_v37 }
0x1a99   :  { %v6284_v53 = vcombine.low %v6243_v17, %v6267_v34  ;;  %v6285_v54 = vcombine.low %v6250_v51, %v6268_v43  ;;  %v6269_v52 = vcombine.high %v6259_v36, %v10376_v8  ;;  %v6270_v55 = vcombine.high %v6266_v44, %v10376_v8 }
0x1a9b   :  { %v10977_v56 = vrot.slane %v6284_v53, %v10952_v21  ;;  %v10980_v57 = vrot.slane %v6285_v54, %v10952_v21  ;;  %v6301_v60 = vcombine.low %v6259_v36, %v6269_v52  ;;  %v6302_v61 = vcombine.low %v6266_v44, %v6270_v55  ;;  %v4255_v55 = vld [vmem:[#allocation8 + $0x40] sm:$0xff] }
0x1a9d   :  { %v6300_v62 = vcombine.low %v10977_v56, %v10980_v57  ;;  %v10985_v63 = vrot.slane %v6301_v60, %v10952_v21  ;;  %v10988_v40 = vrot.slane %v6302_v61, %v10952_v21  ;;  %v10393_v57 = vmov 0.0|0.0  }
0x1a9f   :  { %v6317_v0 = vcombine.low %v10985_v63, %v10988_v40  ;;  %v6204_v63 = vld [vmem:[#allocation8 + $0x1e0] sm:$0xff] }
0x1b0b   :  { %v4054_v1 = vpop.xlane.xlu0 %4053 }
0x1b0c   :  { %v4056_v3 = vmul.f32 0.03125, %v4054_v1  ;;  %v4051_v6 = vpop.xlane.xlu1 %4050 }
0x1b0d   :  { %v4055_v9 = vmul.f32 0.03125, %v4051_v6 }
0x1b0e   :  { %v4058_v11 = vadd.f32 1e-05, %v4056_v3 }
0x1b0f   :  { %v4057_v35 = vadd.f32 1e-05, %v4055_v9 }
0x1b10   :  { %10104 = vrsqrt.f32 %v4058_v11 }
0x1b11   :  { %10106 = vrsqrt.f32 %v4057_v35 }
0x1b1a   :  { %v10105_v15 = vpop.eup %10104 }
0x1b1b   :  { %v10107_v18 = vpop.eup %10106  ;;  %v4062_v4 = vmul.f32 %v10105_v15, %v10940_v58 }
0x1b1c   :  { %v4061_v10 = vmul.f32 %v10107_v18, %v10943_v59  ;;  %v8852_v59 = vld [vmem:[#allocation10 + $0xe] ss:$0 sm:$0xff] }
0x1b1d   :  { %v4068_v14 = vmul.f32 %v8850_v16, %v4062_v4 }
0x1b1e   :  { %v4067_v19 = vmul.f32 %v8850_v16, %v4061_v10 }
0x1b1f   :  { %v4074_v22 = vadd.f32 %v8851_v46, %v4068_v14 }
0x1b20   :  { %v4073_v20 = vadd.f32 %v8851_v46, %v4067_v19 }
0x1b22   :  { %9464 = vmatprep.mubr.msk.f32.mxu1 %vm189_vm0, %v4073_v20 }
0x1b23   :  { %9465 = vmatmul.mubr.msk.f32.vlgmr.msra.gmra.mrb[44].mxu1 %vm189_vm0, %v4074_v22 }
0x1b24   :  { %9480 = vmatprep.mubr.msk.f32.mxu1 %vm10377_vm1, %v10376_v8 }
0x1b65   :  { %v9477_v25 = vpop.f32.mrb[32].mxu0 }
0x1b66   :  { %v10998_v28 = vadd.f32 %v9477_v25, %v8855_v13  ;;  %v4246_v2 = vpop.f32.mrb[33].mxu0 }
0x1b67   :  { %v11000_v58 = vadd.f32 %v8855_v13, %v4246_v2 }
0x1b69   :  { %9479 = vmatpush3.xpose.msk.msra.mxu1 %vm284_vm2, %v11000_v58 }
0x1b6a   :  { %9483 = vmatprep.subr.mxu1 %v10376_v8 }
0x1bf6   :  { %v9466_v48 = vpop.f32.mrb[44].mxu1 }
0x1bf7   :  { %v4156_v12 = vpop.f32.mrb[45].mxu1  ;;  %v11013_v30 = vadd.f32 %v9466_v48, %v8852_v59 }
0x1bf8   :  { %v11005_v29 = vadd.f32 %v8852_v59, %v4156_v12 }
0x1bfa   :  { %9481 = vmatmul.mubr.msk.f32.vlgmr.msra.gmra.mrb[46].mxu1 %vm284_vm2, %v11005_v29 }
0x1bfb   :  { %9484 = vmatpush3.xpose.msk.msra.mxu1 %vm284_vm2, %v10998_v28  ;;  %9485 = vmatprep.mubr.msk.f32.mxu1 %vm10377_vm1, %v10376_v8 }
0x1bfc   :  { %9493 = vmatprep.subr.mxu1 %v10376_v8 }
0x1bfe   :  { %9486 = vmatmul.mubr.msk.f32.vlgmr.msra.gmra.mrb[48].mxu1 %vm284_vm2, %v11013_v30 }
0x1bff   :  { %9495 = vmatprep.mubr.msk.f32.mxu1 %vm10377_vm1, %v10376_v8 }
0x1ccd   :  { %v4337_v31 = vpop.f32.mrb[46].mxu1 }
0x1cce   :  { %v4417_v32 = vmul.f32 0.35355338, %v4337_v31  ;;  %v9482_v26 = vpop.f32.mrb[47].mxu1 }
0x1cd0   :  { %v4419_v39 = vsel %vm10544_vm8, %v4417_v32, -1e+30 }
0x1cd1   :  { %v4413_v27 = vpop.f32.mrb[48].mxu1  ;;  %v4421_v7 = vsel %vm284_vm2, %v4419_v39, -inf }
0x1cd2   :  { %v4418_v33 = vmul.f32 0.35355338, %v4413_v27  ;;  %4422 = vmax.xlane.f32.xlu1 %v4421_v7  ;;  %v9487_v41 = vpop.f32.mrb[49].mxu1 }
0x1cd4   :  { %v4420_v42 = vsel %vm10552_vm9, %v4418_v33, -1e+30 }
0x1cd5   :  { %v4424_v47 = vsel %vm284_vm2, %v4420_v42, -inf }
0x1cd6   :  { %4425 = vmax.xlane.f32.xlu0 %v4424_v47 }
0x1d5f   :  { %v4423_v49 = vpop.xlane.xlu1 %4422 }
0x1d60   :  { %v4427_v50 = vsub.f32 %v4419_v39, %v4423_v49 }
0x1d62   :  { %v4429_v17 = vmul.f32 1.442695, %v4427_v50 }
0x1d63   :  { %v4426_v51 = vpop.xlane.xlu0 %4425 }
0x1d64   :  { %10108 = vpow2.f32 %v4429_v17  ;;  %v4428_v34 = vsub.f32 %v4420_v42, %v4426_v51 }
0x1d66   :  { %v4431_v43 = vmul.f32 1.442695, %v4428_v34 }
0x1d68   :  { %10110 = vpow2.f32 %v4431_v43 }
0x1d6e   :  { %v10109_v36 = vpop.eup %10108 }
0x1d6f   :  { %v4433_v44 = vsel %vm284_vm2, %v10109_v36, 0.0 }
0x1d70   :  { %4434 = vadd.xlane.f32.xlu1 %v4433_v44 }
0x1d72   :  { %v10111_v53 = vpop.eup %10110 }
0x1d73   :  { %v4436_v54 = vsel %vm284_vm2, %v10111_v53, 0.0 }
0x1d74   :  { %4437 = vadd.xlane.f32.xlu0 %v4436_v54 }
0x1d81   :  { %4443 = vrot.lane.b32.xlu1 %v11000_v58, %s10378_s21 }
0x1d85   :  { %4680 = vrot.lane.b32.xlu1 %v11000_v58, %s10383_s22 }
0x1d89   :  { %4678 = vrot.lane.b32.xlu1 %v11005_v29, %s10383_s22 }
0x1d8a   :  { %4519 = vrot.lane.b32.xlu0 %v10998_v28, %s10378_s21 }
0x1d8d   :  { %4756 = vrot.lane.b32.xlu1 %v11013_v30, %s10383_s22 }
0x1d8e   :  { %4758 = vrot.lane.b32.xlu0 %v10998_v28, %s10383_s22 }
0x1d91   :  { %5097 = vrot.lane.b32.xlu1 %v11000_v58, %s10385_s25 }
0x1dfd   :  { %v4435_v52 = vpop.xlane.xlu1 %4434 }
0x1dfe   :  { %10112 = vrcp.f32 %v4435_v52 }
0x1e01   :  { %v4444_v60 = vpop.permute.xlu1 %4443  ;;  %v4438_v61 = vpop.xlane.xlu0 %4437 }
0x1e02   :  { %10114 = vrcp.f32 %v4438_v61  ;;  %9489 = vmatpush3.msra.mxu0 %v4444_v60 }
0x1e03   :  { %9498 = vmatprep.subr.mxu0 %v4255_v55 }
0x1e05   :  { %v4520_v1 = vpop.permute.xlu0 %4519  ;;  %v4681_v11 = vpop.permute.xlu1 %4680 }
0x1e06   :  { %9494 = vmatpush3.msra.mxu1 %v4520_v1 }
0x1e07   :  { %9503 = vmatprep.subr.mxu1 %v10376_v8 }
0x1e08   :  { %v10113_v3 = vpop.eup %10112 }
0x1e09   :  { %v4440_v6 = vmul.f32 %v10113_v3, %v10109_v36  ;;  %v4679_v15 = vpop.permute.xlu1 %4678  ;;  %v4759_v10 = vpop.permute.xlu0 %4758 }
0x1e0b   :  { %9491 = vmatmul.mubr.msk.f32.vlgmr.msra.gmra.mrb[34].mxu0 %vm284_vm2, %v4440_v6 }
0x1e0c   :  { %v10115_v9 = vpop.eup %10114  ;;  %9499 = vmatpush3.msra.mxu0 %v4255_v55 }
0x1e0d   :  { %v4442_v35 = vmul.f32 %v10115_v9, %v10111_v53  ;;  %9508 = vmatprep.subr.mxu0 %v10376_v8  ;;  %v4757_v14 = vpop.permute.xlu1 %4756 }
0x1e0f   :  { %9496 = vmatmul.mubr.msk.f32.vlgmr.msra.gmra.mrb[50].mxu1 %vm284_vm2, %v4442_v35 }
0x1e10   :  { %9504 = vmatpush3.xpose.msk.msra.mxu1 %vm284_vm2, %v4681_v11  ;;  %9505 = vmatprep.mubr.msk.f32.mxu1 %vm10377_vm1, %v10376_v8 }
0x1e11   :  { %9513 = vmatprep.subr.mxu1 %v10376_v8  ;;  %v5098_v41 = vpop.permute.xlu1 %5097 }
0x1e13   :  { %9506 = vmatmul.mubr.msk.f32.vlgmr.msra.gmra.mrb[52].mxu1 %vm284_vm2, %v4679_v15 }
0x1e14   :  { %9515 = vmatprep.mubr.msk.f32.mxu1 %vm10377_vm1, %v10376_v8 }
0x1ede   :  { %v4515_v16 = vpop.f32.mrb[34].mxu0 }
0x1edf   :  { %v9492_v18 = vpop.f32.mrb[35].mxu0  ;;  %9500 = vmatprep.mubr.msk.f32.mxu0 %vm284_vm2, %v4515_v16 }
0x1ee2   :  { %v4591_v4 = vpop.f32.mrb[50].mxu1 }
0x1ee3   :  { %v9497_v46 = vpop.f32.mrb[51].mxu1  ;;  %9501 = vmatmul.mubr.msk.f32.vlgmr.msra.gmra.mrb[36].mxu0 %vm284_vm2, %v4591_v4 }
0x1ee4   :  { %9509 = vmatpush3.xpose.msk.msra.mxu0 %vm284_vm2, %v4759_v10  ;;  %9510 = vmatprep.mubr.msk.f32.mxu0 %vm10377_vm1, %v10376_v8  ;;  %v4256_v46 = vld [vmem:[#allocation8 + $0xc0] sm:$0xff] }
0x1ee5   :  { %9518 = vmatprep.subr.mxu0 %v10376_v8 }
0x1ee6   :  { %v4752_v19 = vpop.f32.mrb[52].mxu1 }
0x1ee7   :  { %v4834_v20 = vmul.f32 0.35355338, %v4752_v19  ;;  %v9507_v22 = vpop.f32.mrb[53].mxu1  ;;  %9511 = vmatmul.mubr.msk.f32.vlgmr.msra.gmra.mrb[38].mxu0 %vm284_vm2, %v4757_v14 }
0x1ee8   :  { %9520 = vmatprep.mubr.msk.f32.mxu0 %vm10377_vm1, %v10376_v8 }
0x1ee9   :  { %v4836_v13 = vsel %vm10544_vm8, %v4834_v20, -1e+30 }
0x1eea   :  { %v4838_v25 = vsel %vm284_vm2, %v4836_v13, -inf }
0x1eeb   :  { %4839 = vmax.xlane.f32.xlu0 %v4838_v25 }
0x1f01   :  { %4860 = vrot.lane.b32.xlu0 %v11000_v58, %s10382_s2 }
0x1f05   :  { %5095 = vrot.lane.b32.xlu0 %v11005_v29, %s10385_s25 }
0x1f09   :  { %5173 = vrot.lane.b32.xlu0 %v11013_v30, %s10385_s25 }
0x1f78   :  { %v4840_v2 = vpop.xlane.xlu0 %4839 }
0x1f79   :  { %v4844_v59 = vsub.f32 %v4836_v13, %v4840_v2 }
0x1f7b   :  { %v4846_v48 = vmul.f32 1.442695, %v4844_v59 }
0x1f7c   :  { %v4861_v12 = vpop.permute.xlu0 %4860 }
0x1f7d   :  { %10116 = vpow2.f32 %v4846_v48  ;;  %9514 = vmatpush3.msra.mxu1 %v4861_v12 }
0x1f7e   :  { %9528 = vmatprep.subr.mxu1 %v10376_v8 }
0x1f80   :  { %v5096_v50 = vpop.permute.xlu0 %5095 }
0x1f84   :  { %v5174_v51 = vpop.permute.xlu0 %5173 }
0x1f87   :  { %v10117_v31 = vpop.eup %10116 }
0x1f88   :  { %v4850_v32 = vsel %vm284_vm2, %v10117_v31, 0.0 }
0x1f89   :  { %4851 = vadd.xlane.f32.xlu1 %v4850_v32 }
0x1f9a   :  { %5175 = vrot.lane.b32.xlu1 %v10998_v28, %s10385_s25 }
0x1fba   :  { %v4830_v26 = vpop.f32.mrb[38].mxu0 }
0x1fbb   :  { %v4835_v39 = vmul.f32 0.35355338, %v4830_v26  ;;  %v9512_v27 = vpop.f32.mrb[39].mxu0 }
0x1fbc   :  { %v4257_v27 = vld [vmem:[#allocation8 + $0x140] sm:$0xff] }
0x1fbd   :  { %v4837_v7 = vsel %vm10552_vm9, %v4835_v39, -1e+30 }
0x1fbe   :  { %v4841_v33 = vsel %vm284_vm2, %v4837_v7, -inf }
0x1fbf   :  { %4842 = vmax.xlane.f32.xlu1 %v4841_v33 }
0x2016   :  { %v4852_v42 = vpop.xlane.xlu1 %4851 }
0x2017   :  { %10118 = vrcp.f32 %v4852_v42 }
0x201a   :  { %v5176_v17 = vpop.permute.xlu1 %5175 }
0x2021   :  { %v10119_v47 = vpop.eup %10118 }
0x2022   :  { %v4857_v49 = vmul.f32 %v10119_v47, %v10117_v31 }
0x2024   :  { %9516 = vmatmul.mubr.msk.f32.vlgmr.msra.gmra.mrb[54].mxu1 %vm284_vm2, %v4857_v49 }
0x2025   :  { %9529 = vmatpush3.xpose.msk.msra.mxu1 %vm284_vm2, %v5098_v41  ;;  %9530 = vmatprep.mubr.msk.f32.mxu1 %vm10377_vm1, %v10376_v8 }
0x2026   :  { %9533 = vmatprep.subr.mxu1 %v10376_v8 }
0x2028   :  { %9531 = vmatmul.mubr.msk.f32.vlgmr.msra.gmra.mrb[56].mxu1 %vm284_vm2, %v5096_v50 }
0x2029   :  { %9534 = vmatpush3.xpose.msk.msra.mxu1 %vm284_vm2, %v5176_v17  ;;  %9535 = vmatprep.mubr.msk.f32.mxu1 %vm10377_vm1, %v10376_v8 }
0x202a   :  { %9543 = vmatprep.subr.mxu1 %v10376_v8 }
0x202c   :  { %9536 = vmatmul.mubr.msk.f32.vlgmr.msra.gmra.mrb[58].mxu1 %vm284_vm2, %v5174_v51 }
0x202d   :  { %9545 = vmatprep.mubr.msk.f32.mxu1 %vm10377_vm1, %v10376_v8 }
0x204c   :  { %v4843_v34 = vpop.xlane.xlu1 %4842 }
0x204d   :  { %v4845_v43 = vsub.f32 %v4837_v7, %v4843_v34 }
0x204f   :  { %v4848_v36 = vmul.f32 1.442695, %v4845_v43 }
0x2051   :  { %10120 = vpow2.f32 %v4848_v36 }
0x205b   :  { %v10121_v44 = vpop.eup %10120 }
0x205c   :  { %v4853_v53 = vsel %vm284_vm2, %v10121_v44, 0.0 }
0x205d   :  { %4854 = vadd.xlane.f32.xlu0 %v4853_v53 }
0x2073   :  { %4936 = vrot.lane.b32.xlu0 %v10998_v28, %s10382_s2 }
0x2077   :  { %5353 = vrot.lane.b32.xlu0 %v10998_v28, %s10386_s26 }
0x207b   :  { %5514 = vrot.lane.b32.xlu0 %v11000_v58, %s10389_s29 }
0x207f   :  { %5592 = vrot.lane.b32.xlu0 %v10998_v28, %s10389_s29 }
0x2083   :  { %5512 = vrot.lane.b32.xlu0 %v11005_v29, %s10389_s29 }
0x20ea   :  { %v4855_v54 = vpop.xlane.xlu0 %4854 }
0x20eb   :  { %10122 = vrcp.f32 %v4855_v54 }
0x20ee   :  { %v4937_v52 = vpop.permute.xlu0 %4936 }
0x20ef   :  { %9519 = vmatpush3.msra.mxu0 %v4937_v52 }
0x20f0   :  { %9523 = vmatprep.subr.mxu0 %v4256_v46 }
0x20f2   :  { %v5354_v55 = vpop.permute.xlu0 %5353 }
0x20f3   :  { %9544 = vmatpush3.msra.mxu1 %v5354_v55 }
0x20f4   :  { %9553 = vmatprep.subr.mxu1 %v10376_v8 }
0x20f5   :  { %v10123_v60 = vpop.eup %10122 }
0x20f6   :  { %v4859_v61 = vmul.f32 %v10123_v60, %v10121_v44  ;;  %v5515_v33 = vpop.permute.xlu0 %5514 }
0x20f7   :  { %v4932_v1 = vpop.f32.mrb[54].mxu1 }
0x20f8   :  { %v9517_v3 = vpop.f32.mrb[55].mxu1  ;;  %9521 = vmatmul.mubr.msk.f32.vlgmr.msra.gmra.mrb[40].mxu0 %vm284_vm2, %v4859_v61 }
0x20f9   :  { %9525 = vmatprep.mubr.msk.f32.mxu0 %vm284_vm2, %v4932_v1  ;;  %9524 = vmatpush3.msra.mxu0 %v4256_v46 }
0x20fa   :  { %9538 = vmatprep.subr.mxu0 %v10376_v8  ;;  %v5593_v47 = vpop.permute.xlu0 %5592 }
0x20fb   :  { %v5169_v6 = vpop.f32.mrb[56].mxu1 }
0x20fc   :  { %v5251_v9 = vmul.f32 0.35355338, %v5169_v6  ;;  %v9532_v11 = vpop.f32.mrb[57].mxu1 }
0x20fe   :  { %v5253_v29 = vsel %vm10544_vm8, %v5251_v9, -1e+30  ;;  %v5513_v50 = vpop.permute.xlu0 %5512 }
0x20ff   :  { %v5247_v35 = vpop.f32.mrb[58].mxu1  ;;  %v5255_v15 = vsel %vm284_vm2, %v5253_v29, -inf }
0x2100   :  { %v5252_v16 = vmul.f32 0.35355338, %v5247_v35  ;;  %5256 = vmax.xlane.f32.xlu1 %v5255_v15  ;;  %v9537_v18 = vpop.f32.mrb[59].mxu1 }
0x2102   :  { %v5254_v4 = vsel %vm10552_vm9, %v5252_v16, -1e+30 }
0x2103   :  { %v5258_v10 = vsel %vm284_vm2, %v5254_v4, -inf }
0x2104   :  { %5259 = vmax.xlane.f32.xlu1 %v5258_v10 }
0x218d   :  { %v5257_v14 = vpop.xlane.xlu1 %5256 }
0x218e   :  { %v5261_v19 = vsub.f32 %v5253_v29, %v5257_v14 }
0x2190   :  { %v5263_v20 = vmul.f32 1.442695, %v5261_v19 }
0x2191   :  { %v5260_v22 = vpop.xlane.xlu1 %5259 }
0x2192   :  { %10124 = vpow2.f32 %v5263_v20  ;;  %v5262_v13 = vsub.f32 %v5254_v4, %v5260_v22  ;;  %v4258_v20 = vld [vmem:[#allocation8 + $0x1c0] sm:$0xff] }
0x2194   :  { %v5265_v25 = vmul.f32 1.442695, %v5262_v13 }
0x2196   :  { %10126 = vpow2.f32 %v5265_v25 }
0x219c   :  { %v10125_v2 = vpop.eup %10124 }
0x219d   :  { %v5267_v59 = vsel %vm284_vm2, %v10125_v2, 0.0 }
0x219e   :  { %5268 = vadd.xlane.f32.xlu1 %v5267_v59 }
0x21a0   :  { %v10127_v48 = vpop.eup %10126 }
0x21a1   :  { %v5270_v12 = vsel %vm284_vm2, %v10127_v48, 0.0 }
0x21a2   :  { %5271 = vadd.xlane.f32.xlu1 %v5270_v12 }
0x21b3   :  { %5277 = vrot.lane.b32.xlu1 %v11000_v58, %s10386_s26 }
0x21b7   :  { %5590 = vrot.lane.b32.xlu1 %v11013_v30, %s10389_s29 }
0x21cb   :  { %v5008_v31 = vpop.f32.mrb[40].mxu0 }
0x21cc   :  { %v9522_v32 = vpop.f32.mrb[41].mxu0  ;;  %9526 = vmatmul.mubr.msk.f32.vlgmr.msra.gmra.mrb[36].mxu0 %vm284_vm2, %v5008_v31 }
0x21cd   :  { %9540 = vmatprep.mubr.msk.f32.mxu0 %vm10377_vm1, %v10376_v8 }
0x222b   :  { %v5269_v26 = vpop.xlane.xlu1 %5268 }
0x222c   :  { %10128 = vrcp.f32 %v5269_v26 }
0x222f   :  { %v5272_v39 = vpop.xlane.xlu1 %5271 }
0x2230   :  { %10130 = vrcp.f32 %v5272_v39 }
0x2233   :  { %v5278_v7 = vpop.permute.xlu1 %5277 }
0x2234   :  { %9539 = vmatpush3.msra.mxu0 %v5278_v7 }
0x2235   :  { %9548 = vmatprep.subr.mxu0 %v4257_v27 }
0x2236   :  { %v10129_v41 = vpop.eup %10128 }
0x2237   :  { %v5274_v42 = vmul.f32 %v10129_v41, %v10125_v2  ;;  %v5591_v36 = vpop.permute.xlu1 %5590 }
0x2239   :  { %9541 = vmatmul.mubr.msk.f32.vlgmr.msra.gmra.mrb[42].mxu0 %vm284_vm2, %v5274_v42  ;;  %v10269_v42 = vld [vmem:[#allocation2] sm:$0xff] }
0x223a   :  { %v10131_v30 = vpop.eup %10130  ;;  %9549 = vmatpush3.msra.mxu0 %v4257_v27 }
0x223b   :  { %v5276_v49 = vmul.f32 %v10131_v30, %v10127_v48  ;;  %9558 = vmatprep.subr.mxu0 %v10376_v8 }
0x223d   :  { %9546 = vmatmul.mubr.msk.f32.vlgmr.msra.gmra.mrb[60].mxu1 %vm284_vm2, %v5276_v49 }
0x223e   :  { %9554 = vmatpush3.xpose.msk.msra.mxu1 %vm284_vm2, %v5515_v33  ;;  %9555 = vmatprep.mubr.msk.f32.mxu1 %vm10377_vm1, %v10376_v8  ;;  %v10268_v33 = vld [vmem:[#allocation2 + $0x8] sm:$0xff] }
0x223f   :  { %9563 = vmatprep.subr.mxu1 %v10376_v8 }
0x2241   :  { %9556 = vmatmul.mubr.msk.f32.vlgmr.msra.gmra.mrb[62].mxu1 %vm284_vm2, %v5513_v50 }
0x2242   :  { %9565 = vmatprep.mubr.msk.f32.mxu1 %vm10377_vm1, %v10376_v8 }
0x230c   :  { %v5349_v17 = vpop.f32.mrb[42].mxu0 }
0x230d   :  { %v9542_v51 = vpop.f32.mrb[43].mxu0  ;;  %9550 = vmatprep.mubr.msk.f32.mxu0 %vm284_vm2, %v5349_v17 }
0x2310   :  { %v5425_v34 = vpop.f32.mrb[60].mxu1 }
0x2311   :  { %v9547_v43 = vpop.f32.mrb[61].mxu1  ;;  %9551 = vmatmul.mubr.msk.f32.vlgmr.msra.gmra.mrb[36].mxu0 %vm284_vm2, %v5425_v34 }
0x2312   :  { %9559 = vmatpush3.xpose.msk.msra.mxu0 %vm284_vm2, %v5593_v47  ;;  %9560 = vmatprep.mubr.msk.f32.mxu0 %vm10377_vm1, %v10376_v8 }
0x2313   :  { %9568 = vmatprep.subr.mxu0 %v10376_v8 }
0x2314   :  { %v5586_v44 = vpop.f32.mrb[62].mxu1 }
0x2315   :  { %v5668_v53 = vmul.f32 0.35355338, %v5586_v44  ;;  %v9557_v54 = vpop.f32.mrb[63].mxu1  ;;  %9561 = vmatmul.mubr.msk.f32.vlgmr.msra.gmra.mrb[44].mxu0 %vm284_vm2, %v5591_v36 }
0x2316   :  { %9570 = vmatprep.mubr.msk.f32.mxu0 %vm10377_vm1, %v10376_v8  ;;  %v5973_v54 = vld [vmem:[#allocation8 + $0x48] sm:$0xff] }
0x2317   :  { %v5670_v52 = vsel %vm10544_vm8, %v5668_v53, -1e+30  ;;  %vm7083_vm8 = vcmp.gt.s32.totalorder %v10527_v24, 4 }
0x2318   :  { %v5672_v55 = vsel %vm284_vm2, %v5670_v52, -inf }
0x2319   :  { %5673 = vmax.xlane.f32.xlu0 %v5672_v55 }
0x23a6   :  { %v5674_v60 = vpop.xlane.xlu0 %5673 }
0x23a7   :  { %v5678_v61 = vsub.f32 %v5670_v52, %v5674_v60  ;;  %v5974_v52 = vld [vmem:[#allocation8 + $0xc8] sm:$0xff] }
0x23a8   :  { %v9846_v55 = vpack.c.bf16 %v5974_v52, %v5973_v54  ;;  %v5975_v60 = vld [vmem:[#allocation8 + $0x148] sm:$0xff] }
0x23a9   :  { %v5680_v1 = vmul.f32 1.442695, %v5678_v61  ;;  %v5976_v61 = vld [vmem:[#allocation8 + $0x1c8] sm:$0xff] }
0x23ab   :  { %10132 = vpow2.f32 %v5680_v1  ;;  %v9850_v1 = vpack.c.bf16 %v5976_v61, %v5975_v60 }
0x23b5   :  { %v10133_v3 = vpop.eup %10132 }
0x23b6   :  { %v5684_v6 = vsel %vm284_vm2, %v10133_v3, 0.0 }
0x23b7   :  { %5685 = vadd.xlane.f32.xlu0 %v5684_v6  ;;  %v6198_v6 = vld [vmem:[#allocation8 + $0xd8] sm:$0xff] }
0x23e8   :  { %v5664_v9 = vpop.f32.mrb[44].mxu0 }
0x23e9   :  { %v5669_v11 = vmul.f32 0.35355338, %v5664_v9  ;;  %v9562_v29 = vpop.f32.mrb[45].mxu0 }
0x23ea   :  { %v6066_v29 = vld [vmem:[#allocation8 + $0xd0] sm:$0xff] }
0x23eb   :  { %v5671_v35 = vsel %vm10552_vm9, %v5669_v11, -1e+30  ;;  %v6065_v11 = vld [vmem:[#allocation8 + $0x50] sm:$0xff]  ;;  %vm7219_vm9 = vcmp.gt.s32.totalorder %v10527_v24, 5 }
0x23ec   :  { %v5675_v38 = vsel %vm284_vm2, %v5671_v35, -inf }
0x23ed   :  { %5676 = vmax.xlane.f32.xlu1 %v5675_v38 }
0x23fe   :  { %5694 = vrot.lane.b32.xlu1 %v11000_v58, %s10388_s28 }
0x2444   :  { %v5686_v15 = vpop.xlane.xlu0 %5685 }
0x2445   :  { %10134 = vrcp.f32 %v5686_v15 }
0x244f   :  { %v10135_v18 = vpop.eup %10134 }
0x2450   :  { %v5691_v46 = vmul.f32 %v10135_v18, %v10133_v3  ;;  %v6197_v3 = vld [vmem:[#allocation8 + $0x58] sm:$0xff] }
0x2451   :  { %v9862_v9 = vpack.c.bf16 %v6198_v6, %v6197_v3 }
0x247a   :  { %v5677_v16 = vpop.xlane.xlu1 %5676 }
0x247b   :  { %v5679_v4 = vsub.f32 %v5671_v35, %v5677_v16  ;;  %v9854_v35 = vpack.c.bf16 %v6066_v29, %v6065_v11 }
0x247d   :  { %v5682_v10 = vmul.f32 1.442695, %v5679_v4 }
0x247e   :  { %v5695_v14 = vpop.permute.xlu1 %5694 }
0x247f   :  { %10136 = vpow2.f32 %v5682_v10  ;;  %9564 = vmatpush3.msra.mxu1 %v5695_v14  ;;  %v8891_v14 = vld [vmem:[#allocation10 + $0x11] ss:$0 sm:$0xff] }
0x2480   :  { %9566 = vmatmul.mubr.msk.f32.vlgmr.msra.gmra.mrb[64].mxu1 %vm284_vm2, %v5691_v46  ;;  %9847 = vmatprep.subr.bf16.mxu1 %v9846_v55 }
0x2481   :  { %9849 = vmatpush3.bf16.msra.mxu1 %v9846_v55 }
0x2482   :  { %9851 = vmatprep.subr.bf16.mxu1 %v9850_v1 }
0x2485   :  { %9853 = vmatpush3.bf16.msra.mxu1 %v9850_v1 }
0x2486   :  { %9863 = vmatprep.subr.bf16.mxu1 %v9862_v9 }
0x2489   :  { %v10137_v45 = vpop.eup %10136 }
0x248a   :  { %v5687_v19 = vsel %vm284_vm2, %v10137_v45, 0.0 }
0x248b   :  { %5688 = vadd.xlane.f32.xlu0 %v5687_v19 }
0x24a1   :  { %5770 = vrot.lane.b32.xlu0 %v10998_v28, %s10388_s28  ;;  %v8858_v28 = vld [vmem:[#allocation10 + $0x10] ss:$0 sm:$0xff] }
0x2518   :  { %v5689_v58 = vpop.xlane.xlu0 %5688 }
0x2519   :  { %10138 = vrcp.f32 %v5689_v58 }
0x251c   :  { %v5771_v22 = vpop.permute.xlu0 %5770 }
0x251d   :  { %9569 = vmatpush3.msra.mxu0 %v5771_v22 }
0x251e   :  { %9573 = vmatprep.subr.mxu0 %v4258_v20 }
0x2523   :  { %v10139_v13 = vpop.eup %10138 }
0x2524   :  { %v5693_v25 = vmul.f32 %v10139_v13, %v10137_v45 }
0x2526   :  { %9571 = vmatmul.mubr.msk.f32.vlgmr.msra.gmra.mrb[46].mxu0 %vm284_vm2, %v5693_v25  ;;  %v6199_v25 = vld [vmem:[#allocation8 + $0x158] sm:$0xff] }
0x2527   :  { %9574 = vmatpush3.msra.mxu0 %v4258_v20  ;;  %v8892_v20 = vld [vmem:[#allocation10 + $0x12] ss:$0 sm:$0xff] }
0x2528   :  { %9855 = vmatprep.subr.bf16.mxu0 %v9854_v35 }
0x2553   :  { %v5766_v2 = vpop.f32.mrb[64].mxu1 }
0x2554   :  { %v9567_v59 = vpop.f32.mrb[65].mxu1  ;;  %9575 = vmatprep.mubr.msk.f32.mxu0 %vm284_vm2, %v5766_v2  ;;  %v6200_v2 = vld [vmem:[#allocation8 + $0x1d8] sm:$0xff] }
0x25f9   :  { %v5842_v48 = vpop.f32.mrb[46].mxu0 }
0x25fa   :  { %v9572_v12 = vpop.f32.mrb[47].mxu0  ;;  %9576 = vmatmul.mubr.msk.f32.vlgmr.msra.gmra.mrb[36].mxu0 %vm284_vm2, %v5842_v48  ;;  %vm6539_vm2 = vcmp.gt.s32.totalorder %v10527_v24, 0 }
0x25fb   :  { %9857 = vmatpush3.bf16.msra.mxu0 %v9854_v35  ;;  %v9866_v12 = vpack.c.bf16 %v6200_v2, %v6199_v25 }
0x26cd   :  { %v9577_v31 = vpop.f32.mrb[36].mxu0 }
0x26ce   :  { %v9980_v32 = vadd.f32 %v9577_v31, %v8858_v28  ;;  %v5918_v26 = vpop.f32.mrb[37].mxu0  ;;  %v6068_v31 = vld [vmem:[#allocation8 + $0x1d0] sm:$0xff] }
0x26cf   :  { %v9981_v39 = vadd.f32 %v8858_v28, %v5918_v26  ;;  %v6067_v28 = vld [vmem:[#allocation8 + $0x150] sm:$0xff]  ;;  %v6201_v26 = vld [vmem:[#allocation8 + $0x60] sm:$0xff] }
0x26d0   :  { %v5930_v27 = vadd.f32 %v9980_v32, %v10927_v23  ;;  %v9858_v32 = vpack.c.bf16 %v6068_v31, %v6067_v28 }
0x26d1   :  { %v5929_v7 = vadd.f32 %v9981_v39, %v10930_v5  ;;  %v6202_v39 = vld [vmem:[#allocation8 + $0xe0] sm:$0xff] }
0x26d2   :  { %v5932_v41 = vadd.f32 %v10268_v33, %v5930_v27  ;;  %9859 = vmatprep.subr.bf16.mxu0 %v9858_v32  ;;  %v11180_v56 = vpack.c.bf16 %v6202_v39, %v6201_v26 }
0x26d3   :  { %v5931_v30 = vadd.f32 %v10269_v42, %v5929_v7  ;;  %9861 = vmatpush3.bf16.msra.mxu0 %v9858_v32 }
0x26d4   :  { %v5938_v47 = vsel %vm189_vm0, %v5932_v41, 0.0  ;;  %9870 = vmatprep.subr.bf16.mxu0 %v10393_v57 }
0x26d5   :  { %5939 = vadd.xlane.f32.xlu0 %v5938_v47  ;;  %v5935_v49 = vsel %vm189_vm0, %v5931_v30, 0.0  ;;  %v8901_v47 = vld [vmem:[#allocation10 + $0x17] ss:$0 sm:$0xff] }
0x26d6   :  { %5936 = vadd.xlane.f32.xlu1 %v5935_v49 }
0x2762   :  { %v5940_v50 = vpop.xlane.xlu0 %5939 }
0x2763   :  { %v5942_v17 = vmul.f32 0.03125, %v5940_v50  ;;  %v5937_v51 = vpop.xlane.xlu1 %5936 }
0x2764   :  { %v5941_v34 = vmul.f32 0.03125, %v5937_v51  ;;  %v11207_v51 = vld [vmem:[#allocation10 + $0x16] ss:$0 sm:$0xff] }
0x2765   :  { %v5944_v43 = vsub.f32 %v5932_v41, %v5942_v17 }
0x2766   :  { %v5943_v36 = vsub.f32 %v5931_v30, %v5941_v34 }
0x2767   :  { %v5946_v44 = vmul.f32 %v5944_v43, %v5944_v43 }
0x2768   :  { %v5945_v23 = vmul.f32 %v5943_v36, %v5943_v36 }
0x2769   :  { %v5950_v5 = vsel %vm189_vm0, %v5946_v44, 0.0 }
0x276a   :  { %5951 = vadd.xlane.f32.xlu0 %v5950_v5  ;;  %v5947_v53 = vsel %vm189_vm0, %v5945_v23, 0.0 }
0x276b   :  { %5948 = vadd.xlane.f32.xlu1 %v5947_v53 }
0x27f7   :  { %v5952_v38 = vpop.xlane.xlu0 %5951 }
0x27f8   :  { %v5954_v15 = vmul.f32 0.03125, %v5952_v38  ;;  %v5949_v16 = vpop.xlane.xlu1 %5948 }
0x27f9   :  { %v5953_v18 = vmul.f32 0.03125, %v5949_v16 }
0x27fa   :  { %v5956_v4 = vadd.f32 1e-05, %v5954_v15 }
0x27fb   :  { %v5955_v10 = vadd.f32 1e-05, %v5953_v18 }
0x27fc   :  { %10140 = vrsqrt.f32 %v5956_v4 }
0x27fd   :  { %10142 = vrsqrt.f32 %v5955_v10 }
0x2806   :  { %v10141_v46 = vpop.eup %10140 }
0x2807   :  { %v10143_v45 = vpop.eup %10142  ;;  %v5960_v19 = vmul.f32 %v10141_v46, %v5944_v43 }
0x2808   :  { %v5959_v58 = vmul.f32 %v10143_v45, %v5943_v36 }
0x2809   :  { %v5966_v22 = vmul.f32 %v8891_v14, %v5960_v19 }
0x280a   :  { %v5965_v13 = vmul.f32 %v8891_v14, %v5959_v58 }
0x280b   :  { %v11164_v48 = vadd.f32 %v8892_v20, %v5966_v22 }
0x280c   :  { %v11162_v59 = vadd.f32 %v8892_v20, %v5965_v13 }
0x280e   :  { %9586 = vmatprep.mubr.msk.f32.mxu1 %vm189_vm0, %v11162_v59 }
0x280f   :  { %9587 = vmatmul.mubr.msk.f32.vlgmr.msra.gmra.mrb[66].mxu1 %vm189_vm0, %v11164_v48 }
0x2810   :  { %9865 = vmatpush3.bf16.msra.mxu1 %v9862_v9  ;;  %9608 = vmatprep.mubr.msk.f32.mxu1 %vm189_vm0, %v6300_v62  ;;  %v6203_v62 = vld [vmem:[#allocation8 + $0x160] sm:$0xff] }
0x2811   :  { %9867 = vmatprep.subr.bf16.mxu1 %v9866_v12  ;;  %v11186_v40 = vpack.c.bf16 %v6204_v63, %v6203_v62 }
0x2814   :  { %9869 = vmatpush3.bf16.msra.mxu1 %v9866_v12 }
0x2815   :  { %9876 = vmatprep.subr.bf16.mxu1 %v10393_v57 }
0x2817   :  { %9609 = vmatmul.mubr.msk.f32.vlgmr.msra.gmra.mrb[68].mxu1 %vm189_vm0, %v6317_v0  ;;  %v8893_v0 = vld [vmem:[#allocation10 + $0x15] ss:$0 sm:$0xff] }
0x2818   :  { %9630 = vmatprep.mubr.msk.f32.mxu1 %vm10377_vm1, %v10376_v8  ;;  %9878 = vmatpush3.bf16.msra.mxu1 %v11180_v56 }
0x2819   :  { %9879 = vmatprep.subr.bf16.mxu1 %v10393_v57 }
0x281c   :  { %9881 = vmatpush3.bf16.msra.mxu1 %v11186_v40 }
0x281d   :  { %9888 = vmatprep.subr.bf16.mxu1 %v10393_v57 }
0x28e2   :  { %v9588_v27 = vpop.f32.mrb[66].mxu1 }
0x28e3   :  { %v6060_v7 = vadd.f32 %v9588_v27, %v8893_v0  ;;  %v6054_v33 = vpop.f32.mrb[67].mxu1 }
0x28e4   :  { %v6055_v41 = vadd.f32 %v8893_v0, %v6054_v33 }
0x28e5   :  { %v6064_v30 = vmax.f32 %v6060_v7, 0.0 }
0x28e6   :  { %v6063_v42 = vmax.f32 %v6055_v41, 0.0 }
0x28e8   :  { %9597 = vmatprep.mubr.msk.f32.mxu0 %vm189_vm0, %v6063_v42 }
0x28e9   :  { %9598 = vmatmul.mubr.msk.f32.vlgmr.msra.gmra.mrb[48].mxu0 %vm189_vm0, %v6064_v30 }
0x28ea   :  { %v9610_v49 = vpop.f32.mrb[68].mxu1  ;;  %9872 = vmatpush3.bf16.msra.mxu0 %v11180_v56  ;;  %9619 = vmatprep.mubr.msk.f32.mxu0 %vm10377_vm1, %v10376_v8 }
0x28eb   :  { %v11195_v50 = vadd.f32 %v9610_v49, %v8901_v47  ;;  %v6388_v17 = vpop.f32.mrb[69].mxu1  ;;  %9873 = vmatprep.subr.bf16.mxu0 %v10393_v57 }
0x28ec   :  { %v11214_v44 = vadd.f32 %v8901_v47, %v6388_v17 }
0x28ee   :  { %9875 = vmatpush3.bf16.msra.mxu0 %v11186_v40  ;;  %v6406_v23 = vrot.slane %v11214_v44, %v10952_v21 }
0x28ef   :  { %9882 = vmatprep.subr.bf16.mxu0 %v10393_v57 }
0x28f0   :  { %v6414_v19 = vcombine.high %v6406_v23, %v6406_v23 }
0x28f1   :  { %9620 = vmatmul.mubr.f32.vlgmr.msra.gmra.mrb[50].mxu0 %v10376_v8 }
0x28f2   :  { %9884 = vmatpush3.bf16.msra.mxu0 %v11180_v56  ;;  %9641 = vmatprep.mubr.msk.f32.mxu0 %vm10377_vm1, %v10376_v8 }
0x28f3   :  { %9885 = vmatprep.subr.bf16.mxu0 %v10393_v57 }
0x28f6   :  { %9887 = vmatpush3.bf16.msra.mxu0 %v11186_v40 }
0x28f7   :  { %9894 = vmatprep.subr.bf16.mxu0 %v10393_v57 }
0x29bc   :  { %v11209_v34 = vpop.f32.mrb[48].mxu0 }
0x29bd   :  { %v6146_v43 = vpop.f32.mrb[49].mxu0 }
0x29be   :  { %v11212_v36 = vadd.f32 %v11207_v51, %v6146_v43  ;;  %v6399_v43 = vcombine.high %v11214_v44, %v11214_v44 }
0x29c4   :  { %v6510_v5 = vpop.f32.mrb[50].mxu0 }
0x29c5   :  { %v6514_v53 = vadd.f32 %v6510_v5, %v6406_v23  ;;  %v9621_v54 = vpop.f32.mrb[51].mxu0  ;;  %v6413_v23 = vrot.slane %v6399_v43, %v10952_v21  ;;  %v6423_v43 = vrot.slane %v11195_v50, %v10952_v21 }
0x29c7   :  { %10144 = vtanh.f32 %v6514_v53  ;;  %v8904_v55 = vmul.f32 -1.442695, %v6514_v53 }
0x29c9   :  { %10146 = vpow2.f32 %v8904_v55 }
0x29d1   :  { %v10145_v52 = vpop.eup %10144 }
0x29d2   :  { %6524 = vrot.lane.b32.xlu1 %v10145_v52, %s10381_s4 }
0x29d3   :  { %v10147_v60 = vpop.eup %10146 }
0x29d4   :  { %v6518_v61 = vadd.f32 1.0, %v10147_v60 }
0x29d6   :  { %10148 = vrcp.f32 %v6518_v61 }
0x29e0   :  { %v10149_v1 = vpop.eup %10148 }
0x29e1   :  { %v6522_v9 = vmul.f32 0.0, %v10149_v1 }
0x2a44   :  { %v6525_v3 = vpop.permute.xlu1 %6524 }
0x2a45   :  { %v6527_v6 = vmul.f32 %v10149_v1, %v6525_v3 }
0x2a47   :  { %6529 = vrot.lane.b32.xlu0 %v6527_v6, %s10394_s9 }
0x2ab9   :  { %v6530_v11 = vpop.permute.xlu0 %6529 }
0x2aba   :  { %v6532_v29 = vadd.f32 %v6530_v11, %v6522_v9 }
0x2abc   :  { %10150 = vtanh.f32 %v6532_v29  ;;  %v6561_v35 = vrot.slane %v6532_v29, %v10952_v21 }
0x2abe   :  { %6562 = vrot.lane.b32.xlu0 %v6561_v35, %s10378_s21 }
0x2ac6   :  { %v10151_v38 = vpop.eup %10150 }
0x2ac7   :  { %6535 = vrot.lane.b32.xlu1 %v10151_v38, %s10381_s4 }
0x2b30   :  { %v6563_v15 = vpop.permute.xlu0 %6562 }
0x2b31   :  { %v6565_v16 = vsel %vm6539_vm2, %v6563_v15, 0.0 }
0x2b32   :  { %v6654_v18 = vrot.slane %v6565_v16, %v10952_v21 }
0x2b34   :  { %6655 = vrot.lane.b32.xlu0 %v6654_v18, %s10394_s9 }
0x2b39   :  { %v6536_v4 = vpop.permute.xlu1 %6535 }
0x2b3a   :  { %v6538_v10 = vmul.f32 %v10149_v1, %v6536_v4 }
0x2b3c   :  { %v6549_v46 = vrot.slane %v6538_v10, %v10952_v21 }
0x2b3e   :  { %6550 = vrot.lane.b32.xlu1 %v6549_v46, %s10394_s9 }
0x2ba6   :  { %v6656_v26 = vpop.permute.xlu0 %6655 }
0x2bb0   :  { %v6551_v14 = vpop.permute.xlu1 %6550 }
0x2bb1   :  { %v6553_v45 = vsel %vm6539_vm2, %v6551_v14, 0.0 }
0x2bb2   :  { %9631 = vmatmul.mubr.msk.f32.vlgmr.msra.gmra.mrb[70].mxu1 %vm189_vm0, %v6553_v45 }
0x2bb3   :  { %9890 = vmatpush3.bf16.msra.mxu1 %v11180_v56  ;;  %9652 = vmatprep.mubr.msk.f32.mxu1 %vm10377_vm1, %v10376_v8 }
0x2bb4   :  { %9891 = vmatprep.subr.bf16.mxu1 %v10393_v57 }
0x2bb7   :  { %9893 = vmatpush3.bf16.msra.mxu1 %v11186_v40 }
0x2bb8   :  { %9900 = vmatprep.subr.bf16.mxu1 %v10393_v57 }
0x2c85   :  { %v6635_v58 = vpop.f32.mrb[70].mxu1 }
0x2c86   :  { %v6639_v20 = vadd.f32 %v6635_v58, %v6414_v19  ;;  %v9632_v22 = vpop.f32.mrb[71].mxu1  ;;  %v6415_v19 = vcombine.high %v6413_v23, %v6413_v23 }
0x2c88   :  { %10152 = vtanh.f32 %v6639_v20  ;;  %v8906_v25 = vmul.f32 -1.442695, %v6639_v20 }
0x2c8a   :  { %10154 = vpow2.f32 %v8906_v25 }
0x2c92   :  { %v10153_v13 = vpop.eup %10152 }
0x2c93   :  { %6660 = vrot.lane.b32.xlu1 %v10153_v13, %s10381_s4 }
0x2c94   :  { %v10155_v2 = vpop.eup %10154 }
0x2c95   :  { %v6643_v12 = vadd.f32 1.0, %v10155_v2 }
0x2c97   :  { %10156 = vrcp.f32 %v6643_v12 }
0x2ca1   :  { %v10157_v28 = vpop.eup %10156 }
0x2ca2   :  { %v6658_v39 = vmul.f32 %v10157_v28, %v6656_v26 }
0x2d05   :  { %v6661_v31 = vpop.permute.xlu1 %6660 }
0x2d06   :  { %v6663_v32 = vmul.f32 %v10157_v28, %v6661_v31 }
0x2d08   :  { %6665 = vrot.lane.b32.xlu1 %v6663_v32, %s10394_s9 }
0x2d7a   :  { %v6666_v62 = vpop.permute.xlu1 %6665 }
0x2d7b   :  { %v6668_v63 = vadd.f32 %v6666_v62, %v6658_v39 }
0x2d7d   :  { %10158 = vtanh.f32 %v6668_v63  ;;  %v6697_v27 = vrot.slane %v6668_v63, %v10952_v21 }
0x2d87   :  { %v10159_v0 = vpop.eup %10158 }
0x2d88   :  { %6671 = vrot.lane.b32.xlu0 %v10159_v0, %s10381_s4 }
0x2d8c   :  { %6698 = vrot.lane.b32.xlu0 %v6697_v27, %s10378_s21 }
0x2dfa   :  { %v6672_v7 = vpop.permute.xlu0 %6671 }
0x2dfb   :  { %v6674_v33 = vmul.f32 %v10157_v28, %v6672_v7 }
0x2dfd   :  { %v6685_v41 = vrot.slane %v6674_v33, %v10952_v21 }
0x2dfe   :  { %v6699_v42 = vpop.permute.xlu0 %6698 }
0x2dff   :  { %v6701_v30 = vsel %vm6675_vm5, %v6699_v42, %v6565_v16  ;;  %6686 = vrot.lane.b32.xlu1 %v6685_v41, %s10394_s9 }
0x2e00   :  { %v6790_v47 = vrot.slane %v6701_v30, %v10952_v21 }
0x2e02   :  { %6791 = vrot.lane.b32.xlu0 %v6790_v47, %s10394_s9 }
0x2e71   :  { %v6687_v49 = vpop.permute.xlu1 %6686 }
0x2e72   :  { %v6689_v17 = vsel %vm6675_vm5, %v6687_v49, %v6553_v45 }
0x2e73   :  { %9642 = vmatmul.mubr.msk.f32.vlgmr.msra.gmra.mrb[52].mxu0 %vm189_vm0, %v6689_v17 }
0x2e74   :  { %9896 = vmatpush3.bf16.msra.mxu0 %v11180_v56  ;;  %9663 = vmatprep.mubr.msk.f32.mxu0 %vm10377_vm1, %v10376_v8  ;;  %v6792_v44 = vpop.permute.xlu0 %6791 }
0x2e75   :  { %9897 = vmatprep.subr.bf16.mxu0 %v10393_v57 }
0x2e78   :  { %9899 = vmatpush3.bf16.msra.mxu0 %v11186_v40 }
0x2e79   :  { %9906 = vmatprep.subr.bf16.mxu0 %v10393_v57 }
0x2f46   :  { %v6771_v5 = vpop.f32.mrb[52].mxu0 }
0x2f47   :  { %v6775_v53 = vadd.f32 %v6771_v5, %v6413_v23  ;;  %v9643_v54 = vpop.f32.mrb[53].mxu0 }
0x2f49   :  { %10160 = vtanh.f32 %v6775_v53  ;;  %v8908_v55 = vmul.f32 -1.442695, %v6775_v53 }
0x2f4b   :  { %10162 = vpow2.f32 %v8908_v55 }
0x2f53   :  { %v10161_v52 = vpop.eup %10160 }
0x2f54   :  { %6796 = vrot.lane.b32.xlu1 %v10161_v52, %s10381_s4 }
0x2f55   :  { %v10163_v60 = vpop.eup %10162 }
0x2f56   :  { %v6779_v61 = vadd.f32 1.0, %v10163_v60 }
0x2f58   :  { %10164 = vrcp.f32 %v6779_v61 }
0x2f62   :  { %v10165_v1 = vpop.eup %10164 }
0x2f63   :  { %v6794_v9 = vmul.f32 %v10165_v1, %v6792_v44 }
0x2fc6   :  { %v6797_v3 = vpop.permute.xlu1 %6796 }
0x2fc7   :  { %v6799_v6 = vmul.f32 %v10165_v1, %v6797_v3 }
0x2fc9   :  { %6801 = vrot.lane.b32.xlu1 %v6799_v6, %s10394_s9 }
0x303b   :  { %v6802_v11 = vpop.permute.xlu1 %6801 }
0x303c   :  { %v6804_v29 = vadd.f32 %v6802_v11, %v6794_v9 }
0x303e   :  { %10166 = vtanh.f32 %v6804_v29  ;;  %v6833_v38 = vrot.slane %v6804_v29, %v10952_v21 }
0x3048   :  { %v10167_v35 = vpop.eup %10166 }
0x3049   :  { %6807 = vrot.lane.b32.xlu0 %v10167_v35, %s10381_s4 }
0x304d   :  { %6834 = vrot.lane.b32.xlu0 %v6833_v38, %s10378_s21 }
0x30bb   :  { %v6808_v15 = vpop.permute.xlu0 %6807 }
0x30bc   :  { %v6810_v16 = vmul.f32 %v10165_v1, %v6808_v15 }
0x30be   :  { %v6821_v18 = vrot.slane %v6810_v16, %v10952_v21 }
0x30bf   :  { %v6835_v4 = vpop.permute.xlu0 %6834 }
0x30c0   :  { %v6837_v10 = vsel %vm6811_vm6, %v6835_v4, %v6701_v30  ;;  %6822 = vrot.lane.b32.xlu1 %v6821_v18, %s10394_s9 }
0x30c1   :  { %v6926_v46 = vrot.slane %v6837_v10, %v10952_v21 }
0x30c3   :  { %6927 = vrot.lane.b32.xlu0 %v6926_v46, %s10394_s9 }
0x3132   :  { %v6823_v14 = vpop.permute.xlu1 %6822 }
0x3133   :  { %v6825_v45 = vsel %vm6811_vm6, %v6823_v14, %v6689_v17 }
0x3134   :  { %9653 = vmatmul.mubr.msk.f32.vlgmr.msra.gmra.mrb[72].mxu1 %vm189_vm0, %v6825_v45 }
0x3135   :  { %9902 = vmatpush3.bf16.msra.mxu1 %v11180_v56  ;;  %9674 = vmatprep.mubr.msk.f32.mxu1 %vm10377_vm1, %v10376_v8  ;;  %v6928_v26 = vpop.permute.xlu0 %6927 }
0x3136   :  { %9903 = vmatprep.subr.bf16.mxu1 %v10393_v57 }
0x3139   :  { %9905 = vmatpush3.bf16.msra.mxu1 %v11186_v40 }
0x313a   :  { %9912 = vmatprep.subr.bf16.mxu1 %v10393_v57 }
0x3207   :  { %v6907_v58 = vpop.f32.mrb[72].mxu1 }
0x3208   :  { %v6911_v20 = vadd.f32 %v6907_v58, %v6415_v19  ;;  %v9654_v22 = vpop.f32.mrb[73].mxu1 }
0x320a   :  { %10168 = vtanh.f32 %v6911_v20  ;;  %v8910_v25 = vmul.f32 -1.442695, %v6911_v20 }
0x320c   :  { %10170 = vpow2.f32 %v8910_v25 }
0x3214   :  { %v10169_v13 = vpop.eup %10168 }
0x3215   :  { %6932 = vrot.lane.b32.xlu1 %v10169_v13, %s10381_s4 }
0x3216   :  { %v10171_v2 = vpop.eup %10170 }
0x3217   :  { %v6915_v12 = vadd.f32 1.0, %v10171_v2 }
0x3219   :  { %10172 = vrcp.f32 %v6915_v12 }
0x3223   :  { %v10173_v28 = vpop.eup %10172 }
0x3224   :  { %v6930_v39 = vmul.f32 %v10173_v28, %v6928_v26 }
0x3287   :  { %v6933_v31 = vpop.permute.xlu1 %6932 }
0x3288   :  { %v6935_v32 = vmul.f32 %v10173_v28, %v6933_v31 }
0x328a   :  { %6937 = vrot.lane.b32.xlu1 %v6935_v32, %s10394_s9 }
0x32fc   :  { %v6938_v62 = vpop.permute.xlu1 %6937 }
0x32fd   :  { %v6940_v63 = vadd.f32 %v6938_v62, %v6930_v39 }
0x32ff   :  { %10174 = vtanh.f32 %v6940_v63  ;;  %v6969_v27 = vrot.slane %v6940_v63, %v10952_v21 }
0x3309   :  { %v10175_v0 = vpop.eup %10174 }
0x330a   :  { %6943 = vrot.lane.b32.xlu0 %v10175_v0, %s10381_s4 }
0x330e   :  { %6970 = vrot.lane.b32.xlu0 %v6969_v27, %s10378_s21 }
0x337c   :  { %v6944_v7 = vpop.permute.xlu0 %6943 }
0x337d   :  { %v6946_v33 = vmul.f32 %v10173_v28, %v6944_v7 }
0x337f   :  { %v6957_v41 = vrot.slane %v6946_v33, %v10952_v21 }
0x3380   :  { %v6971_v42 = vpop.permute.xlu0 %6970 }
0x3381   :  { %v6973_v30 = vsel %vm6947_vm7, %v6971_v42, %v6837_v10  ;;  %6958 = vrot.lane.b32.xlu1 %v6957_v41, %s10394_s9 }
0x3382   :  { %v7062_v47 = vrot.slane %v6973_v30, %v10952_v21 }
0x3384   :  { %7063 = vrot.lane.b32.xlu0 %v7062_v47, %s10394_s9  ;;  %v6416_v47 = vcombine.high %v11195_v50, %v11195_v50 }
0x33f3   :  { %v6959_v49 = vpop.permute.xlu1 %6958 }
0x33f4   :  { %v6961_v17 = vsel %vm6947_vm7, %v6959_v49, %v6825_v45  ;;  %v6431_v45 = vcombine.high %v6423_v43, %v6423_v43  ;;  %v6430_v49 = vrot.slane %v6416_v47, %v10952_v21  ;;  %v7519_v47 = vld [vmem:[#allocation8 + $0xe8] sm:$0xff] }
0x33f5   :  { %9664 = vmatmul.mubr.msk.f32.vlgmr.msra.gmra.mrb[54].mxu0 %vm189_vm0, %v6961_v17 }
0x33f6   :  { %9908 = vmatpush3.bf16.msra.mxu0 %v11180_v56  ;;  %9685 = vmatprep.mubr.msk.f32.mxu0 %vm10377_vm1, %v10376_v8  ;;  %v7064_v6 = vpop.permute.xlu0 %7063 }
0x33f7   :  { %9909 = vmatprep.subr.bf16.mxu0 %v10393_v57 }
0x33fa   :  { %9911 = vmatpush3.bf16.msra.mxu0 %v11186_v40 }
0x34c8   :  { %v7043_v23 = vpop.f32.mrb[54].mxu0 }
0x34c9   :  { %v7047_v5 = vadd.f32 %v7043_v23, %v6423_v43  ;;  %v9665_v53 = vpop.f32.mrb[55].mxu0 }
0x34cb   :  { %10176 = vtanh.f32 %v7047_v5  ;;  %v8912_v52 = vmul.f32 -1.442695, %v7047_v5 }
0x34cd   :  { %10178 = vpow2.f32 %v8912_v52 }
0x34d5   :  { %v10177_v54 = vpop.eup %10176 }
0x34d6   :  { %7068 = vrot.lane.b32.xlu1 %v10177_v54, %s10381_s4 }
0x34d7   :  { %v10179_v55 = vpop.eup %10178 }
0x34d8   :  { %v7051_v60 = vadd.f32 1.0, %v10179_v55 }
0x34da   :  { %10180 = vrcp.f32 %v7051_v60 }
0x34e4   :  { %v10181_v61 = vpop.eup %10180 }
0x34e5   :  { %v7066_v44 = vmul.f32 %v10181_v61, %v7064_v6 }
0x3548   :  { %v7069_v1 = vpop.permute.xlu1 %7068 }
0x3549   :  { %v7071_v3 = vmul.f32 %v10181_v61, %v7069_v1 }
0x354b   :  { %7073 = vrot.lane.b32.xlu1 %v7071_v3, %s10394_s9 }
0x35bd   :  { %v7074_v9 = vpop.permute.xlu1 %7073 }
0x35be   :  { %v7076_v11 = vadd.f32 %v7074_v9, %v7066_v44 }
0x35c0   :  { %10182 = vtanh.f32 %v7076_v11  ;;  %v7105_v35 = vrot.slane %v7076_v11, %v10952_v21 }
0x35ca   :  { %v10183_v29 = vpop.eup %10182 }
0x35cb   :  { %7079 = vrot.lane.b32.xlu0 %v10183_v29, %s10381_s4 }
0x35cf   :  { %7106 = vrot.lane.b32.xlu0 %v7105_v35, %s10378_s21 }
0x363d   :  { %v7080_v38 = vpop.permute.xlu0 %7079 }
0x363e   :  { %v7082_v15 = vmul.f32 %v10181_v61, %v7080_v38 }
0x3640   :  { %v7093_v16 = vrot.slane %v7082_v15, %v10952_v21 }
0x3641   :  { %v7107_v18 = vpop.permute.xlu0 %7106 }
0x3642   :  { %v7109_v4 = vsel %vm7083_vm8, %v7107_v18, %v6973_v30  ;;  %7094 = vrot.lane.b32.xlu1 %v7093_v16, %s10394_s9  ;;  %v6152_v18 = vadd.f32 %v11209_v34, %v11207_v51 }
0x3643   :  { %v7198_v10 = vrot.slane %v7109_v4, %v10952_v21 }
0x3645   :  { %7199 = vrot.lane.b32.xlu0 %v7198_v10, %s10394_s9 }
0x36b4   :  { %v7095_v46 = vpop.permute.xlu1 %7094 }
0x36b5   :  { %v7097_v14 = vsel %vm7083_vm8, %v7095_v46, %v6961_v17 }
0x36b6   :  { %9675 = vmatmul.mubr.msk.f32.vlgmr.msra.gmra.mrb[74].mxu1 %vm189_vm0, %v7097_v14 }
0x36b7   :  { %9914 = vmatpush3.bf16.msra.mxu1 %v11180_v56  ;;  %9696 = vmatprep.mubr.msk.f32.mxu1 %vm10377_vm1, %v10376_v8 }
0x36b8   :  { %9915 = vmatprep.subr.bf16.mxu1 %v10393_v57 }
0x36bb   :  { %9917 = vmatpush3.bf16.msra.mxu1 %v11186_v40  ;;  %v7200_v40 = vpop.permute.xlu0 %7199 }
0x36bc   :  { %9926 = vmatprep.subr.bf16.mxu1 %v10393_v57 }
0x3789   :  { %v7179_v19 = vpop.f32.mrb[74].mxu1 }
0x378a   :  { %v7183_v58 = vadd.f32 %v7179_v19, %v6431_v45  ;;  %v9676_v20 = vpop.f32.mrb[75].mxu1  ;;  %v6432_v45 = vcombine.high %v6430_v49, %v6430_v49 }
0x378c   :  { %10184 = vtanh.f32 %v7183_v58  ;;  %v8914_v13 = vmul.f32 -1.442695, %v7183_v58 }
0x378e   :  { %10186 = vpow2.f32 %v8914_v13 }
0x3796   :  { %v10185_v22 = vpop.eup %10184 }
0x3797   :  { %7204 = vrot.lane.b32.xlu1 %v10185_v22, %s10381_s4 }
0x3798   :  { %v10187_v56 = vpop.eup %10186 }
0x3799   :  { %v7187_v25 = vadd.f32 1.0, %v10187_v56 }
0x379b   :  { %10188 = vrcp.f32 %v7187_v25 }
0x37a5   :  { %v10189_v2 = vpop.eup %10188 }
0x37a6   :  { %v7202_v31 = vmul.f32 %v10189_v2, %v7200_v40 }
0x3809   :  { %v7205_v12 = vpop.permute.xlu1 %7204 }
0x380a   :  { %v7207_v28 = vmul.f32 %v10189_v2, %v7205_v12 }
0x380c   :  { %7209 = vrot.lane.b32.xlu1 %v7207_v28, %s10394_s9 }
0x387e   :  { %v7210_v32 = vpop.permute.xlu1 %7209 }
0x387f   :  { %v7212_v26 = vadd.f32 %v7210_v32, %v7202_v31 }
0x3881   :  { %10190 = vtanh.f32 %v7212_v26  ;;  %v7241_v62 = vrot.slane %v7212_v26, %v10952_v21 }
0x388b   :  { %v10191_v39 = vpop.eup %10190 }
0x388c   :  { %7215 = vrot.lane.b32.xlu0 %v10191_v39, %s10381_s4 }
0x3890   :  { %7242 = vrot.lane.b32.xlu0 %v7241_v62, %s10378_s21 }
0x38fe   :  { %v7216_v63 = vpop.permute.xlu0 %7215 }
0x38ff   :  { %v7218_v0 = vmul.f32 %v10189_v2, %v7216_v63 }
0x3901   :  { %v7229_v27 = vrot.slane %v7218_v0, %v10952_v21 }
0x3902   :  { %v7243_v7 = vpop.permute.xlu0 %7242 }
0x3903   :  { %v7245_v33 = vsel %vm7219_vm9, %v7243_v7, %v7109_v4  ;;  %7230 = vrot.lane.b32.xlu1 %v7229_v27, %s10394_s9  ;;  %v6156_v4 = vadd.f32 %v6152_v18, %v11164_v48  ;;  %v6155_v48 = vadd.f32 %v11212_v36, %v11162_v59 }
0x3904   :  { %v7334_v41 = vrot.slane %v7245_v33, %v10952_v21 }
0x3905   :  { %v6162_v10 = vsel %vm189_vm0, %v6156_v4, 0.0  ;;  %v6159_v34 = vsel %vm189_vm0, %v6155_v48, 0.0 }
0x3906   :  { %7335 = vrot.lane.b32.xlu0 %v7334_v41, %s10394_s9 }
0x3975   :  { %v7231_v42 = vpop.permute.xlu1 %7230 }
0x3976   :  { %v7233_v30 = vsel %vm7219_vm9, %v7231_v42, %v7097_v14 }
0x3977   :  { %9686 = vmatmul.mubr.msk.f32.vlgmr.msra.gmra.mrb[56].mxu0 %vm189_vm0, %v7233_v30 }
0x3978   :  { %v7336_v50 = vpop.permute.xlu0 %7335 }
0x3a4a   :  { %v7315_v17 = vpop.f32.mrb[56].mxu0 }
0x3a4b   :  { %v7319_v43 = vadd.f32 %v7315_v17, %v6430_v49  ;;  %v9687_v23 = vpop.f32.mrb[57].mxu0  ;;  %v7520_v49 = vld [vmem:[#allocation8 + $0x168] sm:$0xff] }
0x3a4d   :  { %10192 = vtanh.f32 %v7319_v43  ;;  %v8916_v53 = vmul.f32 -1.442695, %v7319_v43  ;;  %v7521_v43 = vld [vmem:[#allocation8 + $0x1e8] sm:$0xff] }
0x3a4e   :  { %v9922_v23 = vpack.c.bf16 %v7521_v43, %v7520_v49 }
0x3a4f   :  { %10194 = vpow2.f32 %v8916_v53  ;;  %v7523_v53 = vld [vmem:[#allocation8 + $0xf0] sm:$0xff] }
0x3a57   :  { %v10193_v5 = vpop.eup %10192 }
0x3a58   :  { %7340 = vrot.lane.b32.xlu1 %v10193_v5, %s10381_s4  ;;  %v7522_v5 = vld [vmem:[#allocation8 + $0x70] sm:$0xff] }
0x3a59   :  { %v10195_v54 = vpop.eup %10194 }
0x3a5a   :  { %v7323_v52 = vadd.f32 1.0, %v10195_v54  ;;  %v7524_v54 = vld [vmem:[#allocation8 + $0x170] sm:$0xff] }
0x3a5c   :  { %10196 = vrcp.f32 %v7323_v52  ;;  %v11355_v52 = vpack.c.bf16 %v7523_v53, %v7522_v5 }
0x3a66   :  { %v10197_v55 = vpop.eup %10196 }
0x3a67   :  { %v7338_v1 = vmul.f32 %v10197_v55, %v7336_v50 }
0x3aca   :  { %v7341_v60 = vpop.permute.xlu1 %7340 }
0x3acb   :  { %v7343_v61 = vmul.f32 %v10197_v55, %v7341_v60 }
0x3acd   :  { %7345 = vrot.lane.b32.xlu1 %v7343_v61, %s10394_s9 }
0x3b3f   :  { %v7346_v3 = vpop.permute.xlu1 %7345 }
0x3b40   :  { %v7348_v6 = vadd.f32 %v7346_v3, %v7338_v1 }
0x3b42   :  { %10198 = vtanh.f32 %v7348_v6  ;;  %v7377_v9 = vrot.slane %v7348_v6, %v10952_v21 }
0x3b4c   :  { %v10199_v44 = vpop.eup %10198 }
0x3b4d   :  { %7351 = vrot.lane.b32.xlu0 %v10199_v44, %s10381_s4 }
0x3b51   :  { %7378 = vrot.lane.b32.xlu0 %v7377_v9, %s10378_s21 }
0x3bbf   :  { %v7352_v11 = vpop.permute.xlu0 %7351 }
0x3bc0   :  { %v7354_v29 = vmul.f32 %v10197_v55, %v7352_v11  ;;  %v7525_v55 = vld [vmem:[#allocation8 + $0x1f0] sm:$0xff] }
0x3bc1   :  { %v11358_v60 = vpack.c.bf16 %v7525_v55, %v7524_v54 }
0x3bc2   :  { %v7365_v35 = vrot.slane %v7354_v29, %v10952_v21 }
0x3bc3   :  { %v7379_v38 = vpop.permute.xlu0 %7378 }
0x3bc4   :  { %v11328_v15 = vsel %vm7355_vm10, %v7379_v38, %v7245_v33  ;;  %7366 = vrot.lane.b32.xlu1 %v7365_v35, %s10394_s9 }
0x3bc5   :  { %v7470_v16 = vrot.slane %v11328_v15, %v10952_v21 }
0x3bc7   :  { %7471 = vrot.lane.b32.xlu0 %v7470_v16, %s10394_s9 }
0x3be6   :  { %6163 = vadd.xlane.f32.xlu0 %v6162_v10  ;;  %v8899_v10 = vld [vmem:[#allocation10 + $0x13] ss:$0 sm:$0xff] }
0x3c36   :  { %v7367_v46 = vpop.permute.xlu1 %7366 }
0x3c37   :  { %v11338_v14 = vsel %vm7355_vm10, %v7367_v46, %v7233_v30  ;;  %v7518_v30 = vld [vmem:[#allocation8 + $0x68] sm:$0xff] }
0x3c38   :  { %9697 = vmatmul.mubr.msk.f32.vlgmr.msra.gmra.mrb[76].mxu1 %vm189_vm0, %v11338_v14  ;;  %v9918_v17 = vpack.c.bf16 %v7519_v47, %v7518_v30 }
0x3c39   :  { %9718 = vmatprep.mubr.msk.f32.mxu1 %vm10377_vm1, %v10376_v8  ;;  %v7472_v28 = vpop.permute.xlu0 %7471  ;;  %9928 = vmatpush3.bf16.msra.mxu1 %v11355_v52 }
0x3c3a   :  { %9919 = vmatprep.subr.bf16.mxu0 %v9918_v17  ;;  %9929 = vmatprep.subr.bf16.mxu1 %v10393_v57 }
0x3c3b   :  { %9921 = vmatpush3.bf16.msra.mxu0 %v9918_v17 }
0x3c3c   :  { %9923 = vmatprep.subr.bf16.mxu0 %v9922_v23 }
0x3c3d   :  { %9931 = vmatpush3.bf16.msra.mxu1 %v11358_v60 }
0x3c3e   :  { %9938 = vmatprep.subr.bf16.mxu1 %v10393_v57 }
0x3c3f   :  { %9925 = vmatpush3.bf16.msra.mxu0 %v9922_v23  ;;  %v8919_v23 = vld [vmem:[#allocation10 + $0x18] ss:$0 sm:$0xff] }
0x3c40   :  { %9932 = vmatprep.subr.bf16.mxu0 %v10393_v57 }
0x3c73   :  { %v6164_v40 = vpop.xlane.xlu0 %6163 }
0x3c74   :  { %v6166_v31 = vmul.f32 0.03125, %v6164_v40 }
0x3c76   :  { %v6168_v32 = vsub.f32 %v6156_v4, %v6166_v31 }
0x3c78   :  { %v6170_v26 = vmul.f32 %v6168_v32, %v6168_v32 }
0x3c7a   :  { %v6174_v59 = vsel %vm189_vm0, %v6170_v26, 0.0 }
0x3d0b   :  { %v7451_v19 = vpop.f32.mrb[76].mxu1 }
0x3d0c   :  { %v7455_v58 = vadd.f32 %v7451_v19, %v6432_v45  ;;  %v9698_v20 = vpop.f32.mrb[77].mxu1  ;;  %v8900_v45 = vld [vmem:[#allocation10 + $0x14] ss:$0 sm:$0xff] }
0x3d0e   :  { %10200 = vtanh.f32 %v7455_v58  ;;  %v8918_v22 = vmul.f32 -1.442695, %v7455_v58 }
0x3d10   :  { %10202 = vpow2.f32 %v8918_v22 }
0x3d18   :  { %v10201_v51 = vpop.eup %10200 }
0x3d19   :  { %7476 = vrot.lane.b32.xlu1 %v10201_v51, %s10381_s4 }
0x3d1a   :  { %v10203_v13 = vpop.eup %10202 }
0x3d1b   :  { %v7459_v56 = vadd.f32 1.0, %v10203_v13 }
0x3d1d   :  { %10204 = vrcp.f32 %v7459_v56 }
0x3d27   :  { %v10205_v25 = vpop.eup %10204 }
0x3d28   :  { %v7474_v36 = vmul.f32 %v10205_v25, %v7472_v28 }
0x3d3d   :  { %6160 = vadd.xlane.f32.xlu1 %v6159_v34 }
0x3d8b   :  { %v7477_v2 = vpop.permute.xlu1 %7476 }
0x3d8c   :  { %v7479_v12 = vmul.f32 %v10205_v25, %v7477_v2 }
0x3d8e   :  { %7481 = vrot.lane.b32.xlu0 %v7479_v12, %s10394_s9 }
0x3dad   :  { %6175 = vadd.xlane.f32.xlu0 %v6174_v59 }
0x3dca   :  { %v6161_v0 = vpop.xlane.xlu1 %6160 }
0x3dcb   :  { %v6165_v27 = vmul.f32 0.03125, %v6161_v0 }
0x3dcd   :  { %v6167_v7 = vsub.f32 %v6155_v48, %v6165_v27 }
0x3dcf   :  { %v6169_v33 = vmul.f32 %v6167_v7, %v6167_v7 }
0x3dd1   :  { %v6171_v41 = vsel %vm189_vm0, %v6169_v33, 0.0 }
0x3e00   :  { %v7482_v39 = vpop.permute.xlu0 %7481 }
0x3e01   :  { %v7484_v62 = vadd.f32 %v7482_v39, %v7474_v36 }
0x3e03   :  { %10206 = vtanh.f32 %v7484_v62  ;;  %v7513_v42 = vrot.slane %v7484_v62, %v10952_v21 }
0x3e0d   :  { %v10207_v63 = vpop.eup %10206 }
0x3e0e   :  { %7487 = vrot.lane.b32.xlu1 %v10207_v63, %s10381_s4 }
0x3e32   :  { %6172 = vadd.xlane.f32.xlu1 %v6171_v41 }
0x3e3a   :  { %v6176_v3 = vpop.xlane.xlu0 %6175 }
0x3e3b   :  { %v6178_v6 = vmul.f32 0.03125, %v6176_v3 }
0x3e3d   :  { %v6180_v44 = vadd.f32 1e-05, %v6178_v6 }
0x3e3f   :  { %10208 = vrsqrt.f32 %v6180_v44 }
0x3e43   :  { %7514 = vrot.lane.b32.xlu1 %v7513_v42, %s10378_s21 }
0x3e49   :  { %v10209_v38 = vpop.eup %10208 }
0x3e4a   :  { %v6184_v4 = vmul.f32 %v10209_v38, %v6168_v32 }
0x3e4c   :  { %v6190_v46 = vmul.f32 %v8899_v10, %v6184_v4 }
0x3e4e   :  { %v6196_v58 = vadd.f32 %v8900_v45, %v6190_v46 }
0x3e50   :  { %v7541_v48 = vcombine.high %v6196_v58, %v10376_v8 }
0x3e52   :  { %v7555_v56 = vrot.slane %v7541_v48, %v10952_v21 }
0x3e80   :  { %v7488_v61 = vpop.permute.xlu1 %7487 }
0x3e81   :  { %v7490_v50 = vmul.f32 %v10205_v25, %v7488_v61 }
0x3e83   :  { %v7501_v1 = vrot.slane %v7490_v50, %v10952_v21 }
0x3e85   :  { %7502 = vrot.lane.b32.xlu0 %v7501_v1, %s10394_s9 }
0x3ebf   :  { %v6173_v9 = vpop.xlane.xlu1 %6172 }
0x3ec0   :  { %v6177_v11 = vmul.f32 0.03125, %v6173_v9 }
0x3ec2   :  { %v6179_v29 = vadd.f32 1e-05, %v6177_v11 }
0x3ec3   :  { %v7515_v35 = vpop.permute.xlu1 %7514 }
0x3ec4   :  { %10210 = vrsqrt.f32 %v6179_v29  ;;  %v7517_v16 = vsel %vm7491_vm11, %v7515_v35, %v11328_v15  ;;  %v7548_v15 = vrot.slane %v6196_v58, %v10952_v21 }
0x3ec5   :  { %v7848_v18 = vrot.slane %v7517_v16, %v10952_v21 }
0x3ec7   :  { %7849 = vrot.lane.b32.xlu0 %v7848_v18, %s10394_s9 }
0x3ece   :  { %v10211_v19 = vpop.eup %10210 }
0x3ecf   :  { %v6183_v20 = vmul.f32 %v10211_v19, %v6167_v7 }
0x3ed1   :  { %v6189_v51 = vmul.f32 %v8899_v10, %v6183_v20 }
0x3ed3   :  { %v6195_v34 = vadd.f32 %v8900_v45, %v6189_v51 }
0x3ed5   :  { %v7526_v22 = vcombine.high %v6195_v34, %v10376_v8  ;;  %v7533_v13 = vrot.slane %v6195_v34, %v10952_v21 }
0x3ed7   :  { %v7540_v25 = vrot.slane %v7526_v22, %v10952_v21  ;;  %v7556_v2 = vcombine.low %v7533_v13, %v7548_v15  ;;  %v7557_v12 = vcombine.high %v7533_v13, %v7548_v15 }
0x3ed9   :  { %v7564_v28 = vrot.slane %v7556_v2, %v10960_v37  ;;  %v7571_v40 = vrot.slane %v7557_v12, %v10960_v37  ;;  %v7572_v31 = vcombine.low %v7540_v25, %v7555_v56  ;;  %v7573_v32 = vcombine.high %v7540_v25, %v7555_v56 }
0x3edb   :  { %v7588_v26 = vcombine.high %v7564_v28, %v10376_v8  ;;  %v7589_v59 = vcombine.high %v7571_v40, %v10376_v8  ;;  %v7580_v36 = vrot.slane %v7572_v31, %v10960_v37  ;;  %v7587_v39 = vrot.slane %v7573_v32, %v10960_v37 }
0x3edd   :  { %v7605_v62 = vcombine.low %v7564_v28, %v7588_v26  ;;  %v7606_v63 = vcombine.low %v7571_v40, %v7589_v59  ;;  %v7590_v0 = vcombine.high %v7580_v36, %v10376_v8  ;;  %v7591_v27 = vcombine.high %v7587_v39, %v10376_v8 }
0x3edf   :  { %v7613_v7 = vrot.slane %v7605_v62, %v10952_v21  ;;  %v7620_v33 = vrot.slane %v7606_v63, %v10952_v21  ;;  %v7622_v41 = vcombine.low %v7580_v36, %v7590_v0  ;;  %v7623_v42 = vcombine.low %v7587_v39, %v7591_v27 }
0x3ee1   :  { %v7621_v30 = vcombine.low %v7613_v7, %v7620_v33  ;;  %v7630_v47 = vrot.slane %v7622_v41, %v10952_v21  ;;  %v7637_v49 = vrot.slane %v7623_v42, %v10952_v21 }
0x3ee3   :  { %9707 = vmatprep.mubr.msk.f32.mxu0 %vm189_vm0, %v7621_v30  ;;  %v7638_v37 = vcombine.low %v7630_v47, %v7637_v49 }
0x3ee5   :  { %9708 = vmatmul.mubr.msk.f32.vlgmr.msra.gmra.mrb[58].mxu0 %vm189_vm0, %v7638_v37 }
0x3ee6   :  { %9934 = vmatpush3.bf16.msra.mxu0 %v11355_v52  ;;  %9729 = vmatprep.mubr.msk.f32.mxu0 %vm10377_vm1, %v10376_v8 }
0x3ee7   :  { %9935 = vmatprep.subr.bf16.mxu0 %v10393_v57 }
0x3eea   :  { %9937 = vmatpush3.bf16.msra.mxu0 %v11358_v60 }
0x3eeb   :  { %9944 = vmatprep.subr.bf16.mxu0 %v10393_v57 }
0x3ef7   :  { %v7503_v17 = vpop.permute.xlu0 %7502 }
0x3ef8   :  { %v7505_v43 = vsel %vm7491_vm11, %v7503_v17, %v11338_v14 }
0x3ef9   :  { %9719 = vmatmul.mubr.msk.f32.vlgmr.msra.gmra.mrb[78].mxu1 %vm189_vm0, %v7505_v43 }
0x3efa   :  { %9940 = vmatpush3.bf16.msra.mxu1 %v11355_v52  ;;  %9740 = vmatprep.mubr.msk.f32.mxu1 %vm10377_vm1, %v10376_v8 }
0x3efb   :  { %9941 = vmatprep.subr.bf16.mxu1 %v10393_v57 }
0x3efe   :  { %9943 = vmatpush3.bf16.msra.mxu1 %v11358_v60 }
0x3eff   :  { %9950 = vmatprep.subr.bf16.mxu1 %v10393_v57 }
0x3f39   :  { %v7850_v35 = vpop.permute.xlu0 %7849 }
0x3fb8   :  { %v9709_v5 = vpop.f32.mrb[58].mxu0 }
0x3fb9   :  { %v11407_v53 = vadd.f32 %v9709_v5, %v8919_v23  ;;  %v7709_v54 = vpop.f32.mrb[59].mxu0 }
0x3fba   :  { %v11409_v24 = vadd.f32 %v8919_v23, %v7709_v54 }
0x3fbc   :  { %v7727_v14 = vrot.slane %v11409_v24, %v10952_v21  ;;  %v7720_v39 = vcombine.high %v11409_v24, %v11409_v24 }
0x3fbe   :  { %v7735_v58 = vcombine.high %v7727_v14, %v7727_v14  ;;  %v7734_v62 = vrot.slane %v7720_v39, %v10952_v21 }
0x3fcc   :  { %v7829_v55 = vpop.f32.mrb[78].mxu1 }
0x3fcd   :  { %v7833_v61 = vadd.f32 %v7829_v55, %v7727_v14  ;;  %v9720_v50 = vpop.f32.mrb[79].mxu1  ;;  %v7736_v55 = vcombine.high %v7734_v62, %v7734_v62 }
0x3fcf   :  { %10212 = vtanh.f32 %v7833_v61  ;;  %v8923_v3 = vmul.f32 -1.442695, %v7833_v61 }
0x3fd1   :  { %10214 = vpow2.f32 %v8923_v3 }
0x3fd9   :  { %v10213_v1 = vpop.eup %10212 }
0x3fda   :  { %7854 = vrot.lane.b32.xlu1 %v10213_v1, %s10381_s4 }
0x3fdb   :  { %v10215_v6 = vpop.eup %10214 }
0x3fdc   :  { %v7837_v44 = vadd.f32 1.0, %v10215_v6 }
0x3fde   :  { %10216 = vrcp.f32 %v7837_v44 }
0x3fe8   :  { %v10217_v9 = vpop.eup %10216 }
0x3fe9   :  { %v7852_v38 = vmul.f32 %v10217_v9, %v7850_v35 }
0x404c   :  { %v7855_v11 = vpop.permute.xlu1 %7854 }
0x404d   :  { %v7857_v29 = vmul.f32 %v10217_v9, %v7855_v11 }
0x404f   :  { %7859 = vrot.lane.b32.xlu1 %v7857_v29, %s10394_s9 }
0x40c1   :  { %v7860_v16 = vpop.permute.xlu1 %7859 }
0x40c2   :  { %v7862_v18 = vadd.f32 %v7860_v16, %v7852_v38 }
0x40c4   :  { %10218 = vtanh.f32 %v7862_v18 }
0x40ce   :  { %v10219_v4 = vpop.eup %10218 }
0x40cf   :  { %7865 = vrot.lane.b32.xlu0 %v10219_v4, %s10381_s4 }
0x4141   :  { %v7866_v10 = vpop.permute.xlu0 %7865 }
0x4142   :  { %v11416_v46 = vmul.f32 %v10217_v9, %v7866_v10 }
0x4144   :  { %v7876_v45 = vrot.slane %v11416_v46, %v10952_v21 }
0x4146   :  { %7877 = vrot.lane.b32.xlu1 %v7876_v45, %s10394_s9 }
0x41b8   :  { %v7878_v19 = vpop.permute.xlu1 %7877 }
0x41b9   :  { %9730 = vmatmul.mubr.msk.f32.vlgmr.msra.gmra.mrb[60].mxu0 %vm189_vm0, %v7878_v19 }
0x41ba   :  { %9946 = vmatpush3.bf16.msra.mxu0 %v11355_v52  ;;  %9751 = vmatprep.mubr.msk.f32.mxu0 %vm10377_vm1, %v10376_v8 }
0x41bb   :  { %9947 = vmatprep.subr.bf16.mxu0 %v10393_v57 }
0x41be   :  { %9949 = vmatpush3.bf16.msra.mxu0 %v11358_v60 }
0x41bf   :  { %9956 = vmatprep.subr.bf16.mxu0 %v10393_v57 }
0x428c   :  { %v7947_v20 = vpop.f32.mrb[60].mxu0 }
0x428d   :  { %v7951_v51 = vadd.f32 %v7947_v20, %v7735_v58  ;;  %v9731_v48 = vpop.f32.mrb[61].mxu0 }
0x428f   :  { %10220 = vtanh.f32 %v7951_v51  ;;  %v8925_v22 = vmul.f32 -1.442695, %v7951_v51 }
0x4291   :  { %10222 = vpow2.f32 %v8925_v22 }
0x4299   :  { %v10221_v34 = vpop.eup %10220 }
0x429a   :  { %7961 = vrot.lane.b32.xlu0 %v10221_v34, %s10381_s4 }
0x429b   :  { %v10223_v13 = vpop.eup %10222 }
0x429c   :  { %v7955_v15 = vadd.f32 1.0, %v10223_v13 }
0x429e   :  { %10224 = vrcp.f32 %v7955_v15 }
0x42a8   :  { %v10225_v56 = vpop.eup %10224 }
0x42a9   :  { %v7959_v12 = vmul.f32 %v10225_v56, %v7862_v18 }
0x430c   :  { %v7962_v25 = vpop.permute.xlu0 %7961 }
0x430d   :  { %v7964_v2 = vmul.f32 %v10225_v56, %v7962_v25 }
0x430f   :  { %7966 = vrot.lane.b32.xlu1 %v7964_v2, %s10394_s9 }
0x4381   :  { %v7967_v28 = vpop.permute.xlu1 %7966 }
0x4382   :  { %v7969_v40 = vadd.f32 %v7967_v28, %v7959_v12 }
0x4384   :  { %10226 = vtanh.f32 %v7969_v40 }
0x438e   :  { %v10227_v31 = vpop.eup %10226 }
0x438f   :  { %7972 = vrot.lane.b32.xlu0 %v10227_v31, %s10381_s4 }
0x4401   :  { %v7973_v32 = vpop.permute.xlu0 %7972 }
0x4402   :  { %v11431_v26 = vmul.f32 %v10225_v56, %v7973_v32 }
0x4404   :  { %v7983_v59 = vrot.slane %v11431_v26, %v10952_v21  ;;  %v8521_v45 = vcombine.low %v11416_v46, %v11431_v26  ;;  %v7744_v46 = vrot.slane %v11407_v53, %v10952_v21 }
0x4406   :  { %7984 = vrot.lane.b32.xlu1 %v7983_v59, %s10394_s9  ;;  %v11464_v51 = vrot.slane %v8521_v45, %v10952_v21  ;;  %v8512_v45 = vld [vmem:[#allocation8 + $0xf8] sm:$0xff] }
0x4478   :  { %v7985_v36 = vpop.permute.xlu1 %7984 }
0x4479   :  { %9741 = vmatmul.mubr.msk.f32.vlgmr.msra.gmra.mrb[80].mxu1 %vm189_vm0, %v7985_v36 }
0x447a   :  { %9952 = vmatpush3.bf16.msra.mxu1 %v11355_v52  ;;  %9762 = vmatprep.mubr.msk.f32.mxu1 %vm10377_vm1, %v10376_v8 }
0x447b   :  { %9953 = vmatprep.subr.bf16.mxu1 %v10393_v57 }
0x447e   :  { %9955 = vmatpush3.bf16.msra.mxu1 %v11358_v60 }
0x447f   :  { %9962 = vmatprep.subr.bf16.mxu1 %v10393_v57 }
0x454c   :  { %v8054_v63 = vpop.f32.mrb[80].mxu1 }
0x454d   :  { %v8058_v0 = vadd.f32 %v8054_v63, %v7734_v62  ;;  %v9742_v27 = vpop.f32.mrb[81].mxu1  ;;  %v7752_v62 = vcombine.high %v7744_v46, %v7744_v46 }
0x454f   :  { %10228 = vtanh.f32 %v8058_v0  ;;  %v8927_v33 = vmul.f32 -1.442695, %v8058_v0 }
0x4551   :  { %10230 = vpow2.f32 %v8927_v33 }
0x4559   :  { %v10229_v7 = vpop.eup %10228 }
0x455a   :  { %8068 = vrot.lane.b32.xlu0 %v10229_v7, %s10381_s4 }
0x455b   :  { %v10231_v41 = vpop.eup %10230 }
0x455c   :  { %v8062_v42 = vadd.f32 1.0, %v10231_v41 }
0x455e   :  { %10232 = vrcp.f32 %v8062_v42 }
0x4568   :  { %v10233_v30 = vpop.eup %10232 }
0x4569   :  { %v8066_v37 = vmul.f32 %v10233_v30, %v7969_v40 }
0x45cc   :  { %v8069_v47 = vpop.permute.xlu0 %8068 }
0x45cd   :  { %v8071_v49 = vmul.f32 %v10233_v30, %v8069_v47 }
0x45cf   :  { %8073 = vrot.lane.b32.xlu1 %v8071_v49, %s10394_s9 }
0x4641   :  { %v8074_v17 = vpop.permute.xlu1 %8073 }
0x4642   :  { %v8076_v43 = vadd.f32 %v8074_v17, %v8066_v37 }
0x4644   :  { %10234 = vtanh.f32 %v8076_v43 }
0x464e   :  { %v10235_v23 = vpop.eup %10234 }
0x464f   :  { %8079 = vrot.lane.b32.xlu0 %v10235_v23, %s10381_s4 }
0x46c1   :  { %v8080_v5 = vpop.permute.xlu0 %8079 }
0x46c2   :  { %v8082_v54 = vmul.f32 %v10233_v30, %v8080_v5 }
0x46c4   :  { %v8090_v24 = vrot.slane %v8082_v54, %v10952_v21 }
0x46c6   :  { %8091 = vrot.lane.b32.xlu1 %v8090_v24, %s10394_s9 }
0x4738   :  { %v8092_v14 = vpop.permute.xlu1 %8091 }
0x4739   :  { %9752 = vmatmul.mubr.msk.f32.vlgmr.msra.gmra.mrb[62].mxu0 %vm189_vm0, %v8092_v14 }
0x473a   :  { %9958 = vmatpush3.bf16.msra.mxu0 %v11355_v52  ;;  %9773 = vmatprep.mubr.msk.f32.mxu0 %vm10377_vm1, %v10376_v8 }
0x473b   :  { %9959 = vmatprep.subr.bf16.mxu0 %v10393_v57 }
0x473e   :  { %9961 = vmatpush3.bf16.msra.mxu0 %v11358_v60 }
0x480c   :  { %v8161_v61 = vpop.f32.mrb[62].mxu0 }
0x480d   :  { %v8165_v50 = vadd.f32 %v8161_v61, %v7736_v55  ;;  %v9753_v1 = vpop.f32.mrb[63].mxu0  ;;  %v7737_v55 = vcombine.high %v11407_v53, %v11407_v53 }
0x480f   :  { %10236 = vtanh.f32 %v8165_v50  ;;  %v8929_v6 = vmul.f32 -1.442695, %v8165_v50  ;;  %v7751_v61 = vrot.slane %v7737_v55, %v10952_v21 }
0x4811   :  { %10238 = vpow2.f32 %v8929_v6 }
0x4819   :  { %v10237_v3 = vpop.eup %10236 }
0x481a   :  { %8175 = vrot.lane.b32.xlu0 %v10237_v3, %s10381_s4 }
0x481b   :  { %v10239_v44 = vpop.eup %10238 }
0x481c   :  { %v8169_v9 = vadd.f32 1.0, %v10239_v44 }
0x481e   :  { %10240 = vrcp.f32 %v8169_v9 }
0x4828   :  { %v10241_v11 = vpop.eup %10240 }
0x4829   :  { %v8173_v38 = vmul.f32 %v10241_v11, %v8076_v43 }
0x488c   :  { %v8176_v29 = vpop.permute.xlu0 %8175 }
0x488d   :  { %v8178_v35 = vmul.f32 %v10241_v11, %v8176_v29 }
0x488f   :  { %8180 = vrot.lane.b32.xlu1 %v8178_v35, %s10394_s9 }
0x4901   :  { %v8181_v16 = vpop.permute.xlu1 %8180 }
0x4902   :  { %v8183_v18 = vadd.f32 %v8181_v16, %v8173_v38 }
0x4904   :  { %10242 = vtanh.f32 %v8183_v18 }
0x490e   :  { %v10243_v4 = vpop.eup %10242 }
0x490f   :  { %8186 = vrot.lane.b32.xlu0 %v10243_v4, %s10381_s4 }
0x4981   :  { %v8187_v10 = vpop.permute.xlu0 %8186 }
0x4982   :  { %v8189_v19 = vmul.f32 %v10241_v11, %v8187_v10  ;;  %v8511_v10 = vld [vmem:[#allocation8 + $0x78] sm:$0xff] }
0x4984   :  { %v8197_v58 = vrot.slane %v8189_v19, %v10952_v21  ;;  %v8522_v20 = vcombine.low %v8082_v54, %v8189_v19  ;;  %v8513_v19 = vld [vmem:[#allocation8 + $0x178] sm:$0xff] }
0x4986   :  { %v11467_v48 = vrot.slane %v8522_v20, %v10952_v21  ;;  %8198 = vrot.lane.b32.xlu1 %v8197_v58, %s10394_s9  ;;  %v9968_v58 = vpack.c.bf16 %v8512_v45, %v8511_v10  ;;  %v8514_v20 = vld [vmem:[#allocation8 + $0x1f8] sm:$0xff] }
0x4988   :  { %v8537_v34 = vcombine.low %v11464_v51, %v11467_v48  ;;  %9969 = vmatprep.subr.bf16.mxu0 %v9968_v58 }
0x49f8   :  { %v8199_v22 = vpop.permute.xlu1 %8198 }
0x49f9   :  { %9763 = vmatmul.mubr.msk.f32.vlgmr.msra.gmra.mrb[82].mxu1 %vm189_vm0, %v8199_v22  ;;  %v9972_v22 = vpack.c.bf16 %v8514_v20, %v8513_v19 }
0x49fa   :  { %9964 = vmatpush3.bf16.msra.mxu1 %v11355_v52  ;;  %9784 = vmatprep.mubr.msk.f32.mxu1 %vm10377_vm1, %v10376_v8  ;;  %vm8742_vm1 = vcmask 130048  }
0x49fb   :  { %9965 = vmatprep.subr.bf16.mxu1 %v10393_v57 }
0x49fe   :  { %9967 = vmatpush3.bf16.msra.mxu1 %v11358_v60 }
0x4acc   :  { %v8268_v13 = vpop.f32.mrb[82].mxu1 }
0x4acd   :  { %v8272_v15 = vadd.f32 %v8268_v13, %v7744_v46  ;;  %v9764_v56 = vpop.f32.mrb[83].mxu1 }
0x4acf   :  { %10244 = vtanh.f32 %v8272_v15  ;;  %v8931_v2 = vmul.f32 -1.442695, %v8272_v15 }
0x4ad1   :  { %10246 = vpow2.f32 %v8931_v2  ;;  %v8936_v2 = vld [vmem:[#allocation10 + $0x19] ss:$0 sm:$0xff] }
0x4ad9   :  { %v10245_v25 = vpop.eup %10244 }
0x4ada   :  { %8282 = vrot.lane.b32.xlu0 %v10245_v25, %s10381_s4 }
0x4adb   :  { %v10247_v52 = vpop.eup %10246 }
0x4adc   :  { %v8276_v12 = vadd.f32 1.0, %v10247_v52 }
0x4ade   :  { %10248 = vrcp.f32 %v8276_v12 }
0x4ae8   :  { %v10249_v8 = vpop.eup %10248 }
0x4ae9   :  { %v8280_v60 = vmul.f32 %v10249_v8, %v8183_v18 }
0x4b4c   :  { %v8283_v28 = vpop.permute.xlu0 %8282 }
0x4b4d   :  { %v8285_v57 = vmul.f32 %v10249_v8, %v8283_v28 }
0x4b4f   :  { %8287 = vrot.lane.b32.xlu1 %v8285_v57, %s10394_s9 }
0x4bc1   :  { %v8288_v40 = vpop.permute.xlu1 %8287 }
0x4bc2   :  { %v8290_v31 = vadd.f32 %v8288_v40, %v8280_v60 }
0x4bc4   :  { %10250 = vtanh.f32 %v8290_v31 }
0x4bce   :  { %v10251_v32 = vpop.eup %10250 }
0x4bcf   :  { %8293 = vrot.lane.b32.xlu0 %v10251_v32, %s10381_s4 }
0x4c41   :  { %v8294_v26 = vpop.permute.xlu0 %8293 }
0x4c42   :  { %v11483_v59 = vmul.f32 %v10249_v8, %v8294_v26 }
0x4c44   :  { %v8304_v36 = vrot.slane %v11483_v59, %v10952_v21 }
0x4c46   :  { %8305 = vrot.lane.b32.xlu1 %v8304_v36, %s10394_s9 }
0x4cb8   :  { %v8306_v39 = vpop.permute.xlu1 %8305 }
0x4cb9   :  { %9774 = vmatmul.mubr.msk.f32.vlgmr.msra.gmra.mrb[64].mxu0 %vm189_vm0, %v8306_v39 }
0x4cba   :  { %9971 = vmatpush3.bf16.msra.mxu0 %v9968_v58 }
0x4cbb   :  { %9973 = vmatprep.subr.bf16.mxu0 %v9972_v22 }
0x4cbe   :  { %9975 = vmatpush3.bf16.msra.mxu0 %v9972_v22 }
0x4d8c   :  { %v8375_v63 = vpop.f32.mrb[64].mxu0 }
0x4d8d   :  { %v8379_v0 = vadd.f32 %v8375_v63, %v7752_v62  ;;  %v9775_v27 = vpop.f32.mrb[65].mxu0 }
0x4d8f   :  { %10252 = vtanh.f32 %v8379_v0  ;;  %v8933_v33 = vmul.f32 -1.442695, %v8379_v0 }
0x4d91   :  { %10254 = vpow2.f32 %v8933_v33 }
0x4d99   :  { %v10253_v7 = vpop.eup %10252 }
0x4d9a   :  { %8389 = vrot.lane.b32.xlu0 %v10253_v7, %s10381_s4 }
0x4d9b   :  { %v10255_v41 = vpop.eup %10254 }
0x4d9c   :  { %v8383_v42 = vadd.f32 1.0, %v10255_v41 }
0x4d9e   :  { %10256 = vrcp.f32 %v8383_v42 }
0x4da8   :  { %v10257_v30 = vpop.eup %10256 }
0x4da9   :  { %v8387_v37 = vmul.f32 %v10257_v30, %v8290_v31 }
0x4e0c   :  { %v8390_v47 = vpop.permute.xlu0 %8389 }
0x4e0d   :  { %v8392_v49 = vmul.f32 %v10257_v30, %v8390_v47 }
0x4e0f   :  { %8394 = vrot.lane.b32.xlu1 %v8392_v49, %s10394_s9 }
0x4e81   :  { %v8395_v17 = vpop.permute.xlu1 %8394 }
0x4e82   :  { %v8397_v43 = vadd.f32 %v8395_v17, %v8387_v37 }
0x4e84   :  { %10258 = vtanh.f32 %v8397_v43 }
0x4e8e   :  { %v10259_v23 = vpop.eup %10258 }
0x4e8f   :  { %8400 = vrot.lane.b32.xlu0 %v10259_v23, %s10381_s4 }
0x4f01   :  { %v8401_v5 = vpop.permute.xlu0 %8400 }
0x4f02   :  { %v8403_v54 = vmul.f32 %v10257_v30, %v8401_v5 }
0x4f04   :  { %v8411_v24 = vrot.slane %v8403_v54, %v10952_v21  ;;  %v8538_v51 = vcombine.low %v11483_v59, %v8403_v54 }
0x4f06   :  { %8412 = vrot.lane.b32.xlu1 %v8411_v24, %s10394_s9  ;;  %v8545_v13 = vrot.slane %v8538_v51, %v10952_v21 }
0x4f78   :  { %v8413_v14 = vpop.permute.xlu1 %8412 }
0x4f79   :  { %9785 = vmatmul.mubr.msk.f32.vlgmr.msra.gmra.mrb[84].mxu1 %vm189_vm0, %v8413_v14 }
0x504c   :  { %v8482_v50 = vpop.f32.mrb[84].mxu1 }
0x504d   :  { %v8486_v1 = vadd.f32 %v8482_v50, %v7751_v61  ;;  %v9786_v3 = vpop.f32.mrb[85].mxu1 }
0x504f   :  { %10260 = vtanh.f32 %v8486_v1  ;;  %v8935_v44 = vmul.f32 -1.442695, %v8486_v1 }
0x5051   :  { %10262 = vpow2.f32 %v8935_v44 }
0x5059   :  { %v10261_v6 = vpop.eup %10260 }
0x505a   :  { %8496 = vrot.lane.b32.xlu0 %v10261_v6, %s10381_s4 }
0x505b   :  { %v10263_v9 = vpop.eup %10262 }
0x505c   :  { %v8490_v11 = vadd.f32 1.0, %v10263_v9 }
0x505e   :  { %10264 = vrcp.f32 %v8490_v11 }
0x5068   :  { %v10265_v29 = vpop.eup %10264 }
0x5069   :  { %v8494_v53 = vmul.f32 %v10265_v29, %v8397_v43 }
0x50cc   :  { %v8497_v35 = vpop.permute.xlu0 %8496 }
0x50cd   :  { %v8499_v38 = vmul.f32 %v10265_v29, %v8497_v35 }
0x50cf   :  { %8501 = vrot.lane.b32.xlu1 %v8499_v38, %s10394_s9 }
0x50d3   :  { %8554 = vrot.lane.b32.xlu1 %v8537_v34, %s10394_s9 }
0x5141   :  { %v8502_v16 = vpop.permute.xlu1 %8501 }
0x5142   :  { %v8504_v18 = vadd.f32 %v8502_v16, %v8494_v53 }
0x5144   :  { %10266 = vtanh.f32 %v8504_v18 }
0x5145   :  { %v8555_v4 = vpop.permute.xlu1 %8554 }
0x5146   :  { %9795 = vmatprep.mubr.msk.f32.mxu0 %vm189_vm0, %v8555_v4 }
0x514e   :  { %v10267_v46 = vpop.eup %10266 }
0x514f   :  { %8507 = vrot.lane.b32.xlu0 %v10267_v46, %s10381_s4 }
0x51c1   :  { %v8508_v48 = vpop.permute.xlu0 %8507 }
0x51c2   :  { %v8510_v34 = vmul.f32 %v10265_v29, %v8508_v48 }
0x51c4   :  { %v8552_v15 = vrot.slane %v8510_v34, %v10952_v21 }
0x51c6   :  { %v8553_v56 = vcombine.low %v8545_v13, %v8552_v15 }
0x51c8   :  { %8556 = vrot.lane.b32.xlu0 %v8553_v56, %s10394_s9 }
0x523a   :  { %v8557_v25 = vpop.permute.xlu0 %8556 }
0x523b   :  { %9796 = vmatmul.mubr.msk.f32.vlgmr.msra.gmra.mrb[66].mxu0 %vm189_vm0, %v8557_v25 }
0x530e   :  { %v9797_v52 = vpop.f32.mrb[66].mxu0 }
0x530f   :  { %v8634_v12 = vadd.f32 %v9797_v52, %v8936_v2  ;;  %v8628_v8 = vpop.f32.mrb[67].mxu0 }
0x5310   :  { %v8629_v28 = vadd.f32 %v8936_v2, %v8628_v8 }
0x5311   :  { %v8663_v57 = vrot.slane %v8634_v12, %v10952_v21  ;;  %v8656_v39 = vcombine.high %v8634_v12, %v8634_v12 }
0x5312   :  { %v8639_v60 = vcombine.high %v8629_v28, %v8629_v28  ;;  %v8646_v40 = vrot.slane %v8629_v28, %v10952_v21 }
0x5313   :  { %v8718_v31 = vrot.slane %v8663_v57, %v10952_v21  ;;  %v8671_v63 = vcombine.high %v8663_v57, %v8663_v57  ;;  %v8670_v27 = vrot.slane %v8656_v39, %v10952_v21 }
0x5314   :  { %v8653_v32 = vrot.slane %v8639_v60, %v10952_v21  ;;  %v8654_v26 = vcombine.high %v8646_v40, %v8646_v40  ;;  %v8678_v62 = vrot.slane %v8646_v40, %v10952_v21 }
0x5315   :  { %8719 = vrot.lane.b32.xlu1 %v8718_v31, %s10386_s26  ;;  %v8728_v33 = vrot.slane %v8671_v63, %v10952_v21  ;;  %v8738_v41 = vrot.slane %v8670_v27, %v10952_v21 }
0x5316   :  { %v8655_v59 = vcombine.high %v8653_v32, %v8653_v32  ;;  %v8688_v36 = vrot.slane %v8654_v26, %v10952_v21  ;;  %v8698_v7 = vrot.slane %v8653_v32, %v10952_v21 }
0x5318   :  { %8689 = vrot.lane.b32.xlu0 %v8688_v36, %s10394_s9  ;;  %v8708_v0 = vrot.slane %v8655_v59, %v10952_v21 }
0x5319   :  { %8679 = vrot.lane.b32.xlu1 %v8678_v62, %s10395_s10 }
0x531c   :  { %8709 = vrot.lane.b32.xlu0 %v8708_v0, %s10381_s4 }
0x531d   :  { %8699 = vrot.lane.b32.xlu1 %v8698_v7, %s10387_s27 }
0x5320   :  { %8729 = vrot.lane.b32.xlu0 %v8728_v33, %s10378_s21 }
0x5321   :  { %8739 = vrot.lane.b32.xlu1 %v8738_v41, %s10385_s25 }
0x5387   :  { %v8720_v42 = vpop.permute.xlu1 %8719 }
0x538a   :  { %v8690_v30 = vpop.permute.xlu0 %8689 }
0x538b   :  { %v8680_v47 = vpop.permute.xlu1 %8679 }
0x538c   :  { %v8743_v49 = vsel %vm8742_vm1, 0.0, %v8680_v47 }
0x538d   :  { %v8744_v17 = vsel %vm189_vm0, %v8743_v49, %v8690_v30 }
0x538e   :  { %v8710_v37 = vpop.permute.xlu0 %8709 }
0x538f   :  { %v8700_v43 = vpop.permute.xlu1 %8699 }
0x5390   :  { %v8746_v23 = vsel %vm8745_vm12, %v8744_v17, %v8700_v43 }
0x5391   :  { %v8748_v5 = vsel %vm8747_vm13, %v8746_v23, %v8710_v37 }
0x5392   :  { %v8750_v21 = vsel %vm8749_vm14, %v8748_v5, %v8720_v42  ;;  %v8730_v54 = vpop.permute.xlu0 %8729 }
0x5393   :  { %v8752_v24 = vsel %vm8751_vm15, %v8750_v21, %v8730_v54  ;;  %v8740_v14 = vpop.permute.xlu1 %8739 }
0x5394   :  { %v8754_v55 = vsel %vm8753_vm3, %v8752_v24, %v8740_v14 }
0x5395   :  { %8755 = vst [vmem:[%s11538_s6] sm:$0x3] %v8754_v55 }
0x5396   :  { %8760 = vsyncpa [#allocation3], 1 }
0x5397   :  { %8761 = vsyncpa [#allocation9], 1 }
0x5398   :  { %8762 = vsyncpa [#allocation4], 1 }
0x5399   :  { %8763 = vsyncpa [#allocation7], 1 }

</bundles_post_ra>
